<compile_context>
chip_gen: v7x
topology: tpu7x:2x2x1
jax: 0.10.0
libtpu: 0.0.40
codegen_flags: <defaults>
</compile_context>

<pallas_src>
from functools import partial

import jax
import jax.numpy as jnp
from jax.experimental import pallas as pl
from jax.experimental.pallas import tpu as pltpu


def _round_up(n, m):
    return ((n + m - 1) // m) * m


# ----------------------------------------------------------------------------
# Fused kernel: one batch TILE per program (batch folded into GEMM M)
# ----------------------------------------------------------------------------
def fused_dqn_kernel(p1_ref, w1_ref, b1_ref, w2_ref, b2_ref,
                     w1cat_ref, b1cat_ref, wq_ref, bq_ref, out_ref):
    # p1_ref   : (L1, TB, K1*C_in) bf16  conv1 im2col patches, position-major layout
    # w1_ref   : (K1*C_in, O1)     bf16
    # b1_ref   : (1, O1)           f32
    # w2_ref   : (K2, O1, O2)      bf16  conv2 weight split per tap
    # b2_ref   : (1, O2)           f32
    # w1cat_ref: (L2, O2, 2H)      bf16  [fc_val[0] | fc_adv[0]] split per position
    # b1cat_ref: (1, 2H)           f32
    # wq_ref   : (2H, A_pad)       bf16  second FC layers + dueling combine, folded
    # bq_ref   : (1, A_pad)        f32
    # out_ref  : (TB, A_pad)       f32
    L1, TB, K1C = p1_ref.shape
    K2, O1, O2 = w2_ref.shape
    L2, _, H2 = w1cat_ref.shape

    # --- Conv1 + ReLU: single GEMM, batch folded into M ----------------------
    m1 = p1_ref[...].reshape(L1 * TB, K1C)                       # tile-aligned merge
    h1 = jnp.maximum(
        jnp.dot(m1, w1_ref[...], preferred_element_type=jnp.float32)
        + b1_ref[...], 0.0)                                      # (L1*TB, O1) f32
    h1 = h1.astype(jnp.bfloat16).reshape(L1, TB, O1)

    # --- Conv2 + ReLU: K-split accumulating matmuls (no im2col buffer,
    #     window slices are on the leading axis -> no relayout) ---------------
    acc = jnp.dot(h1[0:L2].reshape(L2 * TB, O1), w2_ref[0],
                  preferred_element_type=jnp.float32)
    for k in range(1, K2):
        acc = acc + jnp.dot(h1[k:k + L2].reshape(L2 * TB, O1), w2_ref[k],
                            preferred_element_type=jnp.float32)
    h2 = jnp.maximum(acc + b2_ref[...], 0.0)                     # (L2*TB, O2) f32
    h2 = h2.astype(jnp.bfloat16).reshape(L2, TB, O2)

    # --- Dueling FC1 (val|adv fused): K-split over the L2 positions ----------
    acc = jnp.dot(h2[0], w1cat_ref[0], preferred_element_type=jnp.float32)
    for j in range(1, L2):
        acc = acc + jnp.dot(h2[j], w1cat_ref[j],
                            preferred_element_type=jnp.float32)
    hcat = jnp.maximum(acc + b1cat_ref[...], 0.0).astype(jnp.bfloat16)  # (TB, 2H)

    # --- FC2 + dueling combine (folded into wq/bq); lane-dense store ---------
    q = jnp.dot(hcat, wq_ref[...], preferred_element_type=jnp.float32) + bq_ref[...]
    out_ref[...] = q.astype(out_ref.dtype)                       # (TB, A_pad)


# ----------------------------------------------------------------------------
# One-time parameter preparation (hoisted out of the per-call forward)
# ----------------------------------------------------------------------------
def prepare_params(p):
    O1, C_in, K1 = p["w1"].shape
    O2, _, K2 = p["w2"].shape
    H, F = p["wv1"].shape
    A = p["wa2"].shape[0]
    L2 = F // O2
    A_pad = _round_up(A, 128)

    # Conv1 weight -> im2col layout (K1*C_in, O1); conv2 weight -> per-tap (K2, O1, O2)
    w1f = jnp.transpose(p["w1"], (2, 1, 0)).reshape(K1 * C_in, O1).astype(jnp.bfloat16)
    w2f = jnp.transpose(p["w2"], (2, 1, 0)).astype(jnp.bfloat16)            # (K2, O1, O2)

    def split_fc1(w):
        # PyTorch flatten index = o*L2 + j (channel-major).  Split per position j
        # so the kernel does hcat += h2[j] @ w1cat[j] with no lane concat.
        return jnp.transpose(w.reshape(H, O2, L2), (2, 1, 0))               # (L2, O2, H)

    w1cat = jnp.concatenate([split_fc1(p["wv1"]), split_fc1(p["wa1"])],
                            axis=-1).astype(jnp.bfloat16)                   # (L2, O2, 2H)
    b1cat = jnp.concatenate([p["bv1"], p["ba1"]]).reshape(1, 2 * H)

    # Fold second FC layers + dueling combine:
    #   q = val + adv - mean(adv)
    #     = hv @ wv2^T (broadcast over actions) + ha @ (wa2 - mean_a wa2)^T
    #       + (bv2 + ba2 - mean(ba2))
    wv2_blk = jnp.broadcast_to(p["wv2"].T, (H, A))
    wa2_blk = (p["wa2"] - jnp.mean(p["wa2"], axis=0, keepdims=True)).T
    wq = jnp.concatenate([wv2_blk, wa2_blk], axis=0)                        # (2H, A)
    bq = (p["bv2"] + p["ba2"] - jnp.mean(p["ba2"])).reshape(1, A)
    # Pad the action dim to 128 lanes -> dense (TB, 128) output store.
    wq = jnp.pad(wq, ((0, 0), (0, A_pad - A))).astype(jnp.bfloat16)
    bq = jnp.pad(bq, ((0, 0), (0, A_pad - A)))

    return {"w1f": w1f, "b1": p["b1"].reshape(1, O1),
            "w2f": w2f, "b2": p["b2"].reshape(1, O2),
            "w1cat": w1cat, "b1cat": b1cat, "wq": wq, "bq": bq}


# ----------------------------------------------------------------------------
# Forward wrapper
# ----------------------------------------------------------------------------
@partial(jax.jit, static_argnames=("actions_n", "block_b"))
def dqn_conv1d_forward(x, pp, *, actions_n, block_b=256):
    """x: (B, C_in, L) float32 (PyTorch NCW).  Returns Q-values (B, actions_n)."""
    B, C_in, L = x.shape
    K1C, O1 = pp["w1f"].shape
    K2, _, O2 = pp["w2f"].shape
    L2, _, H2 = pp["w1cat"].shape
    A_pad = pp["wq"].shape[1]
    K1 = K1C // C_in
    L1 = L - K1 + 1
    assert L1 - K2 + 1 == L2

    # Batch tile: multiple of 8, capped at 256 (fills v6e/v7x 256-row MXU tiles).
    TB = min(block_b, _round_up(B, 8))
    B_pad = _round_up(B, TB)
    if B_pad != B:
        x = jnp.pad(x, ((0, B_pad - B), (0, 0), (0, 0)))

    # (position, batch, channel) layout: every in-kernel window slice / position
    # index is on the leading (untiled) axis -> no sublane/lane relayouts.
    x_lbc = jnp.transpose(x, (2, 0, 1))                                      # (L, B_pad, C_in)
    patches1 = jnp.concatenate([x_lbc[k:k + L1] for k in range(K1)],
                               axis=-1).astype(jnp.bfloat16)                 # (L1, B_pad, K1*C_in)

    out = pl.pallas_call(
        fused_dqn_kernel,
        out_shape=jax.ShapeDtypeStruct((B_pad, A_pad), jnp.float32),
        grid=(B_pad // TB,),
        in_specs=[
            pl.BlockSpec((L1, TB, K1C), lambda b: (0, b, 0)),
            # Grid-invariant weights (constant index_map): DMA'd once; bf16 halves
            # their (double-buffered) VMEM footprint — comfortable on v7x's 64 MiB.
            pl.BlockSpec((K1C, O1), lambda b: (0, 0)),
            pl.BlockSpec((1, O1), lambda b: (0, 0)),
            pl.BlockSpec((K2, O1, O2), lambda b: (0, 0, 0)),
            pl.BlockSpec((1, O2), lambda b: (0, 0)),
            pl.BlockSpec((L2, O2, H2), lambda b: (0, 0, 0)),
            pl.BlockSpec((1, H2), lambda b: (0, 0)),
            pl.BlockSpec((H2, A_pad), lambda b: (0, 0)),
            pl.BlockSpec((1, A_pad), lambda b: (0, 0)),
        ],
        out_specs=pl.BlockSpec((TB, A_pad), lambda b: (b, 0)),
        compiler_params=pltpu.CompilerParams(
            dimension_semantics=("parallel",),
            vmem_limit_bytes=32 * 1024 * 1024),
    )(patches1, pp["w1f"], pp["b1"], pp["w2f"], pp["b2"],
      pp["w1cat"], pp["b1cat"], pp["wq"], pp["bq"])
    return out[:B, :actions_n]


# ----------------------------------------------------------------------------
# Pure-JAX reference (mirrors the PyTorch forward) for correctness checking
# ----------------------------------------------------------------------------
def _conv1d_ref(x, w, b):
    # x: (B, C, L), w: (O, C, K) (PyTorch layout), valid padding, stride 1
    K = w.shape[2]
    Lout = x.shape[2] - K + 1
    patches = jnp.stack([x[:, :, k:k + Lout] for k in range(K)], axis=-1)   # (B,C,Lout,K)
    return jnp.einsum("bclk,ock->bol", patches, w) + b[None, :, None]


def dqn_conv1d_reference(x, p):
    h = jnp.maximum(_conv1d_ref(x, p["w1"], p["b1"]), 0.0)
    h = jnp.maximum(_conv1d_ref(h, p["w2"], p["b2"]), 0.0)
    flat = h.reshape(x.shape[0], -1)
    hv = jnp.maximum(flat @ p["wv1"].T + p["bv1"], 0.0)
    val = hv @ p["wv2"].T + p["bv2"]
    ha = jnp.maximum(flat @ p["wa1"].T + p["ba1"], 0.0)
    adv = ha @ p["wa2"].T + p["ba2"]
    return val + adv - jnp.mean(adv, axis=1, keepdims=True)


# ----------------------------------------------------------------------------
def init_params(key, c_in, seq_len, actions_n):
    K1 = K2 = 5
    O1 = O2 = 128
    L2 = seq_len - K1 + 1 - K2 + 1
    out_size = O2 * L2
    hidden = 512
    ks = jax.random.split(key, 12)
    s = 0.05
    return {
        "w1": jax.random.normal(ks[0], (O1, c_in, K1), jnp.float32) * s,
        "b1": jax.random.normal(ks[1], (O1,), jnp.float32) * s,
        "w2": jax.random.normal(ks[2], (O2, O1, K2), jnp.float32) * s,
        "b2": jax.random.normal(ks[3], (O2,), jnp.float32) * s,
        "wv1": jax.random.normal(ks[4], (hidden, out_size), jnp.float32) * s,
        "bv1": jax.random.normal(ks[5], (hidden,), jnp.float32) * s,
        "wv2": jax.random.normal(ks[6], (1, hidden), jnp.float32) * s,
        "bv2": jax.random.normal(ks[7], (1,), jnp.float32) * s,
        "wa1": jax.random.normal(ks[8], (hidden, out_size), jnp.float32) * s,
        "ba1": jax.random.normal(ks[9], (hidden,), jnp.float32) * s,
        "wa2": jax.random.normal(ks[10], (actions_n, hidden), jnp.float32) * s,
        "ba2": jax.random.normal(ks[11], (actions_n,), jnp.float32) * s,
    }


if __name__ == "__main__":
    B, C_IN, L, ACTIONS = 2, 4, 16, 3   # shape=(4, 16), actions_n=3

    key = jax.random.PRNGKey(0)
    k_x, k_p = jax.random.split(key)
    x = jax.random.normal(k_x, (B, C_IN, L), jnp.float32)
    params = init_params(k_p, C_IN, L, ACTIONS)
    prepped = prepare_params(params)       # one-time weight preprocessing

    q = dqn_conv1d_forward(x, prepped, actions_n=ACTIONS)
    q = jax.block_until_ready(q)

    q_ref = dqn_conv1d_reference(x, params)
    assert q.shape == (B, ACTIONS), q.shape
    # bf16 MXU operands (f32 accumulation) -> loosened tolerance vs. the f32 version.
    assert jnp.allclose(q, q_ref, atol=3e-2, rtol=3e-2), (q, q_ref)

    print("KERNEL_OK")
</pallas_src>

<mosaic_0001>
module attributes {stable_mosaic.version = 11 : i64} {
  func.func @fused_dqn_kernel(%arg0: i32, %arg1: memref<12x8x20xbf16, #tpu.memory_space<vmem>>, %arg2: memref<20x128xbf16, #tpu.memory_space<vmem>>, %arg3: memref<1x128xf32, #tpu.memory_space<vmem>>, %arg4: memref<5x128x128xbf16, #tpu.memory_space<vmem>>, %arg5: memref<1x128xf32, #tpu.memory_space<vmem>>, %arg6: memref<8x128x1024xbf16, #tpu.memory_space<vmem>>, %arg7: memref<1x1024xf32, #tpu.memory_space<vmem>>, %arg8: memref<1024x128xbf16, #tpu.memory_space<vmem>>, %arg9: memref<1x128xf32, #tpu.memory_space<vmem>>, %arg10: memref<8x128xf32, #tpu.memory_space<vmem>>) attributes {dimension_semantics = [#tpu.dimension_semantics<parallel>], iteration_bounds = array<i64: 1>, scalar_prefetch = 0 : i64, scratch_operands = 0 : i64, tpu.core_type = #tpu.core_type<tc>, window_params = [{transform_indices = @transform_0, window_bounds = array<i64: 12, 8, 20>}, {pipeline_mode = #tpu.pipeline_mode<synchronous>, transform_indices = @transform_1, window_bounds = array<i64: 20, 128>}, {pipeline_mode = #tpu.pipeline_mode<synchronous>, transform_indices = @transform_2, window_bounds = array<i64: 1, 128>}, {pipeline_mode = #tpu.pipeline_mode<synchronous>, transform_indices = @transform_3, window_bounds = array<i64: 5, 128, 128>}, {pipeline_mode = #tpu.pipeline_mode<synchronous>, transform_indices = @transform_4, window_bounds = array<i64: 1, 128>}, {pipeline_mode = #tpu.pipeline_mode<synchronous>, transform_indices = @transform_5, window_bounds = array<i64: 8, 128, 1024>}, {pipeline_mode = #tpu.pipeline_mode<synchronous>, transform_indices = @transform_6, window_bounds = array<i64: 1, 1024>}, {pipeline_mode = #tpu.pipeline_mode<synchronous>, transform_indices = @transform_7, window_bounds = array<i64: 1024, 128>}, {pipeline_mode = #tpu.pipeline_mode<synchronous>, transform_indices = @transform_8, window_bounds = array<i64: 1, 128>}, {transform_indices = @transform_9, window_bounds = array<i64: 8, 128>}]} {
    %c0 = arith.constant 0 : index
    %c0_0 = arith.constant 0 : index
    %c0_1 = arith.constant 0 : index
    %0 = vector.load %arg1[%c0, %c0_0, %c0_1] : memref<12x8x20xbf16, #tpu.memory_space<vmem>>, vector<12x8x20xbf16>
    %1 = vector.shape_cast %0 : vector<12x8x20xbf16> to vector<96x20xbf16>
    %c0_2 = arith.constant 0 : index
    %c0_3 = arith.constant 0 : index
    %2 = vector.load %arg2[%c0_2, %c0_3] : memref<20x128xbf16, #tpu.memory_space<vmem>>, vector<20x128xbf16>
    %cst = arith.constant dense<0.000000e+00> : vector<96x128xf32>
    %3 = tpu.matmul %1, %2, %cst {dimension_numbers = #tpu.dot_dimension_numbers<[1], [0], [0], [1], [0, 0, 1, 1], [], []>} : vector<96x20xbf16>, vector<20x128xbf16>, vector<96x128xf32> -> vector<96x128xf32>
    %c0_4 = arith.constant 0 : index
    %c0_5 = arith.constant 0 : index
    %4 = vector.load %arg3[%c0_4, %c0_5] : memref<1x128xf32, #tpu.memory_space<vmem>>, vector<1x128xf32>
    %5 = vector.broadcast %4 : vector<1x128xf32> to vector<96x128xf32>
    %6 = arith.addf %3, %5 : vector<96x128xf32>
    %cst_6 = arith.constant 0.000000e+00 : f32
    %7 = vector.broadcast %cst_6 : f32 to vector<96x128xf32>
    %8 = arith.maximumf %6, %7 : vector<96x128xf32>
    %9 = arith.truncf %8 : vector<96x128xf32> to vector<96x128xbf16>
    %10 = vector.shape_cast %9 : vector<96x128xbf16> to vector<12x8x128xbf16>
    %11 = vector.extract_strided_slice %10 {offsets = [0, 0, 0], sizes = [8, 8, 128], strides = [1, 1, 1]} : vector<12x8x128xbf16> to vector<8x8x128xbf16>
    %12 = vector.shape_cast %11 : vector<8x8x128xbf16> to vector<64x128xbf16>
    %c0_7 = arith.constant 0 : index
    %c0_8 = arith.constant 0 : index
    %c0_9 = arith.constant 0 : index
    %13 = vector.load %arg4[%c0_7, %c0_8, %c0_9] : memref<5x128x128xbf16, #tpu.memory_space<vmem>>, vector<1x128x128xbf16>
    %14 = vector.shape_cast %13 : vector<1x128x128xbf16> to vector<128x128xbf16>
    %cst_10 = arith.constant dense<0.000000e+00> : vector<64x128xf32>
    %15 = tpu.matmul %12, %14, %cst_10 {dimension_numbers = #tpu.dot_dimension_numbers<[1], [0], [0], [1], [0, 0, 1, 1], [], []>} : vector<64x128xbf16>, vector<128x128xbf16>, vector<64x128xf32> -> vector<64x128xf32>
    %16 = vector.extract_strided_slice %10 {offsets = [1, 0, 0], sizes = [8, 8, 128], strides = [1, 1, 1]} : vector<12x8x128xbf16> to vector<8x8x128xbf16>
    %17 = vector.shape_cast %16 : vector<8x8x128xbf16> to vector<64x128xbf16>
    %c1 = arith.constant 1 : index
    %c0_11 = arith.constant 0 : index
    %c0_12 = arith.constant 0 : index
    %18 = vector.load %arg4[%c1, %c0_11, %c0_12] : memref<5x128x128xbf16, #tpu.memory_space<vmem>>, vector<1x128x128xbf16>
    %19 = vector.shape_cast %18 : vector<1x128x128xbf16> to vector<128x128xbf16>
    %cst_13 = arith.constant dense<0.000000e+00> : vector<64x128xf32>
    %20 = tpu.matmul %17, %19, %cst_13 {dimension_numbers = #tpu.dot_dimension_numbers<[1], [0], [0], [1], [0, 0, 1, 1], [], []>} : vector<64x128xbf16>, vector<128x128xbf16>, vector<64x128xf32> -> vector<64x128xf32>
    %21 = arith.addf %15, %20 : vector<64x128xf32>
    %22 = vector.extract_strided_slice %10 {offsets = [2, 0, 0], sizes = [8, 8, 128], strides = [1, 1, 1]} : vector<12x8x128xbf16> to vector<8x8x128xbf16>
    %23 = vector.shape_cast %22 : vector<8x8x128xbf16> to vector<64x128xbf16>
    %c2 = arith.constant 2 : index
    %c0_14 = arith.constant 0 : index
    %c0_15 = arith.constant 0 : index
    %24 = vector.load %arg4[%c2, %c0_14, %c0_15] : memref<5x128x128xbf16, #tpu.memory_space<vmem>>, vector<1x128x128xbf16>
    %25 = vector.shape_cast %24 : vector<1x128x128xbf16> to vector<128x128xbf16>
    %cst_16 = arith.constant dense<0.000000e+00> : vector<64x128xf32>
    %26 = tpu.matmul %23, %25, %cst_16 {dimension_numbers = #tpu.dot_dimension_numbers<[1], [0], [0], [1], [0, 0, 1, 1], [], []>} : vector<64x128xbf16>, vector<128x128xbf16>, vector<64x128xf32> -> vector<64x128xf32>
    %27 = arith.addf %21, %26 : vector<64x128xf32>
    %28 = vector.extract_strided_slice %10 {offsets = [3, 0, 0], sizes = [8, 8, 128], strides = [1, 1, 1]} : vector<12x8x128xbf16> to vector<8x8x128xbf16>
    %29 = vector.shape_cast %28 : vector<8x8x128xbf16> to vector<64x128xbf16>
    %c3 = arith.constant 3 : index
    %c0_17 = arith.constant 0 : index
    %c0_18 = arith.constant 0 : index
    %30 = vector.load %arg4[%c3, %c0_17, %c0_18] : memref<5x128x128xbf16, #tpu.memory_space<vmem>>, vector<1x128x128xbf16>
    %31 = vector.shape_cast %30 : vector<1x128x128xbf16> to vector<128x128xbf16>
    %cst_19 = arith.constant dense<0.000000e+00> : vector<64x128xf32>
    %32 = tpu.matmul %29, %31, %cst_19 {dimension_numbers = #tpu.dot_dimension_numbers<[1], [0], [0], [1], [0, 0, 1, 1], [], []>} : vector<64x128xbf16>, vector<128x128xbf16>, vector<64x128xf32> -> vector<64x128xf32>
    %33 = arith.addf %27, %32 : vector<64x128xf32>
    %34 = vector.extract_strided_slice %10 {offsets = [4, 0, 0], sizes = [8, 8, 128], strides = [1, 1, 1]} : vector<12x8x128xbf16> to vector<8x8x128xbf16>
    %35 = vector.shape_cast %34 : vector<8x8x128xbf16> to vector<64x128xbf16>
    %c4 = arith.constant 4 : index
    %c0_20 = arith.constant 0 : index
    %c0_21 = arith.constant 0 : index
    %36 = vector.load %arg4[%c4, %c0_20, %c0_21] : memref<5x128x128xbf16, #tpu.memory_space<vmem>>, vector<1x128x128xbf16>
    %37 = vector.shape_cast %36 : vector<1x128x128xbf16> to vector<128x128xbf16>
    %cst_22 = arith.constant dense<0.000000e+00> : vector<64x128xf32>
    %38 = tpu.matmul %35, %37, %cst_22 {dimension_numbers = #tpu.dot_dimension_numbers<[1], [0], [0], [1], [0, 0, 1, 1], [], []>} : vector<64x128xbf16>, vector<128x128xbf16>, vector<64x128xf32> -> vector<64x128xf32>
    %39 = arith.addf %33, %38 : vector<64x128xf32>
    %c0_23 = arith.constant 0 : index
    %c0_24 = arith.constant 0 : index
    %40 = vector.load %arg5[%c0_23, %c0_24] : memref<1x128xf32, #tpu.memory_space<vmem>>, vector<1x128xf32>
    %41 = vector.broadcast %40 : vector<1x128xf32> to vector<64x128xf32>
    %42 = arith.addf %39, %41 : vector<64x128xf32>
    %cst_25 = arith.constant 0.000000e+00 : f32
    %43 = vector.broadcast %cst_25 : f32 to vector<64x128xf32>
    %44 = arith.maximumf %42, %43 : vector<64x128xf32>
    %45 = arith.truncf %44 : vector<64x128xf32> to vector<64x128xbf16>
    %46 = vector.shape_cast %45 : vector<64x128xbf16> to vector<8x8x128xbf16>
    %47 = vector.extract_strided_slice %46 {offsets = [0, 0, 0], sizes = [1, 8, 128], strides = [1, 1, 1]} : vector<8x8x128xbf16> to vector<1x8x128xbf16>
    %48 = vector.shape_cast %47 : vector<1x8x128xbf16> to vector<8x128xbf16>
    %c0_26 = arith.constant 0 : index
    %c0_27 = arith.constant 0 : index
    %c0_28 = arith.constant 0 : index
    %49 = vector.load %arg6[%c0_26, %c0_27, %c0_28] : memref<8x128x1024xbf16, #tpu.memory_space<vmem>>, vector<1x128x1024xbf16>
    %50 = vector.shape_cast %49 : vector<1x128x1024xbf16> to vector<128x1024xbf16>
    %cst_29 = arith.constant dense<0.000000e+00> : vector<8x1024xf32>
    %51 = tpu.matmul %48, %50, %cst_29 {dimension_numbers = #tpu.dot_dimension_numbers<[1], [0], [0], [1], [0, 0, 1, 1], [], []>} : vector<8x128xbf16>, vector<128x1024xbf16>, vector<8x1024xf32> -> vector<8x1024xf32>
    %52 = vector.extract_strided_slice %46 {offsets = [1, 0, 0], sizes = [1, 8, 128], strides = [1, 1, 1]} : vector<8x8x128xbf16> to vector<1x8x128xbf16>
    %53 = vector.shape_cast %52 : vector<1x8x128xbf16> to vector<8x128xbf16>
    %c1_30 = arith.constant 1 : index
    %c0_31 = arith.constant 0 : index
    %c0_32 = arith.constant 0 : index
    %54 = vector.load %arg6[%c1_30, %c0_31, %c0_32] : memref<8x128x1024xbf16, #tpu.memory_space<vmem>>, vector<1x128x1024xbf16>
    %55 = vector.shape_cast %54 : vector<1x128x1024xbf16> to vector<128x1024xbf16>
    %cst_33 = arith.constant dense<0.000000e+00> : vector<8x1024xf32>
    %56 = tpu.matmul %53, %55, %cst_33 {dimension_numbers = #tpu.dot_dimension_numbers<[1], [0], [0], [1], [0, 0, 1, 1], [], []>} : vector<8x128xbf16>, vector<128x1024xbf16>, vector<8x1024xf32> -> vector<8x1024xf32>
    %57 = arith.addf %51, %56 : vector<8x1024xf32>
    %58 = vector.extract_strided_slice %46 {offsets = [2, 0, 0], sizes = [1, 8, 128], strides = [1, 1, 1]} : vector<8x8x128xbf16> to vector<1x8x128xbf16>
    %59 = vector.shape_cast %58 : vector<1x8x128xbf16> to vector<8x128xbf16>
    %c2_34 = arith.constant 2 : index
    %c0_35 = arith.constant 0 : index
    %c0_36 = arith.constant 0 : index
    %60 = vector.load %arg6[%c2_34, %c0_35, %c0_36] : memref<8x128x1024xbf16, #tpu.memory_space<vmem>>, vector<1x128x1024xbf16>
    %61 = vector.shape_cast %60 : vector<1x128x1024xbf16> to vector<128x1024xbf16>
    %cst_37 = arith.constant dense<0.000000e+00> : vector<8x1024xf32>
    %62 = tpu.matmul %59, %61, %cst_37 {dimension_numbers = #tpu.dot_dimension_numbers<[1], [0], [0], [1], [0, 0, 1, 1], [], []>} : vector<8x128xbf16>, vector<128x1024xbf16>, vector<8x1024xf32> -> vector<8x1024xf32>
    %63 = arith.addf %57, %62 : vector<8x1024xf32>
    %64 = vector.extract_strided_slice %46 {offsets = [3, 0, 0], sizes = [1, 8, 128], strides = [1, 1, 1]} : vector<8x8x128xbf16> to vector<1x8x128xbf16>
    %65 = vector.shape_cast %64 : vector<1x8x128xbf16> to vector<8x128xbf16>
    %c3_38 = arith.constant 3 : index
    %c0_39 = arith.constant 0 : index
    %c0_40 = arith.constant 0 : index
    %66 = vector.load %arg6[%c3_38, %c0_39, %c0_40] : memref<8x128x1024xbf16, #tpu.memory_space<vmem>>, vector<1x128x1024xbf16>
    %67 = vector.shape_cast %66 : vector<1x128x1024xbf16> to vector<128x1024xbf16>
    %cst_41 = arith.constant dense<0.000000e+00> : vector<8x1024xf32>
    %68 = tpu.matmul %65, %67, %cst_41 {dimension_numbers = #tpu.dot_dimension_numbers<[1], [0], [0], [1], [0, 0, 1, 1], [], []>} : vector<8x128xbf16>, vector<128x1024xbf16>, vector<8x1024xf32> -> vector<8x1024xf32>
    %69 = arith.addf %63, %68 : vector<8x1024xf32>
    %70 = vector.extract_strided_slice %46 {offsets = [4, 0, 0], sizes = [1, 8, 128], strides = [1, 1, 1]} : vector<8x8x128xbf16> to vector<1x8x128xbf16>
    %71 = vector.shape_cast %70 : vector<1x8x128xbf16> to vector<8x128xbf16>
    %c4_42 = arith.constant 4 : index
    %c0_43 = arith.constant 0 : index
    %c0_44 = arith.constant 0 : index
    %72 = vector.load %arg6[%c4_42, %c0_43, %c0_44] : memref<8x128x1024xbf16, #tpu.memory_space<vmem>>, vector<1x128x1024xbf16>
    %73 = vector.shape_cast %72 : vector<1x128x1024xbf16> to vector<128x1024xbf16>
    %cst_45 = arith.constant dense<0.000000e+00> : vector<8x1024xf32>
    %74 = tpu.matmul %71, %73, %cst_45 {dimension_numbers = #tpu.dot_dimension_numbers<[1], [0], [0], [1], [0, 0, 1, 1], [], []>} : vector<8x128xbf16>, vector<128x1024xbf16>, vector<8x1024xf32> -> vector<8x1024xf32>
    %75 = arith.addf %69, %74 : vector<8x1024xf32>
    %76 = vector.extract_strided_slice %46 {offsets = [5, 0, 0], sizes = [1, 8, 128], strides = [1, 1, 1]} : vector<8x8x128xbf16> to vector<1x8x128xbf16>
    %77 = vector.shape_cast %76 : vector<1x8x128xbf16> to vector<8x128xbf16>
    %c5 = arith.constant 5 : index
    %c0_46 = arith.constant 0 : index
    %c0_47 = arith.constant 0 : index
    %78 = vector.load %arg6[%c5, %c0_46, %c0_47] : memref<8x128x1024xbf16, #tpu.memory_space<vmem>>, vector<1x128x1024xbf16>
    %79 = vector.shape_cast %78 : vector<1x128x1024xbf16> to vector<128x1024xbf16>
    %cst_48 = arith.constant dense<0.000000e+00> : vector<8x1024xf32>
    %80 = tpu.matmul %77, %79, %cst_48 {dimension_numbers = #tpu.dot_dimension_numbers<[1], [0], [0], [1], [0, 0, 1, 1], [], []>} : vector<8x128xbf16>, vector<128x1024xbf16>, vector<8x1024xf32> -> vector<8x1024xf32>
    %81 = arith.addf %75, %80 : vector<8x1024xf32>
    %82 = vector.extract_strided_slice %46 {offsets = [6, 0, 0], sizes = [1, 8, 128], strides = [1, 1, 1]} : vector<8x8x128xbf16> to vector<1x8x128xbf16>
    %83 = vector.shape_cast %82 : vector<1x8x128xbf16> to vector<8x128xbf16>
    %c6 = arith.constant 6 : index
    %c0_49 = arith.constant 0 : index
    %c0_50 = arith.constant 0 : index
    %84 = vector.load %arg6[%c6, %c0_49, %c0_50] : memref<8x128x1024xbf16, #tpu.memory_space<vmem>>, vector<1x128x1024xbf16>
    %85 = vector.shape_cast %84 : vector<1x128x1024xbf16> to vector<128x1024xbf16>
    %cst_51 = arith.constant dense<0.000000e+00> : vector<8x1024xf32>
    %86 = tpu.matmul %83, %85, %cst_51 {dimension_numbers = #tpu.dot_dimension_numbers<[1], [0], [0], [1], [0, 0, 1, 1], [], []>} : vector<8x128xbf16>, vector<128x1024xbf16>, vector<8x1024xf32> -> vector<8x1024xf32>
    %87 = arith.addf %81, %86 : vector<8x1024xf32>
    %88 = vector.extract_strided_slice %46 {offsets = [7, 0, 0], sizes = [1, 8, 128], strides = [1, 1, 1]} : vector<8x8x128xbf16> to vector<1x8x128xbf16>
    %89 = vector.shape_cast %88 : vector<1x8x128xbf16> to vector<8x128xbf16>
    %c7 = arith.constant 7 : index
    %c0_52 = arith.constant 0 : index
    %c0_53 = arith.constant 0 : index
    %90 = vector.load %arg6[%c7, %c0_52, %c0_53] : memref<8x128x1024xbf16, #tpu.memory_space<vmem>>, vector<1x128x1024xbf16>
    %91 = vector.shape_cast %90 : vector<1x128x1024xbf16> to vector<128x1024xbf16>
    %cst_54 = arith.constant dense<0.000000e+00> : vector<8x1024xf32>
    %92 = tpu.matmul %89, %91, %cst_54 {dimension_numbers = #tpu.dot_dimension_numbers<[1], [0], [0], [1], [0, 0, 1, 1], [], []>} : vector<8x128xbf16>, vector<128x1024xbf16>, vector<8x1024xf32> -> vector<8x1024xf32>
    %93 = arith.addf %87, %92 : vector<8x1024xf32>
    %c0_55 = arith.constant 0 : index
    %c0_56 = arith.constant 0 : index
    %94 = vector.load %arg7[%c0_55, %c0_56] : memref<1x1024xf32, #tpu.memory_space<vmem>>, vector<1x1024xf32>
    %95 = vector.broadcast %94 : vector<1x1024xf32> to vector<8x1024xf32>
    %96 = arith.addf %93, %95 : vector<8x1024xf32>
    %cst_57 = arith.constant 0.000000e+00 : f32
    %97 = vector.broadcast %cst_57 : f32 to vector<8x1024xf32>
    %98 = arith.maximumf %96, %97 : vector<8x1024xf32>
    %99 = arith.truncf %98 : vector<8x1024xf32> to vector<8x1024xbf16>
    %c0_58 = arith.constant 0 : index
    %c0_59 = arith.constant 0 : index
    %100 = vector.load %arg8[%c0_58, %c0_59] : memref<1024x128xbf16, #tpu.memory_space<vmem>>, vector<1024x128xbf16>
    %cst_60 = arith.constant dense<0.000000e+00> : vector<8x128xf32>
    %101 = tpu.matmul %99, %100, %cst_60 {dimension_numbers = #tpu.dot_dimension_numbers<[1], [0], [0], [1], [0, 0, 1, 1], [], []>} : vector<8x1024xbf16>, vector<1024x128xbf16>, vector<8x128xf32> -> vector<8x128xf32>
    %c0_61 = arith.constant 0 : index
    %c0_62 = arith.constant 0 : index
    %102 = vector.load %arg9[%c0_61, %c0_62] : memref<1x128xf32, #tpu.memory_space<vmem>>, vector<1x128xf32>
    %103 = vector.broadcast %102 : vector<1x128xf32> to vector<8x128xf32>
    %104 = arith.addf %101, %103 : vector<8x128xf32>
    %c0_63 = arith.constant 0 : index
    %c0_64 = arith.constant 0 : index
    %105 = vector.load %arg10[%c0_63, %c0_64] : memref<8x128xf32, #tpu.memory_space<vmem>>, vector<8x128xf32>
    tpu.vector_store %arg10[%c0_63, %c0_64], %104 {strides = array<i32>} : memref<8x128xf32, #tpu.memory_space<vmem>>, vector<8x128xf32>,
    return
  }
  func.func @transform_0(%arg0: i32) -> (i32, i32, i32) {
    %c0_i32 = arith.constant 0 : i32
    %c0_i32_0 = arith.constant 0 : i32
    %c0_i32_1 = arith.constant 0 : i32
    return %c0_i32, %arg0, %c0_i32_0 : i32, i32, i32
  }
  func.func @transform_1(%arg0: i32) -> (i32, i32) {
    %c0_i32 = arith.constant 0 : i32
    %c0_i32_0 = arith.constant 0 : i32
    %c0_i32_1 = arith.constant 0 : i32
    return %c0_i32, %c0_i32_0 : i32, i32
  }
  func.func @transform_2(%arg0: i32) -> (i32, i32) {
    %c0_i32 = arith.constant 0 : i32
    %c0_i32_0 = arith.constant 0 : i32
    %c0_i32_1 = arith.constant 0 : i32
    return %c0_i32, %c0_i32_0 : i32, i32
  }
  func.func @transform_3(%arg0: i32) -> (i32, i32, i32) {
    %c0_i32 = arith.constant 0 : i32
    %c0_i32_0 = arith.constant 0 : i32
    %c0_i32_1 = arith.constant 0 : i32
    %c0_i32_2 = arith.constant 0 : i32
    return %c0_i32, %c0_i32_0, %c0_i32_1 : i32, i32, i32
  }
  func.func @transform_4(%arg0: i32) -> (i32, i32) {
    %c0_i32 = arith.constant 0 : i32
    %c0_i32_0 = arith.constant 0 : i32
    %c0_i32_1 = arith.constant 0 : i32
    return %c0_i32, %c0_i32_0 : i32, i32
  }
  func.func @transform_5(%arg0: i32) -> (i32, i32, i32) {
    %c0_i32 = arith.constant 0 : i32
    %c0_i32_0 = arith.constant 0 : i32
    %c0_i32_1 = arith.constant 0 : i32
    %c0_i32_2 = arith.constant 0 : i32
    return %c0_i32, %c0_i32_0, %c0_i32_1 : i32, i32, i32
  }
  func.func @transform_6(%arg0: i32) -> (i32, i32) {
    %c0_i32 = arith.constant 0 : i32
    %c0_i32_0 = arith.constant 0 : i32
    %c0_i32_1 = arith.constant 0 : i32
    return %c0_i32, %c0_i32_0 : i32, i32
  }
  func.func @transform_7(%arg0: i32) -> (i32, i32) {
    %c0_i32 = arith.constant 0 : i32
    %c0_i32_0 = arith.constant 0 : i32
    %c0_i32_1 = arith.constant 0 : i32
    return %c0_i32, %c0_i32_0 : i32, i32
  }
  func.func @transform_8(%arg0: i32) -> (i32, i32) {
    %c0_i32 = arith.constant 0 : i32
    %c0_i32_0 = arith.constant 0 : i32
    %c0_i32_1 = arith.constant 0 : i32
    return %c0_i32, %c0_i32_0 : i32, i32
  }
  func.func @transform_9(%arg0: i32) -> (i32, i32) {
    %c0_i32 = arith.constant 0 : i32
    %c0_i32_0 = arith.constant 0 : i32
    return %arg0, %c0_i32 : i32, i32
  }
}

</mosaic_0001>

<bundles_post_ra>
// kernel: dqn_conv1d_forward.1
= control target key start
LH: loop header
LB: loop body
LE: loop exit
PB: predicated region body
PF: predicated region fallthrough
CT: control target
= control target key end

     0   :  { %14 = vsyncpa [#allocation3], 0  ;;  %s8077_s0 = inlined_call_operand.vmem [shape: bf16[12,8,20], index: 0, kind: input, shape index: {}]   ;;  %s8078_s1 = inlined_call_operand.hbm [shape: bf16[20,128], index: 1, kind: input, shape index: {}]   ;;  %s8079_s2 = inlined_call_operand.hbm [shape: f32[1,128], index: 2, kind: input, shape index: {}]   ;;  %s8080_s3 = inlined_call_operand.hbm [shape: bf16[5,128,128], index: 3, kind: input, shape index: {}]   ;;  %s8081_s4 = inlined_call_operand.hbm [shape: f32[1,128], index: 4, kind: input, shape index: {}]   ;;  %s8082_s5 = inlined_call_operand.hbm [shape: bf16[8,128,1024], index: 5, kind: input, shape index: {}]   ;;  %s8083_s6 = inlined_call_operand.hbm [shape: f32[1,1024], index: 6, kind: input, shape index: {}]   ;;  %s8084_s7 = inlined_call_operand.hbm [shape: bf16[1024,128], index: 7, kind: input, shape index: {}]   ;;  %s8085_s8 = inlined_call_operand.hbm [shape: f32[1,128], index: 8, kind: input, shape index: {}]   ;;  %s8086_s9 = inlined_call_operand.vmem [shape: f32[8,128], index: 9, kind: output, shape index: {}]  }
   0x1   :  { %15 = vsyncpa [#allocation5], 0 }
   0x2   :  { %16 = vsyncpa [#allocation8], 0 }
   0x3   :  { %17 = vsyncpa [#allocation11], 0 }
   0x4   :  { %18 = vsyncpa [#allocation14], 0  ;;  %s7564_s30 = smov [#allocation4]   ;;  %s7565_s11 = smov [#allocation7]  }
   0x5   :  { %s39_s10 = sshll.u32 %s7564_s30, 4  ;;  %s61_s12 = sshll.u32 %s7565_s11, 4  ;;  %s40_s10 = int_to_ptr.vmem [resolvable:$true] %s39_s10  ;;  %s62_s12 = int_to_ptr.vmem [resolvable:$true] %s61_s12 }
   0x6   :  { %s7378_s15 = scalar_lea.hbm %s8079_s2, 16 }
   0x7   :  { %p7379_p0 = scmp.ne.s32.totalorder %s8079_s2, %s7378_s15  ;;  %p7382_p1 = scmp.lt.u32.totalorder %s7378_s15, %s8079_s2 }
   0x9   :  { %p7384_p2 = pnand %p7382_p1, %p7379_p0 }
   0xb   :  { %7387 = shalt.err (!%p7384_p2)
}
   0xc   :  { %s7388_s20 = scalar_lea.vmem %s40_s10, 16  ;;  %s7392_s21 = scalar_lea.vmem %s40_s10, 32 }
   0xd   :  { %p7389_p3 = scmp.ne.s32.totalorder %s40_s10, %s7388_s20  ;;  %p7393_p4 = scmp.lt.s32.totalorder %s40_s10, %s40_s10 }
   0xe   :  { %p7394_p5 = scmp.lt.s32.totalorder %s7392_s21, %s7388_s20 }
  0x10   :  { %p7395_p6 = por %p7394_p5, %p7393_p4 }
  0x12   :  { %p7396_p7 = pnand %p7395_p6, %p7389_p3 }
  0x14   :  { %7399 = shalt.err (!%p7396_p7)
}
  0x15   :  { %42 = dma.hbm_to_vmem [thread:$0]  %s8079_s2, 16, %s40_s10, [#allocation5]  }
  0x16   :  { %s7400_s26 = scalar_lea.hbm %s8081_s4, 16 }
  0x17   :  { %p7401_p8 = scmp.ne.s32.totalorder %s8081_s4, %s7400_s26  ;;  %p7404_p9 = scmp.lt.u32.totalorder %s7400_s26, %s8081_s4 }
  0x19   :  { %p7406_p10 = pnand %p7404_p9, %p7401_p8 }
  0x1b   :  { %7409 = shalt.err (!%p7406_p10)
}
  0x1c   :  { %s7410_s11 = scalar_lea.vmem %s62_s12, 16  ;;  %s7414_s13 = scalar_lea.vmem %s62_s12, 32 }
  0x1d   :  { %p7411_p11 = scmp.ne.s32.totalorder %s62_s12, %s7410_s11  ;;  %p7415_p12 = scmp.lt.s32.totalorder %s62_s12, %s62_s12 }
  0x1e   :  { %p7416_p13 = scmp.lt.s32.totalorder %s7414_s13, %s7410_s11 }
  0x20   :  { %p7417_p0 = por %p7416_p13, %p7415_p12 }
  0x22   :  { %p7418_p1 = pnand %p7417_p0, %p7411_p11 }
  0x24   :  { %7421 = shalt.err (!%p7418_p1)
}
  0x25   :  { %64 = dma.hbm_to_vmem [thread:$0]  %s8081_s4, 16, %s62_s12, [#allocation8]  }
  0x26   :  { %s7566_s14 = smov [#allocation10]   ;;  %s7567_s16 = smov [#allocation2]  }
  0x27   :  { %s83_s15 = sshll.u32 %s7566_s14, 4  ;;  %s26_s17 = sshll.u32 %s7567_s16, 4  ;;  %s84_s15 = int_to_ptr.vmem [resolvable:$true] %s83_s15  ;;  %s7651_s17 = int_to_ptr.vmem [resolvable:$true] %s26_s17 }
  0x28   :  { %s7422_s20 = scalar_lea.hbm %s8083_s6, 128 }
  0x29   :  { %p7423_p2 = scmp.ne.s32.totalorder %s8083_s6, %s7422_s20  ;;  %p7426_p3 = scmp.lt.u32.totalorder %s7422_s20, %s8083_s6 }
  0x2b   :  { %p7428_p4 = pnand %p7426_p3, %p7423_p2 }
  0x2d   :  { %7431 = shalt.err (!%p7428_p4)
}
  0x2e   :  { %s7432_s4 = scalar_lea.vmem %s84_s15, 128  ;;  %p7437_p6 = scmp.lt.s32.totalorder %s84_s15, %s84_s15 }
  0x2f   :  { %p7433_p5 = scmp.ne.s32.totalorder %s84_s15, %s7432_s4  ;;  %p7438_p7 = scmp.lt.s32.totalorder %s7432_s4, %s7432_s4 }
  0x31   :  { %p7439_p8 = por %p7438_p7, %p7437_p6 }
  0x33   :  { %p7440_p9 = pnand %p7439_p8, %p7433_p5 }
  0x35   :  { %7443 = shalt.err (!%p7440_p9)
}
  0x36   :  { %86 = dma.hbm_to_vmem [thread:$0]  %s8083_s6, 128, %s84_s15, [#allocation11]  }
  0x37   :  { %s7444_s28 = scalar_lea.hbm %s8078_s1, 192 }
  0x38   :  { %p7445_p10 = scmp.ne.s32.totalorder %s8078_s1, %s7444_s28  ;;  %p7448_p11 = scmp.lt.u32.totalorder %s7444_s28, %s8078_s1 }
  0x3a   :  { %p7450_p12 = pnand %p7448_p11, %p7445_p10 }
  0x3c   :  { %7453 = shalt.err (!%p7450_p12)
}
  0x3d   :  { %s7454_s2 = scalar_lea.vmem %s7651_s17, 192  ;;  %p7459_p0 = scmp.lt.s32.totalorder %s7651_s17, %s7651_s17 }
  0x3e   :  { %p7455_p13 = scmp.ne.s32.totalorder %s7651_s17, %s7454_s2  ;;  %p7460_p1 = scmp.lt.s32.totalorder %s7454_s2, %s7454_s2 }
  0x40   :  { %p7461_p2 = por %p7460_p1, %p7459_p0 }
  0x42   :  { %p7462_p3 = pnand %p7461_p2, %p7455_p13 }
  0x44   :  { %7465 = shalt.err (!%p7462_p3)
}
  0x45   :  { %s7568_s6 = smov 64   ;;  %s7569_s10 = smov 4  }
  0x46   :  { %32 = dma.hbm_to_vmem [thread:$0]  %s8078_s1, 192, %s7651_s17, [#allocation3], %s7568_s6, %s7568_s6, %s7569_s10  }
  0x47   :  { %s7570_s16 = smov [#allocation6]   ;;  %s7571_s19 = smov [#allocation9]  }
  0x48   :  { %s48_s18 = sshll.u32 %s7570_s16, 4  ;;  %s70_s20 = sshll.u32 %s7571_s19, 4  ;;  %s49_s18 = int_to_ptr.vmem [resolvable:$true] %s48_s18  ;;  %s7685_s20 = int_to_ptr.vmem [resolvable:$true] %s70_s20 }
  0x49   :  { %s7466_s23 = scalar_lea.hbm %s8080_s3, 5120 }
  0x4a   :  { %p7467_p4 = scmp.ne.s32.totalorder %s8080_s3, %s7466_s23  ;;  %p7470_p5 = scmp.lt.u32.totalorder %s7466_s23, %s8080_s3 }
  0x4c   :  { %p7472_p6 = pnand %p7470_p5, %p7467_p4 }
  0x4e   :  { %7475 = shalt.err (!%p7472_p6)
}
  0x4f   :  { %s7476_s1 = scalar_lea.vmem %s49_s18, 5120  ;;  %p7481_p8 = scmp.lt.s32.totalorder %s49_s18, %s49_s18 }
  0x50   :  { %p7477_p7 = scmp.ne.s32.totalorder %s49_s18, %s7476_s1  ;;  %p7482_p9 = scmp.lt.s32.totalorder %s7476_s1, %s7476_s1 }
  0x52   :  { %p7483_p10 = por %p7482_p9, %p7481_p8 }
  0x54   :  { %p7484_p11 = pnand %p7483_p10, %p7477_p7 }
  0x56   :  { %7487 = shalt.err (!%p7484_p11)
}
  0x57   :  { %54 = dma.hbm_to_vmem [thread:$0]  %s8080_s3, 5120, %s49_s18, [#allocation5], %s7568_s6, %s7568_s6, %s7569_s10  }
  0x58   :  { %s7488_s29 = scalar_lea.hbm %s8082_s5, 65536 }
  0x59   :  { %p7489_p12 = scmp.ne.s32.totalorder %s8082_s5, %s7488_s29  ;;  %p7492_p13 = scmp.lt.u32.totalorder %s7488_s29, %s8082_s5 }
  0x5b   :  { %p7494_p0 = pnand %p7492_p13, %p7489_p12 }
  0x5d   :  { %7497 = shalt.err (!%p7494_p0)
}
  0x5e   :  { %s7498_s14 = scalar_lea.vmem %s7685_s20, 65536  ;;  %p7503_p2 = scmp.lt.s32.totalorder %s7685_s20, %s7685_s20 }
  0x5f   :  { %p7499_p1 = scmp.ne.s32.totalorder %s7685_s20, %s7498_s14  ;;  %p7504_p3 = scmp.lt.s32.totalorder %s7498_s14, %s7498_s14 }
  0x61   :  { %p7505_p4 = por %p7504_p3, %p7503_p2 }
  0x63   :  { %p7506_p5 = pnand %p7505_p4, %p7499_p1 }
  0x65   :  { %7509 = shalt.err (!%p7506_p5)
}
  0x66   :  { %s7572_s3 = smov 512   ;;  %s7573_s15 = smov 32  }
  0x67   :  { %76 = dma.hbm_to_vmem [thread:$0]  %s8082_s5, 65536, %s7685_s20, [#allocation8], %s7572_s3, %s7572_s3, %s7573_s15  }
  0x68   :  { %s7574_s19 = smov [#allocation12]   ;;  %s7575_s22 = smov [#allocation13]  }
  0x69   :  { %s92_s21 = sshll.u32 %s7574_s19, 4  ;;  %s105_s23 = sshll.u32 %s7575_s22, 4  ;;  %s93_s21 = int_to_ptr.vmem [resolvable:$true] %s92_s21  ;;  %s106_s23 = int_to_ptr.vmem [resolvable:$true] %s105_s23 }
  0x6a   :  { %s7510_s12 = scalar_lea.hbm %s8084_s7, 8192 }
  0x6b   :  { %p7511_p6 = scmp.ne.s32.totalorder %s8084_s7, %s7510_s12  ;;  %p7514_p7 = scmp.lt.u32.totalorder %s7510_s12, %s8084_s7 }
  0x6d   :  { %p7516_p8 = pnand %p7514_p7, %p7511_p6 }
  0x6f   :  { %7519 = shalt.err (!%p7516_p8)
}
  0x70   :  { %s7520_s5 = scalar_lea.vmem %s93_s21, 8192  ;;  %p7525_p10 = scmp.lt.s32.totalorder %s93_s21, %s93_s21 }
  0x71   :  { %p7521_p9 = scmp.ne.s32.totalorder %s93_s21, %s7520_s5  ;;  %p7526_p11 = scmp.lt.s32.totalorder %s7520_s5, %s7520_s5 }
  0x73   :  { %p7527_p12 = por %p7526_p11, %p7525_p10 }
  0x75   :  { %p7528_p13 = pnand %p7527_p12, %p7521_p9 }
  0x77   :  { %7531 = shalt.err (!%p7528_p13)
}
  0x78   :  { %98 = dma.hbm_to_vmem [thread:$0]  %s8084_s7, 8192, %s93_s21, [#allocation11], %s7568_s6, %s7568_s6, %s7569_s10  }
  0x79   :  { %s7532_s30 = scalar_lea.hbm %s8085_s8, 16 }
  0x7a   :  { %p7533_p0 = scmp.ne.s32.totalorder %s8085_s8, %s7532_s30  ;;  %p7536_p1 = scmp.lt.u32.totalorder %s7532_s30, %s8085_s8 }
  0x7c   :  { %p7538_p2 = pnand %p7536_p1, %p7533_p0 }
  0x7e   :  { %7541 = shalt.err (!%p7538_p2)
}
  0x7f   :  { %s7542_s3 = scalar_lea.vmem %s106_s23, 16  ;;  %s7546_s15 = scalar_lea.vmem %s106_s23, 32 }
  0x80   :  { %p7543_p3 = scmp.ne.s32.totalorder %s106_s23, %s7542_s3  ;;  %p7547_p4 = scmp.lt.s32.totalorder %s106_s23, %s106_s23 }
  0x81   :  { %p7548_p5 = scmp.lt.s32.totalorder %s7546_s15, %s7542_s3 }
  0x83   :  { %p7549_p6 = por %p7548_p5, %p7547_p4 }
  0x85   :  { %p7550_p7 = pnand %p7549_p6, %p7543_p3 }
  0x87   :  { %7553 = shalt.err (!%p7550_p7)
}
  0x88   :  { %108 = dma.hbm_to_vmem [thread:$0]  %s8085_s8, 16, %s106_s23, [#allocation14]  }
  0x89   :  { %7554 = dma.done.wait [#allocation3], 192  }
  0x8a   :  { %7555 = vsyncadd [#allocation3], 4294967104 }
  0x8b   :  { %7556 = dma.done.wait [#allocation5], 5136  }
  0x8c   :  { %7557 = vsyncadd [#allocation5], 4294962160 }
  0x8d   :  { %7558 = dma.done.wait [#allocation8], 65552  }
  0x8e   :  { %7559 = vsyncadd [#allocation8], 4294901744 }
  0x8f   :  { %7560 = dma.done.wait [#allocation11], 8320  }
  0x90   :  { %7561 = vsyncadd [#allocation11], 4294958976 }
  0x91   :  { %7562 = dma.done.wait [#allocation14], 16  }
  0x92   :  { %7563 = vsyncadd [#allocation14], 4294967280  ;;  %vm214_vm0 = vcmask 1041408   ;;  %v7266_v0 = vld [vmem:[#allocation2] sm:$0xff]   ;;  %vm195_vm1 = vcmask 162816   ;;  %v7269_v4 = vld [vmem:[%s8077_s0 + $0x8] sm:$0xff]  }
  0x93   :  { %v7267_v1 = vld [vmem:[#allocation2 + $0x8] ss:$0 sps:$4 sm:$0x33]   ;;  %v7268_v2 = vld [vmem:[%s8077_s0] sm:$0xff]   ;;  %7084 = vmatprep.subr.bf16.mxu0 %v7266_v0  ;;  %v7270_v5 = vld [vmem:[%s8077_s0 + $0x10] sm:$0xff]  }
  0x94   :  { %7085 = vmatpush3.bf16.msra.mxu0 %v7266_v0  ;;  %7088 = vmatprep.mubr.msk.bf16.mxu0 %vm195_vm1, %v7268_v2  ;;  %v216_v3 = vsel %vm214_vm0, %v7267_v1, 0  ;;  %v7274_v6 = vld [vmem:[#allocation6 + $0x40] sm:$0xff]   ;;  %v7275_v7 = vld [vmem:[#allocation6 + $0x48] sm:$0xff]   ;;  %v7276_v8 = vld [vmem:[#allocation6 + $0x50] sm:$0xff]  }
  0x95   :  { %7252 = vmatprep.subr.msk.bf16.mxu0 %vm214_vm0, %v7267_v1  ;;  %7100 = vmatprep.subr.bf16.mxu1 %v7274_v6  ;;  %v7271_v9 = vld [vmem:[%s8077_s0 + $0x18] sm:$0xff]   ;;  %v7272_v10 = vld [vmem:[%s8077_s0 + $0x20] sm:$0xff]   ;;  %v7273_v11 = vld [vmem:[%s8077_s0 + $0x28] sm:$0xff]  }
  0x96   :  { %7101 = vmatpush3.bf16.msra.mxu1 %v7274_v6  ;;  %v7277_v12 = vld [vmem:[#allocation6 + $0x58] sm:$0xff]   ;;  %v7278_v13 = vld [vmem:[#allocation6 + $0x60] sm:$0xff]   ;;  %v7279_v14 = vld [vmem:[#allocation6 + $0x68] sm:$0xff]  }
  0x97   :  { %7102 = vmatprep.subr.bf16.mxu1 %v7275_v7  ;;  %v7280_v15 = vld [vmem:[#allocation6 + $0x70] sm:$0xff]   ;;  %v7281_v16 = vld [vmem:[#allocation6 + $0x78] sm:$0xff]   ;;  %v7282_v17 = vld [vmem:[#allocation6] sm:$0xff]  }
  0x98   :  { %7087 = vmatpush3.bf16.msra.mxu0 %v216_v3  ;;  %v6279_v18 = vld [vmem:[#allocation4] ss:$0 sm:$0xff]  ;;  %v7283_v2 = vld [vmem:[#allocation6 + $0x8] sm:$0xff]  }
  0x9a   :  { %7103 = vmatpush3.bf16.msra.mxu1 %v7275_v7  ;;  %v7284_v7 = vld [vmem:[#allocation6 + $0x10] sm:$0xff]  }
  0x9b   :  { %7089 = vmatmul.mubr.msk.bf16.vlgmr.msra.gmra.mrb[0].mxu0 %vm195_vm1, %v7269_v4  ;;  %7104 = vmatprep.subr.bf16.mxu1 %v7276_v8 }
  0x9c   :  { %7092 = vmatprep.mubr.msk.bf16.mxu0 %vm195_vm1, %v7270_v5 }
  0x9e   :  { %7105 = vmatpush3.bf16.msra.mxu1 %v7276_v8 }
  0x9f   :  { %7106 = vmatprep.subr.bf16.mxu1 %v7277_v12 }
  0xa2   :  { %7107 = vmatpush3.bf16.msra.mxu1 %v7277_v12  ;;  %v1150_v12 = vld [vmem:[#allocation9 + $0x200] sm:$0xff] }
  0xa3   :  { %7093 = vmatmul.mubr.msk.bf16.gmra.mrb[4].mxu0 %vm195_vm1, %v7271_v9  ;;  %7108 = vmatprep.subr.bf16.mxu1 %v7278_v13 }
  0xa4   :  { %7096 = vmatprep.mubr.msk.bf16.mxu0 %vm195_vm1, %v7272_v10 }
  0xa6   :  { %7109 = vmatpush3.bf16.msra.mxu1 %v7278_v13  ;;  %v1154_v13 = vld [vmem:[#allocation9 + $0x220] sm:$0xff] }
  0xa7   :  { %7110 = vmatprep.subr.bf16.mxu1 %v7279_v14 }
  0xaa   :  { %7111 = vmatpush3.bf16.msra.mxu1 %v7279_v14  ;;  %v7286_v14 = vld [vmem:[#allocation6 + $0x20] sm:$0xff]  }
  0xab   :  { %7097 = vmatmul.mubr.msk.bf16.gmra.mrb[8].mxu0 %vm195_vm1, %v7273_v11  ;;  %7112 = vmatprep.subr.bf16.mxu1 %v7280_v15  ;;  %v7285_v11 = vld [vmem:[#allocation6 + $0x18] sm:$0xff]  }
  0xae   :  { %7113 = vmatpush3.bf16.msra.mxu1 %v7280_v15  ;;  %v6343_v15 = vcombine.low %v1150_v12, %v1154_v13 }
  0xaf   :  { %7114 = vmatprep.subr.bf16.mxu1 %v7281_v16 }
  0xb2   :  { %7115 = vmatpush3.bf16.msra.mxu1 %v7281_v16  ;;  %v6344_v16 = vcombine.high %v1150_v12, %v1154_v13  ;;  %v1102_v13 = vld [vmem:[#allocation9 + $0x88] sm:$0xff] }
  0xb3   :  { %7124 = vmatprep.subr.bf16.mxu1 %v7282_v17 }
  0xb4   :  { %1534 = vmatprep.subr.bf16.mxu0 %v6344_v16 }
  0xb5   :  { %1535 = vmatpush1.bf16.msra.mxu0 %v6343_v15 }
 0x16e   :  { %v7090_v19 = vpop.f32.mrb[0].mxu0 }
 0x16f   :  { %v261_v20 = vadd.f32 %v7090_v19, %v6279_v18  ;;  %v252_v21 = vpop.f32.mrb[1].mxu0 }
 0x170   :  { %v253_v22 = vadd.f32 %v6279_v18, %v252_v21  ;;  %v7091_v23 = vpop.f32.mrb[2].mxu0  ;;  %v1170_v21 = vld [vmem:[#allocation9 + $0x2a0] sm:$0xff] }
 0x171   :  { %v264_v24 = vadd.f32 %v7091_v23, %v6279_v18  ;;  %v255_v25 = vpop.f32.mrb[3].mxu0  ;;  %v301_v27 = vmax.f32 %v261_v20, 0.0  ;;  %v1166_v20 = vld [vmem:[#allocation9 + $0x280] sm:$0xff] }
 0x172   :  { %v256_v26 = vadd.f32 %v6279_v18, %v255_v25  ;;  %v299_v29 = vmax.f32 %v253_v22, 0.0  ;;  %v7287_v23 = vld [vmem:[#allocation6 + $0x28] sm:$0xff]  }
 0x173   :  { %v302_v28 = vmax.f32 %v264_v24, 0.0  ;;  %v6360_v24 = vcombine.high %v1166_v20, %v1170_v21  ;;  %v1174_v25 = vld [vmem:[#allocation9 + $0x2c0] sm:$0xff] }
 0x174   :  { %v300_v30 = vmax.f32 %v256_v26, 0.0  ;;  %v1178_v26 = vld [vmem:[#allocation9 + $0x2e0] sm:$0xff] }
 0x175   :  { %v7770_v31 = vpack.c.bf16 %v302_v28, %v301_v27  ;;  %v6359_v27 = vcombine.low %v1166_v20, %v1170_v21  ;;  %v7288_v28 = vld [vmem:[#allocation6 + $0x30] sm:$0xff]  }
 0x176   :  { %v311_v32 = vpack.c.bf16 %v300_v30, %v299_v29  ;;  %v7094_v33 = vpop.f32.mrb[4].mxu0  ;;  %v6368_v29 = vcombine.high %v1174_v25, %v1178_v26  ;;  %v1182_v30 = vld [vmem:[#allocation9 + $0x300] sm:$0xff]  ;;  %v1118_v21 = vld [vmem:[#allocation9 + $0x108] sm:$0xff] }
 0x177   :  { %v277_v34 = vadd.f32 %v7094_v33, %v6279_v18  ;;  %v268_v35 = vpop.f32.mrb[5].mxu0  ;;  %v325_v36 = vunpack.c.l.b16 %v7770_v31  ;;  %v326_v56 = vunpack.c.h.b16 %v7770_v31  ;;  %v6367_v33 = vcombine.low %v1174_v25, %v1178_v26 }
 0x178   :  { %v269_v37 = vadd.f32 %v6279_v18, %v268_v35  ;;  %v7095_v38 = vpop.f32.mrb[6].mxu0  ;;  %v324_v39 = vunpack.c.h.b16 %v311_v32 }
 0x179   :  { %v280_v40 = vadd.f32 %v7095_v38, %v6279_v18  ;;  %v271_v41 = vpop.f32.mrb[7].mxu0  ;;  %v305_v44 = vmax.f32 %v277_v34, 0.0  ;;  %v7289_v34 = vld [vmem:[#allocation6 + $0x38] sm:$0xff]  }
 0x17a   :  { %v272_v42 = vadd.f32 %v6279_v18, %v271_v41  ;;  %v368_v43 = vpack.c.b16 %v325_v36, %v324_v39  ;;  %v303_v46 = vmax.f32 %v269_v37, 0.0  ;;  %v1190_v36 = vld [vmem:[#allocation9 + $0x340] sm:$0xff] }
 0x17b   :  { %v306_v45 = vmax.f32 %v280_v40, 0.0  ;;  %v1194_v37 = vld [vmem:[#allocation9 + $0x360] sm:$0xff] }
 0x17c   :  { %v304_v47 = vmax.f32 %v272_v42, 0.0  ;;  %7116 = vmatprep.mubr.bf16.mxu1 %v368_v43  ;;  %v7290_v39 = vld [vmem:[#allocation6 + $0x80] sm:$0xff]   ;;  %v6384_v40 = vcombine.high %v1190_v36, %v1194_v37  ;;  %v7291_v41 = vld [vmem:[#allocation6 + $0x88] sm:$0xff]   ;;  %v6383_v42 = vcombine.low %v1190_v36, %v1194_v37  ;;  %v7292_v43 = vld [vmem:[#allocation6 + $0x90] sm:$0xff]  }
 0x17d   :  { %v7773_v48 = vpack.c.bf16 %v306_v45, %v305_v44  ;;  %v7293_v44 = vld [vmem:[#allocation6 + $0x98] sm:$0xff]   ;;  %v7294_v45 = vld [vmem:[#allocation6 + $0xa0] sm:$0xff]   ;;  %v1142_v36 = vld [vmem:[#allocation9 + $0x1c8] sm:$0xff] }
 0x17e   :  { %v7775_v49 = vpack.c.bf16 %v304_v47, %v303_v46  ;;  %v7098_v50 = vpop.f32.mrb[8].mxu0  ;;  %v7295_v46 = vld [vmem:[#allocation6 + $0xa8] sm:$0xff]   ;;  %v7296_v47 = vld [vmem:[#allocation6 + $0xb0] sm:$0xff]  }
 0x17f   :  { %v293_v51 = vadd.f32 %v7098_v50, %v6279_v18  ;;  %v284_v52 = vpop.f32.mrb[9].mxu0  ;;  %v329_v53 = vunpack.c.l.b16 %v7773_v48  ;;  %v330_v8 = vunpack.c.h.b16 %v7773_v48  ;;  %v7297_v50 = vld [vmem:[#allocation6 + $0xb8] sm:$0xff]   ;;  %v1146_v37 = vld [vmem:[#allocation9 + $0x1e8] sm:$0xff] }
 0x180   :  { %v285_v54 = vadd.f32 %v6279_v18, %v284_v52  ;;  %v7099_v55 = vpop.f32.mrb[10].mxu0  ;;  %v327_v57 = vunpack.c.l.b16 %v7775_v49  ;;  %v328_v58 = vunpack.c.h.b16 %v7775_v49  ;;  %v7299_v52 = vld [vmem:[#allocation6 + $0xc8] sm:$0xff]  }
 0x181   :  { %v309_v59 = vmax.f32 %v293_v51, 0.0  ;;  %v296_v60 = vadd.f32 %v7099_v55, %v6279_v18  ;;  %v287_v61 = vpop.f32.mrb[11].mxu0  ;;  %v7298_v51 = vld [vmem:[#allocation6 + $0xc0] sm:$0xff]   ;;  %v7303_v55 = vld [vmem:[#allocation6 + $0xe8] sm:$0xff]  }
 0x182   :  { %v307_v62 = vmax.f32 %v285_v54, 0.0  ;;  %v288_v63 = vadd.f32 %v6279_v18, %v287_v61  ;;  %v7781_v0 = vpack.c.b16 %v327_v57, %v326_v56  ;;  %v7783_v1 = vpack.c.b16 %v329_v53, %v328_v58  ;;  %v1162_v18 = vld [vmem:[#allocation9 + $0x260] sm:$0xff]  ;;  %v7301_v53 = vld [vmem:[#allocation6 + $0xd8] sm:$0xff]   ;;  %v7304_v56 = vld [vmem:[#allocation6 + $0xf0] sm:$0xff]  }
 0x183   :  { %v310_v3 = vmax.f32 %v296_v60, 0.0  ;;  %v7302_v54 = vld [vmem:[#allocation6 + $0xe0] sm:$0xff]   ;;  %v7305_v57 = vld [vmem:[#allocation6 + $0xf8] sm:$0xff]  }
 0x184   :  { %v308_v4 = vmax.f32 %v288_v63, 0.0  ;;  %7117 = vmatmul.mubr.bf16.vlgmr.msra.gmra.mrb[0].mxu1 %v7781_v0  ;;  %v7306_v58 = vld [vmem:[#allocation6 + $0x100] sm:$0xff]  }
 0x185   :  { %v7786_v5 = vpack.c.bf16 %v310_v3, %v309_v59  ;;  %7125 = vmatpush3.bf16.msra.mxu1 %v7282_v17  ;;  %7120 = vmatprep.mubr.bf16.mxu1 %v7783_v1  ;;  %v1158_v17 = vld [vmem:[#allocation9 + $0x240] sm:$0xff]  ;;  %v7312_v3 = vld [vmem:[#allocation6 + $0x130] sm:$0xff]  }
 0x186   :  { %v7789_v6 = vpack.c.bf16 %v308_v4, %v307_v62  ;;  %7126 = vmatprep.subr.bf16.mxu1 %v7283_v2  ;;  %v6352_v19 = vcombine.high %v1158_v17, %v1162_v18  ;;  %v6351_v22 = vcombine.low %v1158_v17, %v1162_v18  ;;  %v7307_v59 = vld [vmem:[#allocation6 + $0x108] sm:$0xff]   ;;  %v7308_v62 = vld [vmem:[#allocation6 + $0x110] sm:$0xff]   ;;  %v7313_v4 = vld [vmem:[#allocation6 + $0x138] sm:$0xff]  }
 0x187   :  { %v333_v60 = vunpack.c.l.b16 %v7786_v5  ;;  %v1110_v17 = vld [vmem:[#allocation9 + $0xc8] sm:$0xff] }
 0x188   :  { %v331_v9 = vunpack.c.l.b16 %v7789_v6  ;;  %1536 = vmatprep.subr.bf16.mxu0 %v6352_v19  ;;  %v332_v61 = vunpack.c.h.b16 %v7789_v6  ;;  %v1114_v18 = vld [vmem:[#allocation9 + $0xe8] sm:$0xff] }
 0x189   :  { %7127 = vmatpush3.bf16.msra.mxu1 %v7283_v2  ;;  %1537 = vmatpush1.bf16.msra.mxu0 %v6351_v22  ;;  %v7310_v2 = vld [vmem:[#allocation6 + $0x120] sm:$0xff]   ;;  %v6434_v20 = vcombine.high %v1110_v17, %v1114_v18  ;;  %v1122_v22 = vld [vmem:[#allocation9 + $0x128] sm:$0xff] }
 0x18a   :  { %7128 = vmatprep.subr.bf16.mxu1 %v7284_v7  ;;  %v7793_v10 = vpack.c.b16 %v331_v9, %v330_v8  ;;  %1538 = vmatprep.subr.bf16.mxu0 %v6360_v24  ;;  %v767_v63 = vpack.c.b16 %v333_v60, %v332_v61  ;;  %v1090_v8 = vld [vmem:[#allocation9 + $0x28] sm:$0xff]  ;;  %v6441_v25 = vcombine.low %v1118_v21, %v1122_v22 }
 0x18b   :  { %v1126_v24 = vld [vmem:[#allocation9 + $0x148] sm:$0xff] }
 0x18c   :  { %7121 = vmatmul.mubr.bf16.gmra.mrb[4].mxu1 %v7793_v10 }
 0x18d   :  { %7129 = vmatpush3.bf16.msra.mxu1 %v7284_v7  ;;  %7140 = vmatprep.mubr.bf16.mxu1 %v311_v32  ;;  %v1186_v32 = vld [vmem:[#allocation9 + $0x320] sm:$0xff]  ;;  %v1086_v7 = vld [vmem:[#allocation9 + $0x8] sm:$0xff] }
 0x18e   :  { %7130 = vmatprep.subr.bf16.mxu1 %v7285_v11  ;;  %1539 = vmatpush1.bf16.msra.mxu0 %v6359_v27  ;;  %v6376_v35 = vcombine.high %v1182_v30, %v1186_v32  ;;  %v6375_v38 = vcombine.low %v1182_v30, %v1186_v32  ;;  %v6410_v9 = vcombine.high %v1086_v7, %v1090_v8  ;;  %v1134_v27 = vld [vmem:[#allocation9 + $0x188] sm:$0xff] }
 0x18f   :  { %1540 = vmatprep.subr.bf16.mxu0 %v6368_v29 }
 0x191   :  { %7131 = vmatpush3.bf16.msra.mxu1 %v7285_v11  ;;  %v1098_v11 = vld [vmem:[#allocation9 + $0x68] sm:$0xff] }
 0x192   :  { %7132 = vmatprep.subr.bf16.mxu1 %v7286_v14  ;;  %1541 = vmatpush1.bf16.msra.mxu0 %v6367_v33  ;;  %v1202_v33 = vld [vmem:[#allocation9 + $0x3a0] sm:$0xff] }
 0x193   :  { %1542 = vmatprep.subr.bf16.mxu0 %v6376_v35 }
 0x195   :  { %7133 = vmatpush3.bf16.msra.mxu1 %v7286_v14  ;;  %v1106_v14 = vld [vmem:[#allocation9 + $0xa8] sm:$0xff] }
 0x196   :  { %7134 = vmatprep.subr.bf16.mxu1 %v7287_v23  ;;  %1543 = vmatpush1.bf16.msra.mxu0 %v6375_v38  ;;  %v6426_v16 = vcombine.high %v1102_v13, %v1106_v14  ;;  %v6425_v19 = vcombine.low %v1102_v13, %v1106_v14  ;;  %v6466_v38 = vcombine.high %v1142_v36, %v1146_v37 }
 0x197   :  { %1544 = vmatprep.subr.bf16.mxu0 %v6384_v40  ;;  %v1206_v40 = vld [vmem:[#allocation9 + $0x3c0] sm:$0xff] }
 0x199   :  { %7135 = vmatpush3.bf16.msra.mxu1 %v7287_v23  ;;  %v6433_v23 = vcombine.low %v1110_v17, %v1114_v18  ;;  %v1171_v17 = vld [vmem:[#allocation9 + $0x2a8] sm:$0xff] }
 0x19a   :  { %7136 = vmatprep.subr.bf16.mxu1 %v7288_v28  ;;  %1545 = vmatpush1.bf16.msra.mxu0 %v6383_v42 }
 0x19d   :  { %7137 = vmatpush3.bf16.msra.mxu1 %v7288_v28  ;;  %v1138_v28 = vld [vmem:[#allocation9 + $0x1a8] sm:$0xff] }
 0x19e   :  { %7138 = vmatprep.subr.bf16.mxu1 %v7289_v34  ;;  %v6458_v30 = vcombine.high %v1134_v27, %v1138_v28  ;;  %v6457_v32 = vcombine.low %v1134_v27, %v1138_v28  ;;  %v1175_v27 = vld [vmem:[#allocation9 + $0x2c8] sm:$0xff] }
 0x19f   :  { %v1179_v28 = vld [vmem:[#allocation9 + $0x2e8] sm:$0xff] }
 0x1a1   :  { %7139 = vmatpush3.bf16.msra.mxu1 %v7289_v34 }
 0x1a2   :  { %7148 = vmatprep.subr.bf16.mxu1 %v7290_v39 }
 0x1a4   :  { %7141 = vmatmul.mubr.bf16.vlgmr.msra.gmra.mrb[0].mxu1 %v7770_v31 }
 0x1a5   :  { %7144 = vmatprep.mubr.bf16.mxu1 %v7775_v49  ;;  %7149 = vmatpush3.bf16.msra.mxu1 %v7290_v39  ;;  %v6465_v39 = vcombine.low %v1142_v36, %v1146_v37  ;;  %v1187_v36 = vld [vmem:[#allocation9 + $0x328] sm:$0xff] }
 0x1a6   :  { %7150 = vmatprep.subr.bf16.mxu1 %v7291_v41 }
 0x1a9   :  { %7151 = vmatpush3.bf16.msra.mxu1 %v7291_v41  ;;  %v1210_v41 = vld [vmem:[#allocation9 + $0x3e0] sm:$0xff] }
 0x1aa   :  { %7152 = vmatprep.subr.bf16.mxu1 %v7292_v43  ;;  %v6400_v42 = vcombine.high %v1206_v40, %v1210_v41 }
 0x1ac   :  { %7145 = vmatmul.mubr.bf16.gmra.mrb[4].mxu1 %v7773_v48 }
 0x1ad   :  { %7153 = vmatpush3.bf16.msra.mxu1 %v7292_v43  ;;  %7164 = vmatprep.mubr.bf16.mxu1 %v7770_v31  ;;  %v7300_v31 = vld [vmem:[#allocation6 + $0xd0] sm:$0xff]   ;;  %v6399_v43 = vcombine.low %v1206_v40, %v1210_v41  ;;  %v1132_v40 = vld [vmem:[#allocation9 + $0x178] sm:$0xff] }
 0x1ae   :  { %7154 = vmatprep.subr.bf16.mxu1 %v7293_v44 }
 0x1b1   :  { %7155 = vmatpush3.bf16.msra.mxu1 %v7293_v44  ;;  %v1088_v44 = vld [vmem:[#allocation9 + $0x18] sm:$0xff] }
 0x1b2   :  { %7156 = vmatprep.subr.bf16.mxu1 %v7294_v45 }
 0x1b5   :  { %7157 = vmatpush3.bf16.msra.mxu1 %v7294_v45  ;;  %v1092_v45 = vld [vmem:[#allocation9 + $0x38] sm:$0xff] }
 0x1b6   :  { %7158 = vmatprep.subr.bf16.mxu1 %v7295_v46 }
 0x1b9   :  { %7159 = vmatpush3.bf16.msra.mxu1 %v7295_v46  ;;  %v6414_v46 = vcombine.high %v1088_v44, %v1092_v45 }
 0x1ba   :  { %7160 = vmatprep.subr.bf16.mxu1 %v7296_v47 }
 0x1bd   :  { %7161 = vmatpush3.bf16.msra.mxu1 %v7296_v47  ;;  %v6413_v47 = vcombine.low %v1088_v44, %v1092_v45  ;;  %v1195_v44 = vld [vmem:[#allocation9 + $0x368] sm:$0xff] }
 0x1be   :  { %7162 = vmatprep.subr.bf16.mxu1 %v7297_v50 }
 0x1c1   :  { %7163 = vmatpush3.bf16.msra.mxu1 %v7297_v50  ;;  %v7576_v50 = vmov 0  }
 0x1c2   :  { %7172 = vmatprep.subr.bf16.mxu1 %v7298_v51  ;;  %1566 = vmatprep.mubr.bf16.mxu0 %v7576_v50 }
 0x1c4   :  { %7165 = vmatmul.mubr.bf16.vlgmr.msra.gmra.mrb[0].mxu1 %v7775_v49 }
 0x1c5   :  { %7168 = vmatprep.mubr.bf16.mxu1 %v7773_v48  ;;  %7173 = vmatpush3.bf16.msra.mxu1 %v7298_v51  ;;  %v1151_v51 = vld [vmem:[#allocation9 + $0x208] sm:$0xff] }
 0x1c6   :  { %7174 = vmatprep.subr.bf16.mxu1 %v7299_v52 }
 0x1c9   :  { %7175 = vmatpush3.bf16.msra.mxu1 %v7299_v52  ;;  %v1155_v52 = vld [vmem:[#allocation9 + $0x228] sm:$0xff] }
 0x1ca   :  { %7176 = vmatprep.subr.bf16.mxu1 %v7300_v31 }
 0x1cc   :  { %7169 = vmatmul.mubr.bf16.gmra.mrb[4].mxu1 %v7789_v6 }
 0x1cd   :  { %7177 = vmatpush3.bf16.msra.mxu1 %v7300_v31  ;;  %7188 = vmatprep.mubr.bf16.mxu1 %v7781_v0  ;;  %v7309_v0 = vld [vmem:[#allocation6 + $0x118] sm:$0xff]   ;;  %v6346_v31 = vcombine.high %v1151_v51, %v1155_v52 }
 0x1ce   :  { %7178 = vmatprep.subr.bf16.mxu1 %v7301_v53 }
 0x1d1   :  { %7179 = vmatpush3.bf16.msra.mxu1 %v7301_v53  ;;  %v6345_v53 = vcombine.low %v1151_v51, %v1155_v52  ;;  %v1140_v51 = vld [vmem:[#allocation9 + $0x1b8] sm:$0xff] }
 0x1d2   :  { %7180 = vmatprep.subr.bf16.mxu1 %v7302_v54 }
 0x1d5   :  { %7181 = vmatpush3.bf16.msra.mxu1 %v7302_v54  ;;  %v6334_v54 = vld [vmem:[#allocation7] ss:$0 sm:$0xff] }
 0x1d6   :  { %7182 = vmatprep.subr.bf16.mxu1 %v7303_v55 }
 0x1d9   :  { %7183 = vmatpush3.bf16.msra.mxu1 %v7303_v55 }
 0x1da   :  { %7184 = vmatprep.subr.bf16.mxu1 %v7304_v56 }
 0x1dd   :  { %7185 = vmatpush3.bf16.msra.mxu1 %v7304_v56 }
 0x1de   :  { %7186 = vmatprep.subr.bf16.mxu1 %v7305_v57 }
 0x1e1   :  { %7187 = vmatpush3.bf16.msra.mxu1 %v7305_v57 }
 0x1e2   :  { %7196 = vmatprep.subr.bf16.mxu1 %v7306_v58 }
 0x1e4   :  { %7189 = vmatmul.mubr.bf16.vlgmr.msra.gmra.mrb[0].mxu1 %v7783_v1  ;;  %v7311_v1 = vld [vmem:[#allocation6 + $0x128] sm:$0xff]  }
 0x1e5   :  { %7192 = vmatprep.mubr.bf16.mxu1 %v7793_v10  ;;  %7197 = vmatpush3.bf16.msra.mxu1 %v7306_v58  ;;  %v1094_v10 = vld [vmem:[#allocation9 + $0x48] sm:$0xff] }
 0x1e6   :  { %7198 = vmatprep.subr.bf16.mxu1 %v7307_v59  ;;  %v6418_v12 = vcombine.high %v1094_v10, %v1098_v11  ;;  %v6417_v15 = vcombine.low %v1094_v10, %v1098_v11  ;;  %v1108_v10 = vld [vmem:[#allocation9 + $0xb8] sm:$0xff] }
 0x1e9   :  { %7199 = vmatpush3.bf16.msra.mxu1 %v7307_v59 }
 0x1ea   :  { %7200 = vmatprep.subr.bf16.mxu1 %v7308_v62 }
 0x1ec   :  { %7193 = vmatmul.mubr.bf16.gmra.mrb[4].mxu1 %v767_v63  ;;  %v1100_v63 = vld [vmem:[#allocation9 + $0x78] sm:$0xff] }
 0x1ed   :  { %7201 = vmatpush3.bf16.msra.mxu1 %v7308_v62  ;;  %7212 = vmatprep.mubr.bf16.mxu1 %v7775_v49  ;;  %v6409_v49 = vcombine.low %v1086_v7, %v1090_v8  ;;  %v1096_v62 = vld [vmem:[#allocation9 + $0x58] sm:$0xff] }
 0x1ee   :  { %7202 = vmatprep.subr.bf16.mxu1 %v7309_v0  ;;  %v6422_v8 = vcombine.high %v1096_v62, %v1100_v63 }
 0x1f1   :  { %7203 = vmatpush3.bf16.msra.mxu1 %v7309_v0 }
 0x1f2   :  { %7204 = vmatprep.subr.bf16.mxu1 %v7310_v2 }
 0x1f5   :  { %7205 = vmatpush3.bf16.msra.mxu1 %v7310_v2 }
 0x1f6   :  { %7206 = vmatprep.subr.bf16.mxu1 %v7311_v1 }
 0x1f9   :  { %7207 = vmatpush3.bf16.msra.mxu1 %v7311_v1  ;;  %v1159_v1 = vld [vmem:[#allocation9 + $0x248] sm:$0xff] }
 0x1fa   :  { %7208 = vmatprep.subr.bf16.mxu1 %v7312_v3 }
 0x1fd   :  { %7209 = vmatpush3.bf16.msra.mxu1 %v7312_v3  ;;  %v1163_v3 = vld [vmem:[#allocation9 + $0x268] sm:$0xff] }
 0x1fe   :  { %7210 = vmatprep.subr.bf16.mxu1 %v7313_v4 }
 0x201   :  { %7211 = vmatpush3.bf16.msra.mxu1 %v7313_v4 }
 0x202   :  { %2059 = vmatprep.subr.bf16.mxu1 %v6410_v9  ;;  %v1104_v9 = vld [vmem:[#allocation9 + $0x98] sm:$0xff] }
 0x204   :  { %7213 = vmatmul.mubr.bf16.vlgmr.msra.gmra.mrb[0].mxu1 %v7773_v48  ;;  %v6442_v48 = vcombine.high %v1118_v21, %v1122_v22 }
 0x205   :  { %7216 = vmatprep.mubr.bf16.mxu1 %v7789_v6  ;;  %2060 = vmatpush1.bf16.msra.mxu1 %v6409_v49  ;;  %v1130_v6 = vld [vmem:[#allocation9 + $0x168] sm:$0xff] }
 0x206   :  { %2061 = vmatprep.subr.bf16.mxu1 %v6418_v12  ;;  %v6450_v26 = vcombine.high %v1126_v24, %v1130_v6  ;;  %v6449_v29 = vcombine.low %v1126_v24, %v1130_v6  ;;  %v6354_v12 = vcombine.high %v1159_v1, %v1163_v3  ;;  %v1116_v24 = vld [vmem:[#allocation9 + $0xf8] sm:$0xff] }
 0x209   :  { %2062 = vmatpush1.bf16.msra.mxu1 %v6417_v15  ;;  %v6421_v15 = vcombine.low %v1096_v62, %v1100_v63  ;;  %v1207_v63 = vld [vmem:[#allocation9 + $0x3c8] sm:$0xff] }
 0x20a   :  { %2063 = vmatprep.subr.bf16.mxu1 %v6426_v16  ;;  %v1167_v16 = vld [vmem:[#allocation9 + $0x288] sm:$0xff] }
 0x20c   :  { %7217 = vmatmul.mubr.bf16.gmra.mrb[4].mxu1 %v7786_v5  ;;  %v1198_v5 = vld [vmem:[#allocation9 + $0x380] sm:$0xff] }
 0x20d   :  { %2064 = vmatpush1.bf16.msra.mxu1 %v6425_v19  ;;  %v6392_v34 = vcombine.high %v1198_v5, %v1202_v33  ;;  %v6391_v35 = vcombine.low %v1198_v5, %v1202_v33  ;;  %2091 = vmatprep.mubr.bf16.mxu1 %v7576_v50  ;;  %v1124_v5 = vld [vmem:[#allocation9 + $0x138] sm:$0xff]  ;;  %v6370_v33 = vcombine.high %v1175_v27, %v1179_v28 }
 0x20e   :  { %2065 = vmatprep.subr.bf16.mxu1 %v6434_v20  ;;  %v6430_v20 = vcombine.high %v1104_v9, %v1108_v10 }
 0x20f   :  { %1546 = vmatprep.subr.bf16.mxu0 %v6392_v34 }
 0x210   :  { %1547 = vmatpush1.bf16.msra.mxu0 %v6391_v35  ;;  %v1183_v35 = vld [vmem:[#allocation9 + $0x308] sm:$0xff] }
 0x211   :  { %2066 = vmatpush1.bf16.msra.mxu1 %v6433_v23  ;;  %1548 = vmatprep.subr.bf16.mxu0 %v6400_v42  ;;  %v6353_v23 = vcombine.low %v1159_v1, %v1163_v3  ;;  %v6378_v41 = vcombine.high %v1183_v35, %v1187_v36  ;;  %v2184_v3 = vld [vmem:[#allocation9 + $0x408] sm:$0xff] }
 0x212   :  { %2067 = vmatprep.subr.bf16.mxu1 %v6442_v48  ;;  %v1112_v48 = vld [vmem:[#allocation9 + $0xd8] sm:$0xff] }
 0x213   :  { %v6437_v34 = vcombine.low %v1112_v48, %v1116_v24 }
 0x214   :  { %1549 = vmatpush1.bf16.msra.mxu0 %v6399_v43  ;;  %v1191_v43 = vld [vmem:[#allocation9 + $0x348] sm:$0xff] }
 0x215   :  { %2068 = vmatpush1.bf16.msra.mxu1 %v6441_v25  ;;  %1575 = vmatprep.subr.bf16.mxu0 %v6346_v31  ;;  %v6362_v25 = vcombine.high %v1167_v16, %v1171_v17  ;;  %v6386_v52 = vcombine.high %v1191_v43, %v1195_v44 }
 0x216   :  { %2069 = vmatprep.subr.bf16.mxu1 %v6450_v26  ;;  %v6429_v26 = vcombine.low %v1104_v9, %v1108_v10  ;;  %v1152_v10 = vld [vmem:[#allocation9 + $0x210] sm:$0xff] }
 0x219   :  { %2070 = vmatpush1.bf16.msra.mxu1 %v6449_v29  ;;  %v6438_v29 = vcombine.high %v1112_v48, %v1116_v24  ;;  %v2200_v24 = vld [vmem:[#allocation9 + $0x488] sm:$0xff] }
 0x21a   :  { %2071 = vmatprep.subr.bf16.mxu1 %v6458_v30  ;;  %v6361_v30 = vcombine.low %v1167_v16, %v1171_v17  ;;  %v2196_v16 = vld [vmem:[#allocation9 + $0x468] sm:$0xff] }
 0x21d   :  { %2072 = vmatpush1.bf16.msra.mxu1 %v6457_v32  ;;  %v1120_v32 = vld [vmem:[#allocation9 + $0x118] sm:$0xff] }
 0x21e   :  { %2073 = vmatprep.subr.bf16.mxu1 %v6466_v38  ;;  %v6446_v37 = vcombine.high %v1120_v32, %v1124_v5  ;;  %v6369_v38 = vcombine.low %v1175_v27, %v1179_v28  ;;  %v6445_v42 = vcombine.low %v1120_v32, %v1124_v5  ;;  %v1168_v28 = vld [vmem:[#allocation9 + $0x290] sm:$0xff]  ;;  %v2208_v5 = vld [vmem:[#allocation9 + $0x4c8] sm:$0xff] }
 0x221   :  { %2074 = vmatpush1.bf16.msra.mxu1 %v6465_v39  ;;  %v1128_v39 = vld [vmem:[#allocation9 + $0x158] sm:$0xff] }
 0x222   :  { %2141 = vmatprep.subr.bf16.mxu1 %v6414_v46  ;;  %v6454_v45 = vcombine.high %v1128_v39, %v1132_v40  ;;  %v6377_v46 = vcombine.low %v1183_v35, %v1187_v36  ;;  %v6453_v31 = vcombine.low %v1128_v39, %v1132_v40  ;;  %v1176_v36 = vld [vmem:[#allocation9 + $0x2d0] sm:$0xff]  ;;  %v2216_v40 = vld [vmem:[#allocation9 + $0x508] sm:$0xff] }
 0x2d7   :  { %v7214_v55 = vpop.f32.mrb[0].mxu1 }
 0x2d8   :  { %v7814_v56 = vadd.f32 %v7214_v55, %v6334_v54  ;;  %v991_v57 = vpop.f32.mrb[1].mxu1 }
 0x2d9   :  { %v1037_v58 = vadd.f32 %v6334_v54, %v991_v57  ;;  %v7215_v59 = vpop.f32.mrb[2].mxu1  ;;  %v6385_v57 = vcombine.low %v1191_v43, %v1195_v44  ;;  %v1184_v44 = vld [vmem:[#allocation9 + $0x310] sm:$0xff] }
 0x2da   :  { %v7816_v60 = vadd.f32 %v7215_v59, %v6334_v54  ;;  %v994_v61 = vpop.f32.mrb[3].mxu1  ;;  %v1148_v59 = vld [vmem:[#allocation9 + $0x1f8] sm:$0xff] }
 0x2db   :  { %v1045_v0 = vmax.f32 %v1037_v58, 0.0  ;;  %v1038_v2 = vadd.f32 %v6334_v54, %v994_v61  ;;  %v1144_v58 = vld [vmem:[#allocation9 + $0x1d8] sm:$0xff] }
 0x2dc   :  { %v6469_v9 = vcombine.low %v1144_v58, %v1148_v59 }
 0x2dd   :  { %v7818_v4 = vpack.c.bf16 %v1045_v0, %v1045_v0  ;;  %v1046_v7 = vmax.f32 %v1038_v2, 0.0  ;;  %v1211_v0 = vld [vmem:[#allocation9 + $0x3e8] sm:$0xff]  ;;  %v6470_v2 = vcombine.high %v1144_v58, %v1148_v59 }
 0x2de   :  { %v2232_v59 = vld [vmem:[#allocation9 + $0x588] sm:$0xff] }
 0x2df   :  { %v7820_v11 = vpack.c.bf16 %v1046_v7, %v1046_v7  ;;  %v7218_v49 = vpop.f32.mrb[4].mxu1  ;;  %2092 = vmatmul.mubr.bf16.vlgmr.msra.gmra.mrb[8].mxu1 %v7818_v4  ;;  %v2188_v7 = vld [vmem:[#allocation9 + $0x428] sm:$0xff] }
 0x2e0   :  { %v7823_v13 = vadd.f32 %v7218_v49, %v6334_v54  ;;  %2142 = vmatpush1.bf16.msra.mxu1 %v6413_v47  ;;  %v1007_v14 = vpop.f32.mrb[5].mxu1  ;;  %2173 = vmatprep.mubr.bf16.mxu1 %v7576_v50  ;;  %v1136_v47 = vld [vmem:[#allocation9 + $0x198] sm:$0xff]  ;;  %v1156_v49 = vld [vmem:[#allocation9 + $0x230] sm:$0xff] }
 0x2e1   :  { %v7826_v18 = vadd.f32 %v6334_v54, %v1007_v14  ;;  %v7219_v19 = vpop.f32.mrb[6].mxu1  ;;  %1567 = vmatmul.mubr.bf16.vlgmr.msra.gmra.mrb[12].mxu0 %v7820_v11  ;;  %2143 = vmatprep.subr.bf16.mxu1 %v6422_v8  ;;  %v6462_v55 = vcombine.high %v1136_v47, %v1140_v51  ;;  %v6461_v62 = vcombine.low %v1136_v47, %v1140_v51  ;;  %v2224_v51 = vld [vmem:[#allocation9 + $0x548] sm:$0xff] }
 0x2e2   :  { %v7829_v21 = vadd.f32 %v7219_v19, %v6334_v54  ;;  %1576 = vmatpush1.bf16.msra.mxu0 %v6345_v53  ;;  %v1010_v22 = vpop.f32.mrb[7].mxu1  ;;  %1607 = vmatprep.mubr.bf16.mxu0 %v7576_v50  ;;  %v1199_v53 = vld [vmem:[#allocation9 + $0x388] sm:$0xff]  ;;  %v6402_v8 = vcombine.high %v1207_v63, %v1211_v0  ;;  %v6401_v14 = vcombine.low %v1207_v63, %v1211_v0  ;;  %v1200_v0 = vld [vmem:[#allocation9 + $0x390] sm:$0xff] }
 0x2e3   :  { %v7832_v6 = vadd.f32 %v6334_v54, %v1010_v22  ;;  %1577 = vmatprep.subr.bf16.mxu0 %v6354_v12  ;;  %v1203_v54 = vld [vmem:[#allocation9 + $0x3a8] sm:$0xff]  ;;  %v6474_v12 = vcombine.high %v2184_v3, %v2188_v7  ;;  %v6348_v17 = vcombine.high %v1152_v10, %v1156_v49  ;;  %v6473_v19 = vcombine.low %v2184_v3, %v2188_v7  ;;  %v1164_v22 = vld [vmem:[#allocation9 + $0x270] sm:$0xff] }
 0x2e4   :  { %2144 = vmatpush1.bf16.msra.mxu1 %v6421_v15  ;;  %v6394_v61 = vcombine.high %v1199_v53, %v1203_v54  ;;  %v6393_v1 = vcombine.low %v1199_v53, %v1203_v54  ;;  %v2192_v15 = vld [vmem:[#allocation9 + $0x448] sm:$0xff]  ;;  %v6347_v48 = vcombine.low %v1152_v10, %v1156_v49  ;;  %v1192_v54 = vld [vmem:[#allocation9 + $0x350] sm:$0xff] }
 0x2e5   :  { %2145 = vmatprep.subr.bf16.mxu1 %v6430_v20  ;;  %v1160_v20 = vld [vmem:[#allocation9 + $0x250] sm:$0xff]  ;;  %v6481_v27 = vcombine.low %v2192_v15, %v2196_v16  ;;  %v2240_v7 = vld [vmem:[#allocation9 + $0x5c8] sm:$0xff] }
 0x2e6   :  { %1578 = vmatpush1.bf16.msra.mxu0 %v6353_v23  ;;  %v6482_v23 = vcombine.high %v2192_v15, %v2196_v16  ;;  %v6355_v32 = vcombine.low %v1160_v20, %v1164_v22  ;;  %v1208_v49 = vld [vmem:[#allocation9 + $0x3d0] sm:$0xff]  ;;  %v2186_v16 = vld [vmem:[#allocation9 + $0x418] sm:$0xff] }
 0x2e7   :  { %1579 = vmatprep.subr.bf16.mxu0 %v6362_v25  ;;  %v2204_v25 = vld [vmem:[#allocation9 + $0x4a8] sm:$0xff] }
 0x2e8   :  { %2146 = vmatpush1.bf16.msra.mxu1 %v6429_v26  ;;  %v6356_v26 = vcombine.high %v1160_v20, %v1164_v22  ;;  %v6489_v35 = vcombine.low %v2200_v24, %v2204_v25  ;;  %v1153_v22 = vld [vmem:[#allocation9 + $0x218] sm:$0xff] }
 0x2e9   :  { %2147 = vmatprep.subr.bf16.mxu1 %v6438_v29  ;;  %v1172_v29 = vld [vmem:[#allocation9 + $0x2b0] sm:$0xff] }
 0x2ea   :  { %1580 = vmatpush1.bf16.msra.mxu0 %v6361_v30  ;;  %v6490_v30 = vcombine.high %v2200_v24, %v2204_v25  ;;  %v6363_v39 = vcombine.low %v1168_v28, %v1172_v29 }
 0x2eb   :  { %1581 = vmatprep.subr.bf16.mxu0 %v6370_v33  ;;  %v2212_v33 = vld [vmem:[#allocation9 + $0x4e8] sm:$0xff] }
 0x2ec   :  { %2148 = vmatpush1.bf16.msra.mxu1 %v6437_v34  ;;  %v6364_v34 = vcombine.high %v1168_v28, %v1172_v29  ;;  %v6497_v43 = vcombine.low %v2208_v5, %v2212_v33 }
 0x2ed   :  { %2149 = vmatprep.subr.bf16.mxu1 %v6446_v37  ;;  %v1180_v37 = vld [vmem:[#allocation9 + $0x2f0] sm:$0xff] }
 0x2ee   :  { %1582 = vmatpush1.bf16.msra.mxu0 %v6369_v38  ;;  %v6498_v38 = vcombine.high %v2208_v5, %v2212_v33  ;;  %v6371_v47 = vcombine.low %v1176_v36, %v1180_v37 }
 0x2ef   :  { %1583 = vmatprep.subr.bf16.mxu0 %v6378_v41  ;;  %v2220_v41 = vld [vmem:[#allocation9 + $0x528] sm:$0xff] }
 0x2f0   :  { %2150 = vmatpush1.bf16.msra.mxu1 %v6445_v42  ;;  %v6372_v42 = vcombine.high %v1176_v36, %v1180_v37  ;;  %v6505_v53 = vcombine.low %v2216_v40, %v2220_v41 }
 0x2f1   :  { %2151 = vmatprep.subr.bf16.mxu1 %v6454_v45  ;;  %v1188_v45 = vld [vmem:[#allocation9 + $0x330] sm:$0xff] }
 0x2f2   :  { %1584 = vmatpush1.bf16.msra.mxu0 %v6377_v46  ;;  %v6506_v46 = vcombine.high %v2216_v40, %v2220_v41  ;;  %v6379_v58 = vcombine.low %v1184_v44, %v1188_v45 }
 0x2f3   :  { %1585 = vmatprep.subr.bf16.mxu0 %v6386_v52  ;;  %v2228_v52 = vld [vmem:[#allocation9 + $0x568] sm:$0xff] }
 0x2f4   :  { %2152 = vmatpush1.bf16.msra.mxu1 %v6453_v31  ;;  %v6380_v31 = vcombine.high %v1184_v44, %v1188_v45  ;;  %v6513_v63 = vcombine.low %v2224_v51, %v2228_v52 }
 0x2f5   :  { %2153 = vmatprep.subr.bf16.mxu1 %v6462_v55  ;;  %v1196_v55 = vld [vmem:[#allocation9 + $0x370] sm:$0xff] }
 0x2f6   :  { %1586 = vmatpush1.bf16.msra.mxu0 %v6385_v57  ;;  %v6514_v57 = vcombine.high %v2224_v51, %v2228_v52  ;;  %v6387_v3 = vcombine.low %v1192_v54, %v1196_v55 }
 0x2f7   :  { %1587 = vmatprep.subr.bf16.mxu0 %v6394_v61  ;;  %v2236_v61 = vld [vmem:[#allocation9 + $0x5a8] sm:$0xff] }
 0x2f8   :  { %2154 = vmatpush1.bf16.msra.mxu1 %v6461_v62  ;;  %v6388_v62 = vcombine.high %v1192_v54, %v1196_v55  ;;  %v6521_v10 = vcombine.low %v2232_v59, %v2236_v61 }
 0x2f9   :  { %2155 = vmatprep.subr.bf16.mxu1 %v6470_v2  ;;  %v1204_v2 = vld [vmem:[#allocation9 + $0x3b0] sm:$0xff] }
 0x2fa   :  { %1588 = vmatpush1.bf16.msra.mxu0 %v6393_v1  ;;  %v6522_v1 = vcombine.high %v2232_v59, %v2236_v61  ;;  %v6395_v15 = vcombine.low %v1200_v0, %v1204_v2 }
 0x2fb   :  { %1589 = vmatprep.subr.bf16.mxu0 %v6402_v8  ;;  %v2244_v8 = vld [vmem:[#allocation9 + $0x5e8] sm:$0xff] }
 0x2fc   :  { %2156 = vmatpush1.bf16.msra.mxu1 %v6469_v9  ;;  %v6396_v9 = vcombine.high %v1200_v0, %v1204_v2  ;;  %v6529_v20 = vcombine.low %v2240_v7, %v2244_v8 }
 0x2fd   :  { %2608 = vmatprep.subr.bf16.mxu1 %v6474_v12  ;;  %v1212_v12 = vld [vmem:[#allocation9 + $0x3f0] sm:$0xff] }
 0x2fe   :  { %1590 = vmatpush1.bf16.msra.mxu0 %v6401_v14  ;;  %v6530_v14 = vcombine.high %v2240_v7, %v2244_v8  ;;  %v6403_v25 = vcombine.low %v1208_v49, %v1212_v12 }
 0x2ff   :  { %2174 = vmatmul.mubr.bf16.vlgmr.msra.gmra.mrb[12].mxu1 %v7818_v4  ;;  %1616 = vmatprep.subr.bf16.mxu0 %v6348_v17  ;;  %v2190_v17 = vld [vmem:[#allocation9 + $0x438] sm:$0xff] }
 0x300   :  { %2609 = vmatpush1.bf16.msra.mxu1 %v6473_v19  ;;  %2640 = vmatprep.mubr.bf16.mxu1 %v7576_v50  ;;  %v6404_v19 = vcombine.high %v1208_v49, %v1212_v12  ;;  %v6478_v24 = vcombine.high %v2186_v16, %v2190_v17  ;;  %v6477_v29 = vcombine.low %v2186_v16, %v2190_v17 }
 0x301   :  { %1608 = vmatmul.mubr.bf16.vlgmr.msra.gmra.mrb[16].mxu0 %v7820_v11  ;;  %2610 = vmatprep.subr.bf16.mxu1 %v6482_v23  ;;  %v1157_v23 = vld [vmem:[#allocation9 + $0x238] sm:$0xff] }
 0x302   :  { %1617 = vmatpush1.bf16.msra.mxu0 %v6347_v48  ;;  %1648 = vmatprep.mubr.bf16.mxu0 %v7576_v50  ;;  %v1047_v48 = vmax.f32 %v7814_v56, 0.0  ;;  %v6350_v28 = vcombine.high %v1153_v22, %v1157_v23  ;;  %v2206_v56 = vld [vmem:[#allocation9 + $0x4b8] sm:$0xff] }
 0x303   :  { %1618 = vmatprep.subr.bf16.mxu0 %v6356_v26  ;;  %v2194_v26 = vld [vmem:[#allocation9 + $0x458] sm:$0xff] }
 0x304   :  { %2611 = vmatpush1.bf16.msra.mxu1 %v6481_v27  ;;  %v2198_v27 = vld [vmem:[#allocation9 + $0x478] sm:$0xff]  ;;  %v7839_v5 = vpack.c.bf16 %v1047_v48, %v1047_v48 }
 0x305   :  { %2612 = vmatprep.subr.bf16.mxu1 %v6490_v30  ;;  %v1161_v30 = vld [vmem:[#allocation9 + $0x258] sm:$0xff]  ;;  %v6486_v33 = vcombine.high %v2194_v26, %v2198_v27  ;;  %v6485_v37 = vcombine.low %v2194_v26, %v2198_v27  ;;  %v2741_v27 = vld [vmem:[#allocation9 + $0x608] sm:$0xff] }
 0x306   :  { %1619 = vmatpush1.bf16.msra.mxu0 %v6355_v32  ;;  %v1165_v32 = vld [vmem:[#allocation9 + $0x278] sm:$0xff] }
 0x307   :  { %1620 = vmatprep.subr.bf16.mxu0 %v6364_v34  ;;  %v6349_v34 = vcombine.low %v1153_v22, %v1157_v23  ;;  %v6358_v36 = vcombine.high %v1161_v30, %v1165_v32  ;;  %v6357_v41 = vcombine.low %v1161_v30, %v1165_v32  ;;  %v1209_v48 = vld [vmem:[#allocation9 + $0x3d8] sm:$0xff]  ;;  %v1085_v32 = vld [vmem:[#allocation9] sm:$0xff] }
 0x308   :  { %2613 = vmatpush1.bf16.msra.mxu1 %v6489_v35  ;;  %v2202_v35 = vld [vmem:[#allocation9 + $0x498] sm:$0xff] }
 0x309   :  { %2614 = vmatprep.subr.bf16.mxu1 %v6498_v38  ;;  %v1169_v38 = vld [vmem:[#allocation9 + $0x298] sm:$0xff]  ;;  %v6494_v40 = vcombine.high %v2202_v35, %v2206_v56  ;;  %v6493_v45 = vcombine.low %v2202_v35, %v2206_v56  ;;  %v2749_v56 = vld [vmem:[#allocation9 + $0x648] sm:$0xff] }
 0x30a   :  { %1621 = vmatpush1.bf16.msra.mxu0 %v6363_v39  ;;  %v1173_v39 = vld [vmem:[#allocation9 + $0x2b8] sm:$0xff] }
 0x30b   :  { %1622 = vmatprep.subr.bf16.mxu0 %v6372_v42  ;;  %v2210_v42 = vld [vmem:[#allocation9 + $0x4d8] sm:$0xff]  ;;  %v6366_v44 = vcombine.high %v1169_v38, %v1173_v39  ;;  %v6365_v52 = vcombine.low %v1169_v38, %v1173_v39  ;;  %v1093_v39 = vld [vmem:[#allocation9 + $0x40] sm:$0xff] }
 0x30c   :  { %2615 = vmatpush1.bf16.msra.mxu1 %v6497_v43  ;;  %v2214_v43 = vld [vmem:[#allocation9 + $0x4f8] sm:$0xff] }
 0x30d   :  { %2616 = vmatprep.subr.bf16.mxu1 %v6506_v46  ;;  %v1177_v46 = vld [vmem:[#allocation9 + $0x2d8] sm:$0xff]  ;;  %v6502_v51 = vcombine.high %v2210_v42, %v2214_v43  ;;  %v6501_v55 = vcombine.low %v2210_v42, %v2214_v43  ;;  %v2757_v43 = vld [vmem:[#allocation9 + $0x688] sm:$0xff] }
 0x30e   :  { %1623 = vmatpush1.bf16.msra.mxu0 %v6371_v47  ;;  %v1181_v47 = vld [vmem:[#allocation9 + $0x2f8] sm:$0xff] }
 0x30f   :  { %1624 = vmatprep.subr.bf16.mxu0 %v6380_v31  ;;  %v2218_v31 = vld [vmem:[#allocation9 + $0x518] sm:$0xff]  ;;  %v6374_v54 = vcombine.high %v1177_v46, %v1181_v47  ;;  %v6373_v61 = vcombine.low %v1177_v46, %v1181_v47  ;;  %v1101_v47 = vld [vmem:[#allocation9 + $0x80] sm:$0xff] }
 0x310   :  { %2617 = vmatpush1.bf16.msra.mxu1 %v6505_v53  ;;  %v2222_v53 = vld [vmem:[#allocation9 + $0x538] sm:$0xff] }
 0x311   :  { %2618 = vmatprep.subr.bf16.mxu1 %v6514_v57  ;;  %v1185_v57 = vld [vmem:[#allocation9 + $0x318] sm:$0xff]  ;;  %v6510_v59 = vcombine.high %v2218_v31, %v2222_v53  ;;  %v6509_v2 = vcombine.low %v2218_v31, %v2222_v53  ;;  %v2765_v53 = vld [vmem:[#allocation9 + $0x6c8] sm:$0xff] }
 0x312   :  { %1625 = vmatpush1.bf16.msra.mxu0 %v6379_v58  ;;  %v1189_v58 = vld [vmem:[#allocation9 + $0x338] sm:$0xff] }
 0x313   :  { %1626 = vmatprep.subr.bf16.mxu0 %v6388_v62  ;;  %v2226_v62 = vld [vmem:[#allocation9 + $0x558] sm:$0xff]  ;;  %v6382_v0 = vcombine.high %v1185_v57, %v1189_v58  ;;  %v6381_v8 = vcombine.low %v1185_v57, %v1189_v58  ;;  %v1109_v58 = vld [vmem:[#allocation9 + $0xc0] sm:$0xff] }
 0x314   :  { %2619 = vmatpush1.bf16.msra.mxu1 %v6513_v63  ;;  %v2230_v63 = vld [vmem:[#allocation9 + $0x578] sm:$0xff] }
 0x315   :  { %2620 = vmatprep.subr.bf16.mxu1 %v6522_v1  ;;  %v1193_v1 = vld [vmem:[#allocation9 + $0x358] sm:$0xff]  ;;  %v6518_v7 = vcombine.high %v2226_v62, %v2230_v63  ;;  %v6517_v12 = vcombine.low %v2226_v62, %v2230_v63  ;;  %v2773_v63 = vld [vmem:[#allocation9 + $0x708] sm:$0xff] }
 0x316   :  { %1627 = vmatpush1.bf16.msra.mxu0 %v6387_v3  ;;  %v1197_v3 = vld [vmem:[#allocation9 + $0x378] sm:$0xff] }
 0x317   :  { %1628 = vmatprep.subr.bf16.mxu0 %v6396_v9  ;;  %v2234_v9 = vld [vmem:[#allocation9 + $0x598] sm:$0xff]  ;;  %v6390_v49 = vcombine.high %v1193_v1, %v1197_v3  ;;  %v6389_v17 = vcombine.low %v1193_v1, %v1197_v3  ;;  %v1117_v1 = vld [vmem:[#allocation9 + $0x100] sm:$0xff] }
 0x318   :  { %2621 = vmatpush1.bf16.msra.mxu1 %v6521_v10  ;;  %v2238_v10 = vld [vmem:[#allocation9 + $0x5b8] sm:$0xff]  ;;  %v1121_v3 = vld [vmem:[#allocation9 + $0x120] sm:$0xff] }
 0x319   :  { %2622 = vmatprep.subr.bf16.mxu1 %v6530_v14  ;;  %v1201_v14 = vld [vmem:[#allocation9 + $0x398] sm:$0xff]  ;;  %v6526_v16 = vcombine.high %v2234_v9, %v2238_v10  ;;  %v6525_v23 = vcombine.low %v2234_v9, %v2238_v10  ;;  %v2781_v9 = vld [vmem:[#allocation9 + $0x748] sm:$0xff] }
 0x31a   :  { %1629 = vmatpush1.bf16.msra.mxu0 %v6395_v15  ;;  %v1205_v15 = vld [vmem:[#allocation9 + $0x3b8] sm:$0xff]  ;;  %v2785_v10 = vld [vmem:[#allocation9 + $0x768] sm:$0xff] }
 0x31b   :  { %1630 = vmatprep.subr.bf16.mxu0 %v6404_v19  ;;  %v2242_v19 = vld [vmem:[#allocation9 + $0x5d8] sm:$0xff]  ;;  %v6398_v22 = vcombine.high %v1201_v14, %v1205_v15  ;;  %v6397_v26 = vcombine.low %v1201_v14, %v1205_v15  ;;  %v1125_v14 = vld [vmem:[#allocation9 + $0x140] sm:$0xff] }
 0x31c   :  { %2623 = vmatpush1.bf16.msra.mxu1 %v6529_v20  ;;  %v2246_v20 = vld [vmem:[#allocation9 + $0x5f8] sm:$0xff]  ;;  %v1129_v15 = vld [vmem:[#allocation9 + $0x160] sm:$0xff] }
 0x31d   :  { %2690 = vmatprep.subr.bf16.mxu1 %v6478_v24  ;;  %v1213_v24 = vld [vmem:[#allocation9 + $0x3f8] sm:$0xff]  ;;  %v6533_v30 = vcombine.low %v2242_v19, %v2246_v20 }
 0x31e   :  { %1631 = vmatpush1.bf16.msra.mxu0 %v6403_v25  ;;  %v6534_v25 = vcombine.high %v2242_v19, %v2246_v20  ;;  %v6405_v35 = vcombine.low %v1209_v48, %v1213_v24  ;;  %v2789_v19 = vld [vmem:[#allocation9 + $0x788] sm:$0xff] }
 0x31f   :  { %2641 = vmatmul.mubr.bf16.vlgmr.msra.gmra.mrb[16].mxu1 %v7839_v5  ;;  %1657 = vmatprep.subr.bf16.mxu0 %v6350_v28  ;;  %v2745_v28 = vld [vmem:[#allocation9 + $0x628] sm:$0xff] }
 0x320   :  { %2691 = vmatpush1.bf16.msra.mxu1 %v6477_v29  ;;  %2722 = vmatprep.mubr.bf16.mxu1 %v7576_v50  ;;  %v6406_v29 = vcombine.high %v1209_v48, %v1213_v24  ;;  %v6537_v38 = vcombine.low %v2741_v27, %v2745_v28  ;;  %v2793_v20 = vld [vmem:[#allocation9 + $0x7a8] sm:$0xff]  ;;  %v1133_v48 = vld [vmem:[#allocation9 + $0x180] sm:$0xff] }
 0x321   :  { %1649 = vmatmul.mubr.bf16.vlgmr.msra.gmra.mrb[20].mxu0 %v7820_v11  ;;  %2692 = vmatprep.subr.bf16.mxu1 %v6486_v33  ;;  %v1089_v33 = vld [vmem:[#allocation9 + $0x20] sm:$0xff] }
 0x322   :  { %1658 = vmatpush1.bf16.msra.mxu0 %v6349_v34  ;;  %1689 = vmatprep.mubr.bf16.mxu0 %v7576_v50  ;;  %v6538_v34 = vcombine.high %v2741_v27, %v2745_v28  ;;  %v6407_v42 = vcombine.low %v1085_v32, %v1089_v33  ;;  %v1137_v24 = vld [vmem:[#allocation9 + $0x1a0] sm:$0xff]  ;;  %v2797_v27 = vld [vmem:[#allocation9 + $0x7c8] sm:$0xff] }
 0x323   :  { %1659 = vmatprep.subr.bf16.mxu0 %v6358_v36  ;;  %v2753_v36 = vld [vmem:[#allocation9 + $0x668] sm:$0xff] }
 0x324   :  { %2693 = vmatpush1.bf16.msra.mxu1 %v6485_v37  ;;  %v6408_v37 = vcombine.high %v1085_v32, %v1089_v33  ;;  %v6545_v46 = vcombine.low %v2749_v56, %v2753_v36  ;;  %v2801_v28 = vld [vmem:[#allocation9 + $0x7e8] sm:$0xff]  ;;  %v1141_v32 = vld [vmem:[#allocation9 + $0x1c0] sm:$0xff] }
 0x325   :  { %2694 = vmatprep.subr.bf16.mxu1 %v6494_v40  ;;  %v1097_v40 = vld [vmem:[#allocation9 + $0x60] sm:$0xff] }
 0x326   :  { %1660 = vmatpush1.bf16.msra.mxu0 %v6357_v41  ;;  %v6546_v41 = vcombine.high %v2749_v56, %v2753_v36  ;;  %v6415_v31 = vcombine.low %v1093_v39, %v1097_v40  ;;  %v1145_v33 = vld [vmem:[#allocation9 + $0x1e0] sm:$0xff]  ;;  %v2743_v56 = vld [vmem:[#allocation9 + $0x618] sm:$0xff] }
 0x327   :  { %1661 = vmatprep.subr.bf16.mxu0 %v6366_v44  ;;  %v2761_v44 = vld [vmem:[#allocation9 + $0x6a8] sm:$0xff]  ;;  %v2747_v36 = vld [vmem:[#allocation9 + $0x638] sm:$0xff] }
 0x328   :  { %2695 = vmatpush1.bf16.msra.mxu1 %v6493_v45  ;;  %v6416_v45 = vcombine.high %v1093_v39, %v1097_v40  ;;  %v6553_v57 = vcombine.low %v2757_v43, %v2761_v44  ;;  %v1087_v39 = vld [vmem:[#allocation9 + $0x10] sm:$0xff] }
 0x329   :  { %2696 = vmatprep.subr.bf16.mxu1 %v6502_v51  ;;  %v1105_v51 = vld [vmem:[#allocation9 + $0xa0] sm:$0xff]  ;;  %v1091_v40 = vld [vmem:[#allocation9 + $0x30] sm:$0xff] }
 0x32a   :  { %1662 = vmatpush1.bf16.msra.mxu0 %v6365_v52  ;;  %v6554_v52 = vcombine.high %v2757_v43, %v2761_v44  ;;  %v6423_v62 = vcombine.low %v1101_v47, %v1105_v51  ;;  %v6463_v43 = vcombine.low %v1141_v32, %v1145_v33  ;;  %v2751_v44 = vld [vmem:[#allocation9 + $0x658] sm:$0xff] }
 0x32b   :  { %1663 = vmatprep.subr.bf16.mxu0 %v6374_v54  ;;  %v2769_v54 = vld [vmem:[#allocation9 + $0x6e8] sm:$0xff] }
 0x32c   :  { %2697 = vmatpush1.bf16.msra.mxu1 %v6501_v55  ;;  %v6424_v55 = vcombine.high %v1101_v47, %v1105_v51  ;;  %v6541_v47 = vcombine.low %v2743_v56, %v2747_v36  ;;  %v1095_v51 = vld [vmem:[#allocation9 + $0x50] sm:$0xff] }
 0x32d   :  { %2698 = vmatprep.subr.bf16.mxu1 %v6510_v59  ;;  %v1113_v59 = vld [vmem:[#allocation9 + $0xe0] sm:$0xff] }
 0x32e   :  { %1664 = vmatpush1.bf16.msra.mxu0 %v6373_v61  ;;  %v6562_v61 = vcombine.high %v2765_v53, %v2769_v54 }
 0x32f   :  { %1665 = vmatprep.subr.bf16.mxu0 %v6382_v0  ;;  %v6432_v0 = vcombine.high %v1109_v58, %v1113_v59 }
 0x330   :  { %2699 = vmatpush1.bf16.msra.mxu1 %v6509_v2  ;;  %v6561_v2 = vcombine.low %v2765_v53, %v2769_v54  ;;  %v6411_v54 = vcombine.low %v1087_v39, %v1091_v40 }
 0x331   :  { %2700 = vmatprep.subr.bf16.mxu1 %v6518_v7 }
 0x332   :  { %1666 = vmatpush1.bf16.msra.mxu0 %v6381_v8  ;;  %v6431_v8 = vcombine.low %v1109_v58, %v1113_v59  ;;  %v1103_v59 = vld [vmem:[#allocation9 + $0x90] sm:$0xff] }
 0x333   :  { %1667 = vmatprep.subr.bf16.mxu0 %v6390_v49  ;;  %v6440_v49 = vcombine.high %v1117_v1, %v1121_v3 }
 0x334   :  { %2701 = vmatpush1.bf16.msra.mxu1 %v6517_v12 }
 0x335   :  { %2702 = vmatprep.subr.bf16.mxu1 %v6526_v16  ;;  %v6578_v16 = vcombine.high %v2781_v9, %v2785_v10 }
 0x336   :  { %1668 = vmatpush1.bf16.msra.mxu0 %v6389_v17  ;;  %v6439_v17 = vcombine.low %v1117_v1, %v1121_v3  ;;  %v1111_v3 = vld [vmem:[#allocation9 + $0xd0] sm:$0xff] }
 0x337   :  { %1669 = vmatprep.subr.bf16.mxu0 %v6398_v22  ;;  %v6448_v22 = vcombine.high %v1125_v14, %v1129_v15 }
 0x338   :  { %2703 = vmatpush1.bf16.msra.mxu1 %v6525_v23  ;;  %v6577_v23 = vcombine.low %v2781_v9, %v2785_v10  ;;  %v2775_v10 = vld [vmem:[#allocation9 + $0x718] sm:$0xff] }
 0x339   :  { %2704 = vmatprep.subr.bf16.mxu1 %v6534_v25  ;;  %v6586_v25 = vcombine.high %v2789_v19, %v2793_v20 }
 0x33a   :  { %1670 = vmatpush1.bf16.msra.mxu0 %v6397_v26  ;;  %v6447_v26 = vcombine.low %v1125_v14, %v1129_v15  ;;  %v1119_v15 = vld [vmem:[#allocation9 + $0x110] sm:$0xff] }
 0x33b   :  { %1671 = vmatprep.subr.bf16.mxu0 %v6406_v29  ;;  %v6456_v29 = vcombine.high %v1133_v48, %v1137_v24 }
 0x33c   :  { %2705 = vmatpush1.bf16.msra.mxu1 %v6533_v30  ;;  %v6585_v30 = vcombine.low %v2789_v19, %v2793_v20  ;;  %v2783_v20 = vld [vmem:[#allocation9 + $0x758] sm:$0xff] }
 0x33d   :  { %3165 = vmatprep.subr.bf16.mxu1 %v6538_v34  ;;  %v6594_v34 = vcombine.high %v2797_v27, %v2801_v28 }
 0x33e   :  { %1672 = vmatpush1.bf16.msra.mxu0 %v6405_v35  ;;  %v6455_v35 = vcombine.low %v1133_v48, %v1137_v24  ;;  %v1127_v24 = vld [vmem:[#allocation9 + $0x150] sm:$0xff] }
 0x33f   :  { %2723 = vmatmul.mubr.bf16.vlgmr.msra.gmra.mrb[20].mxu1 %v7839_v5  ;;  %2018 = vmatprep.subr.bf16.mxu0 %v6408_v37  ;;  %v6464_v37 = vcombine.high %v1141_v32, %v1145_v33  ;;  %v1135_v33 = vld [vmem:[#allocation9 + $0x190] sm:$0xff] }
 0x340   :  { %3166 = vmatpush1.bf16.msra.mxu1 %v6537_v38  ;;  %3197 = vmatprep.mubr.bf16.mxu1 %v7576_v50  ;;  %v6593_v38 = vcombine.low %v2797_v27, %v2801_v28  ;;  %v2791_v28 = vld [vmem:[#allocation9 + $0x798] sm:$0xff] }
 0x341   :  { %1690 = vmatmul.mubr.bf16.vlgmr.msra.gmra.mrb[24].mxu0 %v7820_v11  ;;  %3167 = vmatprep.subr.bf16.mxu1 %v6546_v41  ;;  %v2777_v11 = vld [vmem:[#allocation9 + $0x728] sm:$0xff]  ;;  %v1048_v41 = vmax.f32 %v7816_v60, 0.0  ;;  %v2763_v60 = vld [vmem:[#allocation9 + $0x6b8] sm:$0xff] }
 0x342   :  { %2019 = vmatpush1.bf16.msra.mxu0 %v6407_v42  ;;  %2050 = vmatprep.mubr.bf16.mxu0 %v7576_v50  ;;  %v6570_v7 = vcombine.high %v2773_v63, %v2777_v11  ;;  %v6569_v12 = vcombine.low %v2773_v63, %v2777_v11  ;;  %v6542_v42 = vcombine.high %v2743_v56, %v2747_v36  ;;  %v2767_v11 = vld [vmem:[#allocation9 + $0x6d8] sm:$0xff] }
 0x343   :  { %2020 = vmatprep.subr.bf16.mxu0 %v6416_v45  ;;  %v2755_v45 = vld [vmem:[#allocation9 + $0x678] sm:$0xff] }
 0x344   :  { %3168 = vmatpush1.bf16.msra.mxu1 %v6545_v46  ;;  %v6412_v46 = vcombine.high %v1087_v39, %v1091_v40  ;;  %v6550_v53 = vcombine.high %v2751_v44, %v2755_v45  ;;  %v6549_v58 = vcombine.low %v2751_v44, %v2755_v45  ;;  %v2799_v36 = vld [vmem:[#allocation9 + $0x7d8] sm:$0xff]  ;;  %v1143_v40 = vld [vmem:[#allocation9 + $0x1d0] sm:$0xff]  ;;  %v3298_v44 = vld [vmem:[#allocation9 + $0x808] sm:$0xff] }
 0x345   :  { %3169 = vmatprep.subr.bf16.mxu1 %v6554_v52  ;;  %v1099_v52 = vld [vmem:[#allocation9 + $0x70] sm:$0xff]  ;;  %v3302_v45 = vld [vmem:[#allocation9 + $0x828] sm:$0xff] }
 0x346   :  { %2021 = vmatpush1.bf16.msra.mxu0 %v6415_v31  ;;  %v7850_v31 = vpack.c.bf16 %v1048_v41, %v1048_v41  ;;  %v6419_v63 = vcombine.low %v1095_v51, %v1099_v52  ;;  %v1147_v41 = vld [vmem:[#allocation9 + $0x1f0] sm:$0xff] }
 0x347   :  { %2022 = vmatprep.subr.bf16.mxu0 %v6424_v55  ;;  %v2759_v55 = vld [vmem:[#allocation9 + $0x698] sm:$0xff] }
 0x348   :  { %3170 = vmatpush1.bf16.msra.mxu1 %v6553_v57  ;;  %v6420_v57 = vcombine.high %v1095_v51, %v1099_v52  ;;  %v6557_v1 = vcombine.low %v2759_v55, %v2763_v60  ;;  %v2183_v51 = vld [vmem:[#allocation9 + $0x400] sm:$0xff] }
 0x349   :  { %3171 = vmatprep.subr.bf16.mxu1 %v6562_v61  ;;  %v1107_v61 = vld [vmem:[#allocation9 + $0xb0] sm:$0xff]  ;;  %v2187_v52 = vld [vmem:[#allocation9 + $0x420] sm:$0xff] }
 0x34a   :  { %2023 = vmatpush1.bf16.msra.mxu0 %v6423_v62  ;;  %v6558_v62 = vcombine.high %v2759_v55, %v2763_v60  ;;  %v6427_v9 = vcombine.low %v1103_v59, %v1107_v61  ;;  %v3306_v55 = vld [vmem:[#allocation9 + $0x848] sm:$0xff] }
 0x34b   :  { %2024 = vmatprep.subr.bf16.mxu0 %v6432_v0  ;;  %v2771_v0 = vld [vmem:[#allocation9 + $0x6f8] sm:$0xff]  ;;  %v3310_v60 = vld [vmem:[#allocation9 + $0x868] sm:$0xff] }
 0x34c   :  { %3172 = vmatpush1.bf16.msra.mxu1 %v6561_v2  ;;  %v6428_v2 = vcombine.high %v1103_v59, %v1107_v61  ;;  %v6565_v14 = vcombine.low %v2767_v11, %v2771_v0  ;;  %v2191_v59 = vld [vmem:[#allocation9 + $0x440] sm:$0xff] }
 0x34d   :  { %3173 = vmatprep.subr.bf16.mxu1 %v6570_v7  ;;  %v1115_v7 = vld [vmem:[#allocation9 + $0xf0] sm:$0xff]  ;;  %v2195_v61 = vld [vmem:[#allocation9 + $0x460] sm:$0xff] }
 0x34e   :  { %2025 = vmatpush1.bf16.msra.mxu0 %v6431_v8  ;;  %v6566_v8 = vcombine.high %v2767_v11, %v2771_v0  ;;  %v6435_v19 = vcombine.low %v1111_v3, %v1115_v7  ;;  %v3314_v11 = vld [vmem:[#allocation9 + $0x888] sm:$0xff] }
 0x34f   :  { %2026 = vmatprep.subr.bf16.mxu0 %v6440_v49  ;;  %v2779_v49 = vld [vmem:[#allocation9 + $0x738] sm:$0xff]  ;;  %v3318_v0 = vld [vmem:[#allocation9 + $0x8a8] sm:$0xff] }
 0x350   :  { %3174 = vmatpush1.bf16.msra.mxu1 %v6569_v12  ;;  %v6436_v12 = vcombine.high %v1111_v3, %v1115_v7  ;;  %v6573_v48 = vcombine.low %v2775_v10, %v2779_v49  ;;  %v2199_v3 = vld [vmem:[#allocation9 + $0x480] sm:$0xff] }
 0x351   :  { %3175 = vmatprep.subr.bf16.mxu1 %v6578_v16  ;;  %v1123_v16 = vld [vmem:[#allocation9 + $0x130] sm:$0xff]  ;;  %v2203_v7 = vld [vmem:[#allocation9 + $0x4a0] sm:$0xff] }
 0x352   :  { %2027 = vmatpush1.bf16.msra.mxu0 %v6439_v17  ;;  %v6574_v17 = vcombine.high %v2775_v10, %v2779_v49  ;;  %v6443_v27 = vcombine.low %v1119_v15, %v1123_v16  ;;  %v3322_v10 = vld [vmem:[#allocation9 + $0x8c8] sm:$0xff] }
 0x353   :  { %2028 = vmatprep.subr.bf16.mxu0 %v6448_v22  ;;  %v2787_v22 = vld [vmem:[#allocation9 + $0x778] sm:$0xff]  ;;  %v3326_v49 = vld [vmem:[#allocation9 + $0x8e8] sm:$0xff] }
 0x354   :  { %3176 = vmatpush1.bf16.msra.mxu1 %v6577_v23  ;;  %v6444_v23 = vcombine.high %v1119_v15, %v1123_v16  ;;  %v6581_v32 = vcombine.low %v2783_v20, %v2787_v22  ;;  %v2207_v15 = vld [vmem:[#allocation9 + $0x4c0] sm:$0xff] }
 0x355   :  { %3177 = vmatprep.subr.bf16.mxu1 %v6586_v25  ;;  %v1131_v25 = vld [vmem:[#allocation9 + $0x170] sm:$0xff]  ;;  %v2211_v16 = vld [vmem:[#allocation9 + $0x4e0] sm:$0xff] }
 0x356   :  { %2029 = vmatpush1.bf16.msra.mxu0 %v6447_v26  ;;  %v6582_v26 = vcombine.high %v2783_v20, %v2787_v22  ;;  %v6451_v56 = vcombine.low %v1127_v24, %v1131_v25  ;;  %v3330_v20 = vld [vmem:[#allocation9 + $0x908] sm:$0xff]  ;;  %v6496_v22 = vcombine.high %v2207_v15, %v2211_v16 }
 0x357   :  { %2030 = vmatprep.subr.bf16.mxu0 %v6456_v29  ;;  %v2795_v29 = vld [vmem:[#allocation9 + $0x7b8] sm:$0xff] }
 0x358   :  { %3178 = vmatpush1.bf16.msra.mxu1 %v6585_v30  ;;  %v6452_v30 = vcombine.high %v1127_v24, %v1131_v25  ;;  %v6589_v39 = vcombine.low %v2791_v28, %v2795_v29  ;;  %v2219_v24 = vld [vmem:[#allocation9 + $0x520] sm:$0xff] }
 0x359   :  { %3179 = vmatprep.subr.bf16.mxu1 %v6594_v34  ;;  %v1139_v34 = vld [vmem:[#allocation9 + $0x1b0] sm:$0xff] }
 0x35a   :  { %2031 = vmatpush1.bf16.msra.mxu0 %v6455_v35  ;;  %v6590_v35 = vcombine.high %v2791_v28, %v2795_v29  ;;  %v3342_v28 = vld [vmem:[#allocation9 + $0x968] sm:$0xff] }
 0x35b   :  { %2032 = vmatprep.subr.bf16.mxu0 %v6464_v37  ;;  %v2803_v37 = vld [vmem:[#allocation9 + $0x7f8] sm:$0xff] }
 0x35c   :  { %3180 = vmatpush1.bf16.msra.mxu1 %v6593_v38  ;;  %v6460_v38 = vcombine.high %v1135_v33, %v1139_v34 }
 0x35d   :  { %3247 = vmatprep.subr.bf16.mxu1 %v6542_v42  ;;  %v6598_v42 = vcombine.high %v2799_v36, %v2803_v37 }
 0x35e   :  { %2033 = vmatpush1.bf16.msra.mxu0 %v6463_v43  ;;  %v6459_v43 = vcombine.low %v1135_v33, %v1139_v34  ;;  %v2227_v33 = vld [vmem:[#allocation9 + $0x560] sm:$0xff] }
 0x35f   :  { %3198 = vmatmul.mubr.bf16.vlgmr.msra.gmra.mrb[24].mxu1 %v7850_v31  ;;  %2100 = vmatprep.subr.bf16.mxu0 %v6412_v46  ;;  %v6468_v46 = vcombine.high %v1143_v40, %v1147_v41 }
 0x360   :  { %3248 = vmatpush1.bf16.msra.mxu1 %v6541_v47  ;;  %3279 = vmatprep.mubr.bf16.mxu1 %v7576_v50  ;;  %v6597_v47 = vcombine.low %v2799_v36, %v2803_v37  ;;  %v3350_v36 = vld [vmem:[#allocation9 + $0x9a8] sm:$0xff] }
 0x361   :  { %2051 = vmatmul.mubr.bf16.vlgmr.msra.gmra.mrb[28].mxu0 %v7818_v4  ;;  %3249 = vmatprep.subr.bf16.mxu1 %v6550_v53  ;;  %v6602_v53 = vcombine.high %v3298_v44, %v3302_v45 }
 0x362   :  { %2101 = vmatpush1.bf16.msra.mxu0 %v6411_v54  ;;  %2132 = vmatprep.mubr.bf16.mxu0 %v7576_v50  ;;  %v6467_v54 = vcombine.low %v1143_v40, %v1147_v41  ;;  %v2235_v40 = vld [vmem:[#allocation9 + $0x5a0] sm:$0xff] }
 0x363   :  { %2102 = vmatprep.subr.bf16.mxu0 %v6420_v57  ;;  %v6472_v57 = vcombine.high %v2183_v51, %v2187_v52 }
 0x364   :  { %3250 = vmatpush1.bf16.msra.mxu1 %v6549_v58  ;;  %v6601_v58 = vcombine.low %v3298_v44, %v3302_v45  ;;  %v3358_v44 = vld [vmem:[#allocation9 + $0x9e8] sm:$0xff] }
 0x365   :  { %3251 = vmatprep.subr.bf16.mxu1 %v6558_v62  ;;  %v6610_v62 = vcombine.high %v3306_v55, %v3310_v60 }
 0x366   :  { %2103 = vmatpush1.bf16.msra.mxu0 %v6419_v63  ;;  %v6471_v63 = vcombine.low %v2183_v51, %v2187_v52  ;;  %v2243_v51 = vld [vmem:[#allocation9 + $0x5e0] sm:$0xff] }
 0x367   :  { %2104 = vmatprep.subr.bf16.mxu0 %v6428_v2  ;;  %v6480_v2 = vcombine.high %v2191_v59, %v2195_v61 }
 0x368   :  { %3252 = vmatpush1.bf16.msra.mxu1 %v6557_v1  ;;  %v6609_v1 = vcombine.low %v3306_v55, %v3310_v60  ;;  %v3304_v55 = vld [vmem:[#allocation9 + $0x838] sm:$0xff] }
 0x369   :  { %3253 = vmatprep.subr.bf16.mxu1 %v6566_v8  ;;  %v6618_v8 = vcombine.high %v3314_v11, %v3318_v0 }
 0x36a   :  { %2105 = vmatpush1.bf16.msra.mxu0 %v6427_v9  ;;  %v6479_v9 = vcombine.low %v2191_v59, %v2195_v61  ;;  %v2189_v59 = vld [vmem:[#allocation9 + $0x430] sm:$0xff]  ;;  %v1049_v61 = vmax.f32 %v7826_v18, 0.0  ;;  %v3320_v18 = vld [vmem:[#allocation9 + $0x8b8] sm:$0xff] }
 0x36b   :  { %2106 = vmatprep.subr.bf16.mxu0 %v6436_v12  ;;  %v6488_v12 = vcombine.high %v2199_v3, %v2203_v7 }
 0x36c   :  { %3254 = vmatpush1.bf16.msra.mxu1 %v6565_v14  ;;  %v6617_v14 = vcombine.low %v3314_v11, %v3318_v0  ;;  %v3308_v11 = vld [vmem:[#allocation9 + $0x858] sm:$0xff] }
 0x36d   :  { %3255 = vmatprep.subr.bf16.mxu1 %v6574_v17  ;;  %v6626_v17 = vcombine.high %v3322_v10, %v3326_v49  ;;  %v3312_v0 = vld [vmem:[#allocation9 + $0x878] sm:$0xff] }
 0x36e   :  { %2107 = vmatpush1.bf16.msra.mxu0 %v6435_v19  ;;  %v6487_v19 = vcombine.low %v2199_v3, %v2203_v7  ;;  %v2193_v3 = vld [vmem:[#allocation9 + $0x450] sm:$0xff] }
 0x36f   :  { %2108 = vmatprep.subr.bf16.mxu0 %v6444_v23  ;;  %v6625_v23 = vcombine.low %v3322_v10, %v3326_v49  ;;  %v2197_v7 = vld [vmem:[#allocation9 + $0x470] sm:$0xff]  ;;  %v3316_v49 = vld [vmem:[#allocation9 + $0x898] sm:$0xff] }
 0x370   :  { %3256 = vmatpush1.bf16.msra.mxu1 %v6573_v48  ;;  %v2215_v48 = vld [vmem:[#allocation9 + $0x500] sm:$0xff] }
 0x371   :  { %3257 = vmatprep.subr.bf16.mxu1 %v6582_v26  ;;  %v6495_v26 = vcombine.low %v2207_v15, %v2211_v16  ;;  %v6504_v29 = vcombine.high %v2215_v48, %v2219_v24  ;;  %v2201_v15 = vld [vmem:[#allocation9 + $0x490] sm:$0xff] }
 0x372   :  { %2109 = vmatpush1.bf16.msra.mxu0 %v6443_v27  ;;  %v3338_v27 = vld [vmem:[#allocation9 + $0x948] sm:$0xff]  ;;  %v2205_v16 = vld [vmem:[#allocation9 + $0x4b0] sm:$0xff] }
 0x373   :  { %2110 = vmatprep.subr.bf16.mxu0 %v6452_v30  ;;  %v6642_v34 = vcombine.high %v3338_v27, %v3342_v28 }
 0x374   :  { %3258 = vmatpush1.bf16.msra.mxu1 %v6581_v32  ;;  %v2223_v32 = vld [vmem:[#allocation9 + $0x540] sm:$0xff] }
 0x375   :  { %3259 = vmatprep.subr.bf16.mxu1 %v6590_v35  ;;  %v6503_v35 = vcombine.low %v2215_v48, %v2219_v24  ;;  %v6512_v37 = vcombine.high %v2223_v32, %v2227_v33  ;;  %v2209_v48 = vld [vmem:[#allocation9 + $0x4d0] sm:$0xff] }
 0x376   :  { %2111 = vmatpush1.bf16.msra.mxu0 %v6451_v56  ;;  %v3346_v56 = vld [vmem:[#allocation9 + $0x988] sm:$0xff]  ;;  %v2213_v24 = vld [vmem:[#allocation9 + $0x4f0] sm:$0xff] }
 0x377   :  { %2112 = vmatprep.subr.bf16.mxu0 %v6460_v38  ;;  %v6641_v38 = vcombine.low %v3338_v27, %v3342_v28  ;;  %v6650_v41 = vcombine.high %v3346_v56, %v3350_v36  ;;  %v3332_v27 = vld [vmem:[#allocation9 + $0x918] sm:$0xff] }
 0x378   :  { %3260 = vmatpush1.bf16.msra.mxu1 %v6589_v39  ;;  %v2231_v39 = vld [vmem:[#allocation9 + $0x580] sm:$0xff]  ;;  %v3336_v28 = vld [vmem:[#allocation9 + $0x938] sm:$0xff] }
 0x379   :  { %3261 = vmatprep.subr.bf16.mxu1 %v6598_v42  ;;  %v6511_v42 = vcombine.low %v2223_v32, %v2227_v33  ;;  %v6520_v45 = vcombine.high %v2231_v39, %v2235_v40  ;;  %v2217_v32 = vld [vmem:[#allocation9 + $0x510] sm:$0xff] }
 0x37a   :  { %2113 = vmatpush1.bf16.msra.mxu0 %v6459_v43  ;;  %v3354_v43 = vld [vmem:[#allocation9 + $0x9c8] sm:$0xff]  ;;  %v2221_v33 = vld [vmem:[#allocation9 + $0x530] sm:$0xff] }
 0x37b   :  { %2114 = vmatprep.subr.bf16.mxu0 %v6468_v46  ;;  %v6649_v46 = vcombine.low %v3346_v56, %v3350_v36  ;;  %v6658_v52 = vcombine.high %v3354_v43, %v3358_v44  ;;  %v3340_v56 = vld [vmem:[#allocation9 + $0x958] sm:$0xff] }
 0x37c   :  { %3262 = vmatpush1.bf16.msra.mxu1 %v6597_v47  ;;  %v2239_v47 = vld [vmem:[#allocation9 + $0x5c0] sm:$0xff]  ;;  %v3344_v36 = vld [vmem:[#allocation9 + $0x978] sm:$0xff] }
 0x37d   :  { %3722 = vmatprep.subr.bf16.mxu1 %v6602_v53  ;;  %v6519_v53 = vcombine.low %v2231_v39, %v2235_v40  ;;  %v6528_v60 = vcombine.high %v2239_v47, %v2243_v51  ;;  %v2225_v39 = vld [vmem:[#allocation9 + $0x550] sm:$0xff] }
 0x37e   :  { %2115 = vmatpush1.bf16.msra.mxu0 %v6467_v54  ;;  %v3300_v54 = vld [vmem:[#allocation9 + $0x818] sm:$0xff]  ;;  %v2229_v40 = vld [vmem:[#allocation9 + $0x570] sm:$0xff] }
 0x37f   :  { %3280 = vmatmul.mubr.bf16.vlgmr.msra.gmra.mrb[28].mxu1 %v7850_v31  ;;  %2567 = vmatprep.subr.bf16.mxu0 %v6472_v57  ;;  %v6657_v57 = vcombine.low %v3354_v43, %v3358_v44  ;;  %v3348_v43 = vld [vmem:[#allocation9 + $0x998] sm:$0xff] }
 0x380   :  { %3723 = vmatpush1.bf16.msra.mxu1 %v6601_v58  ;;  %3754 = vmatprep.mubr.bf16.mxu1 %v7576_v50  ;;  %v2185_v58 = vld [vmem:[#allocation9 + $0x410] sm:$0xff]  ;;  %v3352_v44 = vld [vmem:[#allocation9 + $0x9b8] sm:$0xff] }
 0x381   :  { %2133 = vmatmul.mubr.bf16.vlgmr.msra.gmra.mrb[32].mxu0 %v7818_v4  ;;  %3724 = vmatprep.subr.bf16.mxu1 %v6610_v62  ;;  %v3334_v4 = vld [vmem:[#allocation9 + $0x928] sm:$0xff]  ;;  %v6606_v62 = vcombine.high %v3300_v54, %v3304_v55  ;;  %v6475_v10 = vcombine.low %v2185_v58, %v2189_v59 }
 0x382   :  { %2568 = vmatpush1.bf16.msra.mxu0 %v6471_v63  ;;  %2599 = vmatprep.mubr.bf16.mxu0 %v7576_v50  ;;  %v6634_v25 = vcombine.high %v3330_v20, %v3334_v4  ;;  %v6633_v30 = vcombine.low %v3330_v20, %v3334_v4  ;;  %v6527_v63 = vcombine.low %v2239_v47, %v2243_v51  ;;  %v3324_v20 = vld [vmem:[#allocation9 + $0x8d8] sm:$0xff]  ;;  %v2233_v47 = vld [vmem:[#allocation9 + $0x590] sm:$0xff] }
 0x383   :  { %2569 = vmatprep.subr.bf16.mxu0 %v6480_v2  ;;  %v6476_v2 = vcombine.high %v2185_v58, %v2189_v59  ;;  %v3328_v4 = vld [vmem:[#allocation9 + $0x8f8] sm:$0xff]  ;;  %v2237_v51 = vld [vmem:[#allocation9 + $0x5b0] sm:$0xff] }
 0x384   :  { %3725 = vmatpush1.bf16.msra.mxu1 %v6609_v1  ;;  %v6605_v1 = vcombine.low %v3300_v54, %v3304_v55  ;;  %v6515_v54 = vcombine.low %v2225_v39, %v2229_v40  ;;  %v3356_v55 = vld [vmem:[#allocation9 + $0x9d8] sm:$0xff]  ;;  %v6524_v58 = vcombine.high %v2233_v47, %v2237_v51 }
 0x385   :  { %3726 = vmatprep.subr.bf16.mxu1 %v6618_v8  ;;  %v7861_v8 = vpack.c.bf16 %v1049_v61, %v1049_v61 }
 0x386   :  { %2570 = vmatpush1.bf16.msra.mxu0 %v6479_v9  ;;  %v6614_v9 = vcombine.high %v3308_v11, %v3312_v0 }
 0x387   :  { %2571 = vmatprep.subr.bf16.mxu0 %v6488_v12  ;;  %v6484_v12 = vcombine.high %v2193_v3, %v2197_v7 }
 0x388   :  { %3727 = vmatpush1.bf16.msra.mxu1 %v6617_v14  ;;  %v6613_v14 = vcombine.low %v3308_v11, %v3312_v0  ;;  %v2245_v11 = vld [vmem:[#allocation9 + $0x5f0] sm:$0xff] }
 0x389   :  { %3728 = vmatprep.subr.bf16.mxu1 %v6626_v17  ;;  %v6622_v17 = vcombine.high %v3316_v49, %v3320_v18 }
 0x38a   :  { %2572 = vmatpush1.bf16.msra.mxu0 %v6487_v19  ;;  %v6483_v19 = vcombine.low %v2193_v3, %v2197_v7  ;;  %v6523_v7 = vcombine.low %v2233_v47, %v2237_v51 }
 0x38b   :  { %2573 = vmatprep.subr.bf16.mxu0 %v6496_v22  ;;  %v6492_v22 = vcombine.high %v2201_v15, %v2205_v16 }
 0x38c   :  { %3729 = vmatpush1.bf16.msra.mxu1 %v6625_v23  ;;  %v6621_v23 = vcombine.low %v3316_v49, %v3320_v18 }
 0x38d   :  { %3730 = vmatprep.subr.bf16.mxu1 %v6634_v25  ;;  %v6630_v25 = vcombine.high %v3324_v20, %v3328_v4 }
 0x38e   :  { %2574 = vmatpush1.bf16.msra.mxu0 %v6495_v26  ;;  %v6491_v26 = vcombine.low %v2201_v15, %v2205_v16  ;;  %v2744_v15 = vld [vmem:[#allocation9 + $0x620] sm:$0xff] }
 0x38f   :  { %2575 = vmatprep.subr.bf16.mxu0 %v6504_v29  ;;  %v6500_v29 = vcombine.high %v2209_v48, %v2213_v24 }
 0x390   :  { %3731 = vmatpush1.bf16.msra.mxu1 %v6633_v30  ;;  %v6629_v30 = vcombine.low %v3324_v20, %v3328_v4  ;;  %v3867_v20 = vld [vmem:[#allocation9 + $0xa68] sm:$0xff] }
 0x391   :  { %3732 = vmatprep.subr.bf16.mxu1 %v6642_v34  ;;  %v6638_v34 = vcombine.high %v3332_v27, %v3336_v28 }
 0x392   :  { %2576 = vmatpush1.bf16.msra.mxu0 %v6503_v35  ;;  %v6499_v35 = vcombine.low %v2209_v48, %v2213_v24  ;;  %v2752_v48 = vld [vmem:[#allocation9 + $0x660] sm:$0xff] }
 0x393   :  { %2577 = vmatprep.subr.bf16.mxu0 %v6512_v37  ;;  %v6508_v37 = vcombine.high %v2217_v32, %v2221_v33 }
 0x394   :  { %3733 = vmatpush1.bf16.msra.mxu1 %v6641_v38  ;;  %v6637_v38 = vcombine.low %v3332_v27, %v3336_v28  ;;  %v3875_v27 = vld [vmem:[#allocation9 + $0xaa8] sm:$0xff] }
 0x395   :  { %3734 = vmatprep.subr.bf16.mxu1 %v6650_v41  ;;  %v6646_v41 = vcombine.high %v3340_v56, %v3344_v36 }
 0x396   :  { %2578 = vmatpush1.bf16.msra.mxu0 %v6511_v42  ;;  %v6507_v42 = vcombine.low %v2217_v32, %v2221_v33  ;;  %v2760_v32 = vld [vmem:[#allocation9 + $0x6a0] sm:$0xff] }
 0x397   :  { %2579 = vmatprep.subr.bf16.mxu0 %v6520_v45  ;;  %v6516_v45 = vcombine.high %v2225_v39, %v2229_v40  ;;  %v2768_v39 = vld [vmem:[#allocation9 + $0x6e0] sm:$0xff] }
 0x398   :  { %3735 = vmatpush1.bf16.msra.mxu1 %v6649_v46  ;;  %v6645_v46 = vcombine.low %v3340_v56, %v3344_v36  ;;  %v3883_v56 = vld [vmem:[#allocation9 + $0xae8] sm:$0xff] }
 0x399   :  { %3736 = vmatprep.subr.bf16.mxu1 %v6658_v52  ;;  %v6654_v52 = vcombine.high %v3348_v43, %v3352_v44 }
 0x39a   :  { %2580 = vmatpush1.bf16.msra.mxu0 %v6519_v53 }
 0x39b   :  { %2581 = vmatprep.subr.bf16.mxu0 %v6528_v60  ;;  %v3360_v60 = vld [vmem:[#allocation9 + $0x9f8] sm:$0xff] }
 0x39c   :  { %3737 = vmatpush1.bf16.msra.mxu1 %v6657_v57 }
 0x39d   :  { %3804 = vmatprep.subr.bf16.mxu1 %v6606_v62  ;;  %v6653_v62 = vcombine.low %v3348_v43, %v3352_v44 }
 0x39e   :  { %2582 = vmatpush1.bf16.msra.mxu0 %v6527_v63  ;;  %v2241_v63 = vld [vmem:[#allocation9 + $0x5d0] sm:$0xff] }
 0x39f   :  { %3755 = vmatmul.mubr.bf16.vlgmr.msra.gmra.mrb[32].mxu1 %v7861_v8  ;;  %2649 = vmatprep.subr.bf16.mxu0 %v6476_v2  ;;  %v6532_v18 = vcombine.high %v2241_v63, %v2245_v11 }
 0x3a0   :  { %3805 = vmatpush1.bf16.msra.mxu1 %v6605_v1  ;;  %3836 = vmatprep.mubr.bf16.mxu1 %v7576_v50  ;;  %v6662_v1 = vcombine.high %v3356_v55, %v3360_v60 }
 0x3a1   :  { %2600 = vmatmul.mubr.bf16.vlgmr.msra.gmra.mrb[36].mxu0 %v7839_v5  ;;  %3806 = vmatprep.subr.bf16.mxu1 %v6614_v9  ;;  %v3855_v9 = vld [vmem:[#allocation9 + $0xa08] sm:$0xff] }
 0x3a2   :  { %2650 = vmatpush1.bf16.msra.mxu0 %v6475_v10  ;;  %2681 = vmatprep.mubr.bf16.mxu0 %v7576_v50  ;;  %v3859_v10 = vld [vmem:[#allocation9 + $0xa28] sm:$0xff] }
 0x3a3   :  { %2651 = vmatprep.subr.bf16.mxu0 %v6484_v12  ;;  %v6661_v12 = vcombine.low %v3356_v55, %v3360_v60  ;;  %v6666_v16 = vcombine.high %v3855_v9, %v3859_v10 }
 0x3a4   :  { %3807 = vmatpush1.bf16.msra.mxu1 %v6613_v14  ;;  %v2740_v14 = vld [vmem:[#allocation9 + $0x600] sm:$0xff] }
 0x3a5   :  { %3808 = vmatprep.subr.bf16.mxu1 %v6622_v17  ;;  %v6531_v17 = vcombine.low %v2241_v63, %v2245_v11  ;;  %v6536_v4 = vcombine.high %v2740_v14, %v2744_v15  ;;  %v3903_v11 = vld [vmem:[#allocation9 + $0xb88] sm:$0xff] }
 0x3a6   :  { %2652 = vmatpush1.bf16.msra.mxu0 %v6483_v19  ;;  %v3863_v19 = vld [vmem:[#allocation9 + $0xa48] sm:$0xff] }
 0x3a7   :  { %2653 = vmatprep.subr.bf16.mxu0 %v6492_v22  ;;  %v6665_v22 = vcombine.low %v3855_v9, %v3859_v10  ;;  %v6674_v24 = vcombine.high %v3863_v19, %v3867_v20  ;;  %v2792_v9 = vld [vmem:[#allocation9 + $0x7a0] sm:$0xff] }
 0x3a8   :  { %3809 = vmatpush1.bf16.msra.mxu1 %v6621_v23  ;;  %v2748_v23 = vld [vmem:[#allocation9 + $0x640] sm:$0xff] }
 0x3a9   :  { %3810 = vmatprep.subr.bf16.mxu1 %v6630_v25  ;;  %v6535_v25 = vcombine.low %v2740_v14, %v2744_v15  ;;  %v6544_v28 = vcombine.high %v2748_v23, %v2752_v48  ;;  %v3915_v14 = vld [vmem:[#allocation9 + $0xbe8] sm:$0xff] }
 0x3aa   :  { %2654 = vmatpush1.bf16.msra.mxu0 %v6491_v26  ;;  %v3871_v26 = vld [vmem:[#allocation9 + $0xa88] sm:$0xff] }
 0x3ab   :  { %2655 = vmatprep.subr.bf16.mxu0 %v6500_v29  ;;  %v6673_v29 = vcombine.low %v3863_v19, %v3867_v20  ;;  %v6682_v33 = vcombine.high %v3871_v26, %v3875_v27 }
 0x3ac   :  { %3811 = vmatpush1.bf16.msra.mxu1 %v6629_v30  ;;  %v2756_v30 = vld [vmem:[#allocation9 + $0x680] sm:$0xff] }
 0x3ad   :  { %3812 = vmatprep.subr.bf16.mxu1 %v6638_v34  ;;  %v6543_v34 = vcombine.low %v2748_v23, %v2752_v48  ;;  %v6552_v36 = vcombine.high %v2756_v30, %v2760_v32 }
 0x3ae   :  { %2656 = vmatpush1.bf16.msra.mxu0 %v6499_v35  ;;  %v3879_v35 = vld [vmem:[#allocation9 + $0xac8] sm:$0xff] }
 0x3af   :  { %2657 = vmatprep.subr.bf16.mxu0 %v6508_v37  ;;  %v6681_v37 = vcombine.low %v3871_v26, %v3875_v27  ;;  %v6690_v40 = vcombine.high %v3879_v35, %v3883_v56  ;;  %v6689_v44 = vcombine.low %v3879_v35, %v3883_v56  ;;  %v2742_v35 = vld [vmem:[#allocation9 + $0x610] sm:$0xff]  ;;  %v1050_v56 = vmax.f32 %v7832_v6, 0.0  ;;  %v3877_v6 = vld [vmem:[#allocation9 + $0xab8] sm:$0xff] }
 0x3b0   :  { %3813 = vmatpush1.bf16.msra.mxu1 %v6637_v38  ;;  %v2764_v38 = vld [vmem:[#allocation9 + $0x6c0] sm:$0xff] }
 0x3b1   :  { %3814 = vmatprep.subr.bf16.mxu1 %v6646_v41  ;;  %v6551_v41 = vcombine.low %v2756_v30, %v2760_v32  ;;  %v6560_v43 = vcombine.high %v2764_v38, %v2768_v39  ;;  %v6559_v51 = vcombine.low %v2764_v38, %v2768_v39  ;;  %v3861_v30 = vld [vmem:[#allocation9 + $0xa38] sm:$0xff] }
 0x3b2   :  { %2658 = vmatpush1.bf16.msra.mxu0 %v6507_v42  ;;  %v7867_v53 = vpop.f32.mrb[8].mxu1  ;;  %v3887_v42 = vld [vmem:[#allocation9 + $0xb08] sm:$0xff]  ;;  %v3869_v38 = vld [vmem:[#allocation9 + $0xa78] sm:$0xff] }
 0x3b3   :  { %v7869_v57 = vpop.f32.mrb[9].mxu1  ;;  %2659 = vmatprep.subr.bf16.mxu0 %v6516_v45  ;;  %v2772_v45 = vld [vmem:[#allocation9 + $0x700] sm:$0xff] }
 0x3b4   :  { %3815 = vmatpush1.bf16.msra.mxu1 %v6645_v46  ;;  %v7871_v59 = vpop.f32.mrb[12].mxu0  ;;  %v2097_v61 = vpop.f32.mrb[10].mxu1  ;;  %v2776_v46 = vld [vmem:[#allocation9 + $0x720] sm:$0xff] }
 0x3b5   :  { %v7873_v0 = vpop.f32.mrb[13].mxu0  ;;  %v2098_v2 = vpop.f32.mrb[11].mxu1  ;;  %3816 = vmatprep.subr.bf16.mxu1 %v6654_v52  ;;  %v3895_v52 = vld [vmem:[#allocation9 + $0xb48] sm:$0xff]  ;;  %v6568_v55 = vcombine.high %v2772_v45, %v2776_v46  ;;  %v2784_v61 = vld [vmem:[#allocation9 + $0x760] sm:$0xff]  ;;  %v6567_v63 = vcombine.low %v2772_v45, %v2776_v46  ;;  %v3873_v45 = vld [vmem:[#allocation9 + $0xa98] sm:$0xff] }
 0x3b6   :  { %2660 = vmatpush1.bf16.msra.mxu0 %v6515_v54  ;;  %v1572_v3 = vpop.f32.mrb[14].mxu0  ;;  %v3899_v54 = vld [vmem:[#allocation9 + $0xb68] sm:$0xff] }
 0x3b7   :  { %v1573_v49 = vpop.f32.mrb[15].mxu0  ;;  %2661 = vmatprep.subr.bf16.mxu0 %v6524_v58  ;;  %v2780_v58 = vld [vmem:[#allocation9 + $0x740] sm:$0xff]  ;;  %v3907_v2 = vld [vmem:[#allocation9 + $0xba8] sm:$0xff]  ;;  %v6705_v3 = vcombine.low %v3895_v52, %v3899_v54 }
 0x3b8   :  { %3817 = vmatpush1.bf16.msra.mxu1 %v6653_v62  ;;  %v6706_v62 = vcombine.high %v3895_v52, %v3899_v54  ;;  %v6714_v10 = vcombine.high %v3903_v11, %v3907_v2  ;;  %v6713_v20 = vcombine.low %v3903_v11, %v3907_v2  ;;  %v2762_v52 = vld [vmem:[#allocation9 + $0x6b0] sm:$0xff]  ;;  %v6686_v54 = vcombine.high %v3873_v45, %v3877_v6 }
 0x3b9   :  { %3818 = vmatprep.subr.bf16.mxu1 %v6662_v1  ;;  %v6576_v1 = vcombine.high %v2780_v58, %v2784_v61  ;;  %v2770_v11 = vld [vmem:[#allocation9 + $0x6f0] sm:$0xff] }
 0x3ba   :  { %2662 = vmatpush1.bf16.msra.mxu0 %v6523_v7  ;;  %v2788_v7 = vld [vmem:[#allocation9 + $0x780] sm:$0xff] }
 0x3bb   :  { %2663 = vmatprep.subr.bf16.mxu0 %v6532_v18  ;;  %v6575_v18 = vcombine.low %v2780_v58, %v2784_v61  ;;  %v3885_v58 = vld [vmem:[#allocation9 + $0xaf8] sm:$0xff] }
 0x3bc   :  { %3819 = vmatpush1.bf16.msra.mxu1 %v6661_v12  ;;  %v3911_v12 = vld [vmem:[#allocation9 + $0xbc8] sm:$0xff] }
 0x3bd   :  { %4279 = vmatprep.subr.bf16.mxu1 %v6666_v16  ;;  %v6584_v16 = vcombine.high %v2788_v7, %v2792_v9 }
 0x3be   :  { %2664 = vmatpush1.bf16.msra.mxu0 %v6531_v17 }
 0x3bf   :  { %3837 = vmatmul.mubr.bf16.vlgmr.msra.gmra.mrb[36].mxu1 %v7861_v8  ;;  %3124 = vmatprep.subr.bf16.mxu0 %v6536_v4  ;;  %v2796_v4 = vld [vmem:[#allocation9 + $0x7c0] sm:$0xff] }
 0x3c0   :  { %4280 = vmatpush1.bf16.msra.mxu1 %v6665_v22  ;;  %4311 = vmatprep.mubr.bf16.mxu1 %v7576_v50  ;;  %v2800_v22 = vld [vmem:[#allocation9 + $0x7e0] sm:$0xff] }
 0x3c1   :  { %2682 = vmatmul.mubr.bf16.vlgmr.msra.gmra.mrb[40].mxu0 %v7839_v5  ;;  %4281 = vmatprep.subr.bf16.mxu1 %v6674_v24  ;;  %v3891_v5 = vld [vmem:[#allocation9 + $0xb28] sm:$0xff] }
 0x3c2   :  { %3125 = vmatpush1.bf16.msra.mxu0 %v6535_v25  ;;  %3156 = vmatprep.mubr.bf16.mxu0 %v7576_v50  ;;  %v6698_v47 = vcombine.high %v3887_v42, %v3891_v5  ;;  %v6697_v60 = vcombine.low %v3887_v42, %v3891_v5  ;;  %v6722_v25 = vcombine.high %v3911_v12, %v3915_v14  ;;  %v2754_v42 = vld [vmem:[#allocation9 + $0x670] sm:$0xff] }
 0x3c3   :  { %3126 = vmatprep.subr.bf16.mxu0 %v6544_v28  ;;  %v6583_v28 = vcombine.low %v2788_v7, %v2792_v9  ;;  %v7890_v5 = vpack.c.bf16 %v1050_v56, %v1050_v56  ;;  %v3893_v7 = vld [vmem:[#allocation9 + $0xb38] sm:$0xff] }
 0x3c4   :  { %4282 = vmatpush1.bf16.msra.mxu1 %v6673_v29  ;;  %v3857_v29 = vld [vmem:[#allocation9 + $0xa18] sm:$0xff] }
 0x3c5   :  { %4283 = vmatprep.subr.bf16.mxu1 %v6682_v33  ;;  %v6592_v33 = vcombine.high %v2796_v4, %v2800_v22  ;;  %v3913_v56 = vld [vmem:[#allocation9 + $0xbd8] sm:$0xff] }
 0x3c6   :  { %3127 = vmatpush1.bf16.msra.mxu0 %v6543_v34  ;;  %v6721_v34 = vcombine.low %v3911_v12, %v3915_v14  ;;  %v2778_v12 = vld [vmem:[#allocation9 + $0x730] sm:$0xff] }
 0x3c7   :  { %3128 = vmatprep.subr.bf16.mxu0 %v6552_v36  ;;  %v6670_v36 = vcombine.high %v3857_v29, %v3861_v30 }
 0x3c8   :  { %4284 = vmatpush1.bf16.msra.mxu1 %v6681_v37  ;;  %v6591_v37 = vcombine.low %v2796_v4, %v2800_v22  ;;  %v2782_v22 = vld [vmem:[#allocation9 + $0x750] sm:$0xff] }
 0x3c9   :  { %4285 = vmatprep.subr.bf16.mxu1 %v6690_v40  ;;  %v6669_v40 = vcombine.low %v3857_v29, %v3861_v30 }
 0x3ca   :  { %3129 = vmatpush1.bf16.msra.mxu0 %v6551_v41  ;;  %v2750_v41 = vld [vmem:[#allocation9 + $0x650] sm:$0xff] }
 0x3cb   :  { %3130 = vmatprep.subr.bf16.mxu0 %v6560_v43  ;;  %v6548_v46 = vcombine.high %v2750_v41, %v2754_v42 }
 0x3cc   :  { %4286 = vmatpush1.bf16.msra.mxu1 %v6689_v44 }
 0x3cd   :  { %4287 = vmatprep.subr.bf16.mxu1 %v6698_v47 }
 0x3ce   :  { %3131 = vmatpush1.bf16.msra.mxu0 %v6559_v51  ;;  %v2758_v51 = vld [vmem:[#allocation9 + $0x690] sm:$0xff] }
 0x3cf   :  { %3132 = vmatprep.subr.bf16.mxu0 %v6568_v55  ;;  %v6547_v55 = vcombine.low %v2750_v41, %v2754_v42  ;;  %v6556_v61 = vcombine.high %v2758_v51, %v2762_v52 }
 0x3d0   :  { %4288 = vmatpush1.bf16.msra.mxu1 %v6697_v60  ;;  %v3881_v60 = vld [vmem:[#allocation9 + $0xad8] sm:$0xff] }
 0x3d1   :  { %4289 = vmatprep.subr.bf16.mxu1 %v6706_v62  ;;  %v6685_v62 = vcombine.low %v3873_v45, %v3877_v6  ;;  %v6694_v2 = vcombine.high %v3881_v60, %v3885_v58 }
 0x3d2   :  { %v7879_v49 = vpop.f32.mrb[12].mxu1  ;;  %3133 = vmatpush1.bf16.msra.mxu0 %v6567_v63  ;;  %v2766_v63 = vld [vmem:[#allocation9 + $0x6d0] sm:$0xff] }
 0x3d3   :  { %v7881_v15 = vpop.f32.mrb[13].mxu1  ;;  %3134 = vmatprep.subr.bf16.mxu0 %v6576_v1  ;;  %v6555_v1 = vcombine.low %v2758_v51, %v2762_v52  ;;  %v6564_v9 = vcombine.high %v2766_v63, %v2770_v11  ;;  %v4412_v51 = vld [vmem:[#allocation9 + $0xc08] sm:$0xff] }
 0x3d4   :  { %v1609_v17 = vpop.f32.mrb[16].mxu0  ;;  %v2179_v19 = vpop.f32.mrb[14].mxu1  ;;  %4290 = vmatpush1.bf16.msra.mxu1 %v6705_v3  ;;  %v3889_v3 = vld [vmem:[#allocation9 + $0xb18] sm:$0xff]  ;;  %v4416_v52 = vld [vmem:[#allocation9 + $0xc28] sm:$0xff] }
 0x3d5   :  { %v7884_v23 = vadd.f32 %v7867_v53, %v1609_v17  ;;  %v1611_v48 = vpop.f32.mrb[17].mxu0  ;;  %v2180_v24 = vpop.f32.mrb[15].mxu1  ;;  %4291 = vmatprep.subr.bf16.mxu1 %v6714_v10  ;;  %v2746_v53 = vld [vmem:[#allocation9 + $0x630] sm:$0xff]  ;;  %v6693_v10 = vcombine.low %v3881_v60, %v3885_v58  ;;  %v6702_v14 = vcombine.high %v3889_v3, %v3893_v7  ;;  %v3897_v17 = vld [vmem:[#allocation9 + $0xb58] sm:$0xff]  ;;  %v6701_v4 = vcombine.low %v3889_v3, %v3893_v7  ;;  %v3297_v60 = vld [vmem:[#allocation9 + $0x800] sm:$0xff] }
 0x3d6   :  { %v7887_v26 = vadd.f32 %v7869_v57, %v1611_v48  ;;  %v1613_v27 = vpop.f32.mrb[18].mxu0  ;;  %3135 = vmatpush1.bf16.msra.mxu0 %v6575_v18  ;;  %v3865_v57 = vld [vmem:[#allocation9 + $0xa58] sm:$0xff]  ;;  %v6540_v39 = vcombine.high %v2742_v35, %v2746_v53  ;;  %v6539_v44 = vcombine.low %v2742_v35, %v2746_v53  ;;  %v2774_v18 = vld [vmem:[#allocation9 + $0x710] sm:$0xff]  ;;  %v3301_v58 = vld [vmem:[#allocation9 + $0x820] sm:$0xff] }
 0x3d7   :  { %v1614_v32 = vpop.f32.mrb[19].mxu0  ;;  %3136 = vmatprep.subr.bf16.mxu0 %v6584_v16  ;;  %v6678_v43 = vcombine.high %v3865_v57, %v3869_v38  ;;  %v6677_v47 = vcombine.low %v3865_v57, %v3869_v38  ;;  %v6563_v16 = vcombine.low %v2766_v63, %v2770_v11  ;;  %v3901_v19 = vld [vmem:[#allocation9 + $0xb78] sm:$0xff]  ;;  %v2786_v48 = vld [vmem:[#allocation9 + $0x770] sm:$0xff]  ;;  %v4420_v63 = vld [vmem:[#allocation9 + $0xc48] sm:$0xff] }
 0x3d8   :  { %4292 = vmatpush1.bf16.msra.mxu1 %v6713_v20  ;;  %v6572_v20 = vcombine.high %v2774_v18, %v2778_v12  ;;  %v6710_v24 = vcombine.high %v3897_v17, %v3901_v19  ;;  %v3905_v27 = vld [vmem:[#allocation9 + $0xb98] sm:$0xff]  ;;  %v6580_v29 = vcombine.high %v2782_v22, %v2786_v48  ;;  %v6709_v30 = vcombine.low %v3897_v17, %v3901_v19  ;;  %v2790_v32 = vld [vmem:[#allocation9 + $0x790] sm:$0xff]  ;;  %v4424_v11 = vld [vmem:[#allocation9 + $0xc68] sm:$0xff] }
 0x3d9   :  { %4293 = vmatprep.subr.bf16.mxu1 %v6722_v25  ;;  %v6571_v25 = vcombine.low %v2774_v18, %v2778_v12  ;;  %v6579_v53 = vcombine.low %v2782_v22, %v2786_v48  ;;  %v3305_v3 = vld [vmem:[#allocation9 + $0x840] sm:$0xff]  ;;  %v4428_v18 = vld [vmem:[#allocation9 + $0xc88] sm:$0xff] }
 0x3da   :  { %3137 = vmatpush1.bf16.msra.mxu0 %v6583_v28  ;;  %v3909_v28 = vld [vmem:[#allocation9 + $0xbb8] sm:$0xff]  ;;  %v3309_v7 = vld [vmem:[#allocation9 + $0x860] sm:$0xff]  ;;  %v4432_v12 = vld [vmem:[#allocation9 + $0xca8] sm:$0xff] }
 0x3db   :  { %3138 = vmatprep.subr.bf16.mxu0 %v6592_v33  ;;  %v2794_v33 = vld [vmem:[#allocation9 + $0x7b0] sm:$0xff]  ;;  %v6717_v42 = vcombine.low %v3905_v27, %v3909_v28  ;;  %v3313_v17 = vld [vmem:[#allocation9 + $0x880] sm:$0xff]  ;;  %v4436_v22 = vld [vmem:[#allocation9 + $0xcc8] sm:$0xff] }
 0x3dc   :  { %4294 = vmatpush1.bf16.msra.mxu1 %v6721_v34  ;;  %v6718_v34 = vcombine.high %v3905_v27, %v3909_v28  ;;  %v6588_v38 = vcombine.high %v2790_v32, %v2794_v33  ;;  %v3317_v19 = vld [vmem:[#allocation9 + $0x8a0] sm:$0xff]  ;;  %v4440_v48 = vld [vmem:[#allocation9 + $0xce8] sm:$0xff] }
 0x3dd   :  { %4361 = vmatprep.subr.bf16.mxu1 %v6670_v36  ;;  %v3917_v36 = vld [vmem:[#allocation9 + $0xbf8] sm:$0xff]  ;;  %v3321_v27 = vld [vmem:[#allocation9 + $0x8c0] sm:$0xff] }
 0x3de   :  { %3139 = vmatpush1.bf16.msra.mxu0 %v6591_v37  ;;  %v3325_v28 = vld [vmem:[#allocation9 + $0x8e0] sm:$0xff] }
 0x3df   :  { %4312 = vmatmul.mubr.bf16.vlgmr.msra.gmra.mrb[40].mxu1 %v7890_v5  ;;  %3206 = vmatprep.subr.bf16.mxu0 %v6540_v39 }
 0x3e0   :  { %4362 = vmatpush1.bf16.msra.mxu1 %v6669_v40  ;;  %4393 = vmatprep.mubr.bf16.mxu1 %v7576_v50 }
 0x3e1   :  { %3157 = vmatmul.mubr.bf16.vlgmr.msra.gmra.mrb[44].mxu0 %v7850_v31  ;;  %4363 = vmatprep.subr.bf16.mxu1 %v6678_v43  ;;  %v2798_v43 = vld [vmem:[#allocation9 + $0x7d0] sm:$0xff] }
 0x3e2   :  { %3207 = vmatpush1.bf16.msra.mxu0 %v6539_v44  ;;  %3238 = vmatprep.mubr.bf16.mxu0 %v7576_v50  ;;  %v2802_v44 = vld [vmem:[#allocation9 + $0x7f0] sm:$0xff] }
 0x3e3   :  { %3208 = vmatprep.subr.bf16.mxu0 %v6548_v46  ;;  %v6726_v46 = vcombine.high %v3913_v56, %v3917_v36 }
 0x3e4   :  { %4364 = vmatpush1.bf16.msra.mxu1 %v6677_v47  ;;  %v6587_v47 = vcombine.low %v2790_v32, %v2794_v33  ;;  %v4444_v32 = vld [vmem:[#allocation9 + $0xd08] sm:$0xff]  ;;  %v6624_v33 = vcombine.high %v3321_v27, %v3325_v28 }
 0x3e5   :  { %4365 = vmatprep.subr.bf16.mxu1 %v6686_v54 }
 0x3e6   :  { %3209 = vmatpush1.bf16.msra.mxu0 %v6547_v55  ;;  %v6725_v55 = vcombine.low %v3913_v56, %v3917_v36  ;;  %v6623_v36 = vcombine.low %v3321_v27, %v3325_v28  ;;  %v3299_v27 = vld [vmem:[#allocation9 + $0x810] sm:$0xff] }
 0x3e7   :  { %3210 = vmatprep.subr.bf16.mxu0 %v6556_v61  ;;  %v6730_v61 = vcombine.high %v4412_v51, %v4416_v52 }
 0x3e8   :  { %4366 = vmatpush1.bf16.msra.mxu1 %v6685_v62  ;;  %v6595_v62 = vcombine.low %v2798_v43, %v2802_v44 }
 0x3e9   :  { %4367 = vmatprep.subr.bf16.mxu1 %v6694_v2  ;;  %v6600_v2 = vcombine.high %v3297_v60, %v3301_v58 }
 0x3ea   :  { %3211 = vmatpush1.bf16.msra.mxu0 %v6555_v1  ;;  %v6729_v1 = vcombine.low %v4412_v51, %v4416_v52 }
 0x3eb   :  { %3212 = vmatprep.subr.bf16.mxu0 %v6564_v9  ;;  %v6738_v9 = vcombine.high %v4420_v63, %v4424_v11 }
 0x3ec   :  { %4368 = vmatpush1.bf16.msra.mxu1 %v6693_v10  ;;  %v6599_v10 = vcombine.low %v3297_v60, %v3301_v58 }
 0x3ed   :  { %4369 = vmatprep.subr.bf16.mxu1 %v6702_v14  ;;  %v6608_v14 = vcombine.high %v3305_v3, %v3309_v7 }
 0x3ee   :  { %3213 = vmatpush1.bf16.msra.mxu0 %v6563_v16  ;;  %v6737_v16 = vcombine.low %v4420_v63, %v4424_v11 }
 0x3ef   :  { %3214 = vmatprep.subr.bf16.mxu0 %v6572_v20  ;;  %v6746_v20 = vcombine.high %v4428_v18, %v4432_v12 }
 0x3f0   :  { %4370 = vmatpush1.bf16.msra.mxu1 %v6701_v4  ;;  %v6607_v4 = vcombine.low %v3305_v3, %v3309_v7  ;;  %v3353_v7 = vld [vmem:[#allocation9 + $0x9c0] sm:$0xff] }
 0x3f1   :  { %4371 = vmatprep.subr.bf16.mxu1 %v6710_v24  ;;  %v6616_v24 = vcombine.high %v3313_v17, %v3317_v19 }
 0x3f2   :  { %v2642_v35 = vpop.f32.mrb[16].mxu1  ;;  %3215 = vmatpush1.bf16.msra.mxu0 %v6571_v25  ;;  %v6745_v25 = vcombine.low %v4428_v18, %v4432_v12 }
 0x3f3   :  { %v7897_v37 = vadd.f32 %v2642_v35, %v7884_v23  ;;  %v2644_v57 = vpop.f32.mrb[17].mxu1  ;;  %3216 = vmatprep.subr.bf16.mxu0 %v6580_v29  ;;  %v6754_v29 = vcombine.high %v4436_v22, %v4440_v48  ;;  %v3329_v35 = vld [vmem:[#allocation9 + $0x900] sm:$0xff] }
 0x3f4   :  { %v7900_v39 = vadd.f32 %v2644_v57, %v7887_v26  ;;  %v7902_v40 = vpop.f32.mrb[20].mxu0  ;;  %v2646_v41 = vpop.f32.mrb[18].mxu1  ;;  %4372 = vmatpush1.bf16.msra.mxu1 %v6709_v30  ;;  %v6596_v26 = vcombine.high %v2798_v43, %v2802_v44  ;;  %v6615_v30 = vcombine.low %v3313_v17, %v3317_v19  ;;  %v4452_v57 = vld [vmem:[#allocation9 + $0xd48] sm:$0xff]  ;;  %v3337_v43 = vld [vmem:[#allocation9 + $0x940] sm:$0xff] }
 0x3f5   :  { %v7904_v45 = vpop.f32.mrb[21].mxu0  ;;  %v2647_v6 = vpop.f32.mrb[19].mxu1  ;;  %4373 = vmatprep.subr.bf16.mxu1 %v6718_v34  ;;  %v6753_v34 = vcombine.low %v4436_v22, %v4440_v48  ;;  %v3341_v44 = vld [vmem:[#allocation9 + $0x960] sm:$0xff] }
 0x3f6   :  { %v1654_v23 = vpop.f32.mrb[22].mxu0  ;;  %3217 = vmatpush1.bf16.msra.mxu0 %v6579_v53  ;;  %v3333_v53 = vld [vmem:[#allocation9 + $0x920] sm:$0xff]  ;;  %v6640_v51 = vcombine.high %v3337_v43, %v3341_v44  ;;  %v6639_v58 = vcombine.low %v3337_v43, %v3341_v44  ;;  %v3315_v43 = vld [vmem:[#allocation9 + $0x890] sm:$0xff] }
 0x3f7   :  { %v1655_v54 = vpop.f32.mrb[23].mxu0  ;;  %3218 = vmatprep.subr.bf16.mxu0 %v6588_v38  ;;  %v4456_v38 = vld [vmem:[#allocation9 + $0xd68] sm:$0xff]  ;;  %v6632_v41 = vcombine.high %v3329_v35, %v3333_v53  ;;  %v3319_v44 = vld [vmem:[#allocation9 + $0x8b0] sm:$0xff] }
 0x3f8   :  { %4374 = vmatpush1.bf16.msra.mxu1 %v6717_v42  ;;  %v6770_v6 = vcombine.high %v4452_v57, %v4456_v38  ;;  %v4460_v23 = vld [vmem:[#allocation9 + $0xd88] sm:$0xff]  ;;  %v6769_v52 = vcombine.low %v4452_v57, %v4456_v38  ;;  %v3345_v54 = vld [vmem:[#allocation9 + $0x980] sm:$0xff]  ;;  %v4430_v38 = vld [vmem:[#allocation9 + $0xc98] sm:$0xff] }
 0x3f9   :  { %4375 = vmatprep.subr.bf16.mxu1 %v6726_v46  ;;  %v6631_v46 = vcombine.low %v3329_v35, %v3333_v53  ;;  %v3307_v35 = vld [vmem:[#allocation9 + $0x850] sm:$0xff] }
 0x3fa   :  { %3219 = vmatpush1.bf16.msra.mxu0 %v6587_v47  ;;  %v4464_v47 = vld [vmem:[#allocation9 + $0xda8] sm:$0xff]  ;;  %v3311_v53 = vld [vmem:[#allocation9 + $0x870] sm:$0xff] }
 0x3fb   :  { %3220 = vmatprep.subr.bf16.mxu0 %v6596_v26  ;;  %v3349_v26 = vld [vmem:[#allocation9 + $0x9a0] sm:$0xff]  ;;  %v6777_v3 = vcombine.low %v4460_v23, %v4464_v47 }
 0x3fc   :  { %4376 = vmatpush1.bf16.msra.mxu1 %v6725_v55  ;;  %v6778_v55 = vcombine.high %v4460_v23, %v4464_v47  ;;  %v6648_v11 = vcombine.high %v3345_v54, %v3349_v26  ;;  %v6647_v19 = vcombine.low %v3345_v54, %v3349_v26  ;;  %v4438_v23 = vld [vmem:[#allocation9 + $0xcd8] sm:$0xff]  ;;  %v3323_v54 = vld [vmem:[#allocation9 + $0x8d0] sm:$0xff] }
 0x3fd   :  { %4836 = vmatprep.subr.bf16.mxu1 %v6730_v61  ;;  %v4468_v61 = vld [vmem:[#allocation9 + $0xdc8] sm:$0xff]  ;;  %v4442_v47 = vld [vmem:[#allocation9 + $0xcf8] sm:$0xff]  ;;  %v3327_v26 = vld [vmem:[#allocation9 + $0x8f0] sm:$0xff] }
 0x3fe   :  { %3221 = vmatpush1.bf16.msra.mxu0 %v6595_v62  ;;  %v4472_v62 = vld [vmem:[#allocation9 + $0xde8] sm:$0xff] }
 0x3ff   :  { %4394 = vmatmul.mubr.bf16.vlgmr.msra.gmra.mrb[44].mxu1 %v7890_v5  ;;  %3681 = vmatprep.subr.bf16.mxu0 %v6600_v2 }
 0x400   :  { %4837 = vmatpush1.bf16.msra.mxu1 %v6729_v1  ;;  %4868 = vmatprep.mubr.bf16.mxu1 %v7576_v50 }
 0x401   :  { %3239 = vmatmul.mubr.bf16.vlgmr.msra.gmra.mrb[48].mxu0 %v7850_v31  ;;  %4838 = vmatprep.subr.bf16.mxu1 %v6738_v9  ;;  %v4448_v31 = vld [vmem:[#allocation9 + $0xd28] sm:$0xff]  ;;  %v3357_v9 = vld [vmem:[#allocation9 + $0x9e0] sm:$0xff] }
 0x402   :  { %3682 = vmatpush1.bf16.msra.mxu0 %v6599_v10  ;;  %3713 = vmatprep.mubr.bf16.mxu0 %v7576_v50  ;;  %v6762_v56 = vcombine.high %v4444_v32, %v4448_v31  ;;  %v6761_v42 = vcombine.low %v4444_v32, %v4448_v31  ;;  %v6656_v48 = vcombine.high %v3353_v7, %v3357_v9  ;;  %v4422_v32 = vld [vmem:[#allocation9 + $0xc58] sm:$0xff] }
 0x403   :  { %3683 = vmatprep.subr.bf16.mxu0 %v6608_v14  ;;  %v6786_v14 = vcombine.high %v4468_v61, %v4472_v62  ;;  %v4426_v31 = vld [vmem:[#allocation9 + $0xc78] sm:$0xff] }
 0x404   :  { %4839 = vmatpush1.bf16.msra.mxu1 %v6737_v16 }
 0x405   :  { %4840 = vmatprep.subr.bf16.mxu1 %v6746_v20  ;;  %v4414_v20 = vld [vmem:[#allocation9 + $0xc18] sm:$0xff] }
 0x406   :  { %3684 = vmatpush1.bf16.msra.mxu0 %v6607_v4  ;;  %v4418_v4 = vld [vmem:[#allocation9 + $0xc38] sm:$0xff] }
 0x407   :  { %3685 = vmatprep.subr.bf16.mxu0 %v6616_v24 }
 0x408   :  { %4841 = vmatpush1.bf16.msra.mxu1 %v6745_v25  ;;  %v6785_v25 = vcombine.low %v4468_v61, %v4472_v62  ;;  %v4450_v61 = vld [vmem:[#allocation9 + $0xd38] sm:$0xff]  ;;  %v6628_v62 = vcombine.high %v3323_v54, %v3327_v26 }
 0x409   :  { %4842 = vmatprep.subr.bf16.mxu1 %v6754_v29  ;;  %v1051_v29 = vmax.f32 %v7823_v13, 0.0  ;;  %v4434_v13 = vld [vmem:[#allocation9 + $0xcb8] sm:$0xff] }
 0x40a   :  { %3686 = vmatpush1.bf16.msra.mxu0 %v6615_v30  ;;  %v6655_v30 = vcombine.low %v3353_v7, %v3357_v9  ;;  %v4454_v7 = vld [vmem:[#allocation9 + $0xd58] sm:$0xff] }
 0x40b   :  { %3687 = vmatprep.subr.bf16.mxu0 %v6624_v33  ;;  %v4458_v9 = vld [vmem:[#allocation9 + $0xd78] sm:$0xff] }
 0x40c   :  { %4843 = vmatpush1.bf16.msra.mxu1 %v6753_v34  ;;  %v6733_v34 = vcombine.low %v4414_v20, %v4418_v4 }
 0x40d   :  { %4844 = vmatprep.subr.bf16.mxu1 %v6762_v56  ;;  %v7917_v56 = vpack.c.bf16 %v1051_v29, %v1051_v29 }
 0x40e   :  { %3688 = vmatpush1.bf16.msra.mxu0 %v6623_v36  ;;  %v6742_v36 = vcombine.high %v4422_v32, %v4426_v31 }
 0x40f   :  { %3689 = vmatprep.subr.bf16.mxu0 %v6632_v41  ;;  %v6612_v41 = vcombine.high %v3307_v35, %v3311_v53 }
 0x410   :  { %4845 = vmatpush1.bf16.msra.mxu1 %v6761_v42  ;;  %v6741_v42 = vcombine.low %v4422_v32, %v4426_v31 }
 0x411   :  { %4846 = vmatprep.subr.bf16.mxu1 %v6770_v6  ;;  %v6750_v6 = vcombine.high %v4430_v38, %v4434_v13 }
 0x412   :  { %v2724_v60 = vpop.f32.mrb[20].mxu1  ;;  %3690 = vmatpush1.bf16.msra.mxu0 %v6631_v46  ;;  %v6611_v46 = vcombine.low %v3307_v35, %v3311_v53 }
 0x413   :  { %v2726_v63 = vpop.f32.mrb[21].mxu1  ;;  %3691 = vmatprep.subr.bf16.mxu0 %v6640_v51  ;;  %v6620_v51 = vcombine.high %v3315_v43, %v3319_v44 }
 0x414   :  { %v1691_v2 = vpop.f32.mrb[24].mxu0  ;;  %v2728_v1 = vpop.f32.mrb[22].mxu1  ;;  %4847 = vmatpush1.bf16.msra.mxu1 %v6769_v52  ;;  %v6749_v52 = vcombine.low %v4430_v38, %v4434_v13  ;;  %v3359_v38 = vld [vmem:[#allocation9 + $0x9f0] sm:$0xff] }
 0x415   :  { %v2176_v10 = vadd.f32 %v7879_v49, %v1691_v2  ;;  %v1693_v18 = vpop.f32.mrb[25].mxu0  ;;  %v2729_v12 = vpop.f32.mrb[23].mxu1  ;;  %4848 = vmatprep.subr.bf16.mxu1 %v6778_v55  ;;  %v3303_v49 = vld [vmem:[#allocation9 + $0x830] sm:$0xff]  ;;  %v6758_v55 = vcombine.high %v4438_v23, %v4442_v47 }
 0x416   :  { %v2178_v16 = vadd.f32 %v7881_v15, %v1693_v18  ;;  %v1695_v17 = vpop.f32.mrb[26].mxu0  ;;  %3692 = vmatpush1.bf16.msra.mxu0 %v6639_v58  ;;  %v6734_v15 = vcombine.high %v4414_v20, %v4418_v4  ;;  %v6604_v33 = vcombine.high %v3299_v27, %v3303_v49  ;;  %v6603_v57 = vcombine.low %v3299_v27, %v3303_v49  ;;  %v4446_v58 = vld [vmem:[#allocation9 + $0xd18] sm:$0xff]  ;;  %v3335_v2 = vld [vmem:[#allocation9 + $0x930] sm:$0xff] }
 0x417   :  { %v1696_v22 = vpop.f32.mrb[27].mxu0  ;;  %3693 = vmatprep.subr.bf16.mxu0 %v6648_v11  ;;  %v7912_v24 = vadd.f32 %v2724_v60, %v2176_v10  ;;  %v6619_v60 = vcombine.low %v3315_v43, %v3319_v44  ;;  %v3331_v11 = vld [vmem:[#allocation9 + $0x910] sm:$0xff]  ;;  %v6766_v1 = vcombine.high %v4446_v58, %v4450_v61  ;;  %v6765_v18 = vcombine.low %v4446_v58, %v4450_v61  ;;  %v4466_v20 = vld [vmem:[#allocation9 + $0xdb8] sm:$0xff]  ;;  %v3862_v61 = vld [vmem:[#allocation9 + $0xa40] sm:$0xff] }
 0x418   :  { %4849 = vmatpush1.bf16.msra.mxu1 %v6777_v3  ;;  %v7914_v28 = vadd.f32 %v2726_v63, %v2178_v16  ;;  %v6757_v63 = vcombine.low %v4438_v23, %v4442_v47  ;;  %v6627_v3 = vcombine.low %v3323_v54, %v3327_v26  ;;  %v6636_v10 = vcombine.high %v3331_v11, %v3335_v2  ;;  %v3339_v12 = vld [vmem:[#allocation9 + $0x950] sm:$0xff] }
 0x419   :  { %4850 = vmatprep.subr.bf16.mxu1 %v6786_v14  ;;  %v3343_v14 = vld [vmem:[#allocation9 + $0x970] sm:$0xff]  ;;  %v6774_v16 = vcombine.high %v4454_v7, %v4458_v9  ;;  %v6635_v17 = vcombine.low %v3331_v11, %v3335_v2  ;;  %v6773_v22 = vcombine.low %v4454_v7, %v4458_v9  ;;  %v4985_v2 = vld [vmem:[#allocation9 + $0xe88] sm:$0xff]  ;;  %v3870_v9 = vld [vmem:[#allocation9 + $0xa80] sm:$0xff] }
 0x41a   :  { %3694 = vmatpush1.bf16.msra.mxu0 %v6647_v19  ;;  %v4462_v19 = vld [vmem:[#allocation9 + $0xd98] sm:$0xff]  ;;  %v6644_v4 = vcombine.high %v3339_v12, %v3343_v14  ;;  %v6643_v29 = vcombine.low %v3339_v12, %v3343_v14  ;;  %v4993_v14 = vld [vmem:[#allocation9 + $0xec8] sm:$0xff] }
 0x41b   :  { %3695 = vmatprep.subr.bf16.mxu0 %v6656_v48  ;;  %v3347_v48 = vld [vmem:[#allocation9 + $0x990] sm:$0xff]  ;;  %v6782_v27 = vcombine.high %v4462_v19, %v4466_v20 }
 0x41c   :  { %4851 = vmatpush1.bf16.msra.mxu1 %v6785_v25  ;;  %v3351_v25 = vld [vmem:[#allocation9 + $0x9b0] sm:$0xff] }
 0x41d   :  { %4918 = vmatprep.subr.bf16.mxu1 %v6734_v15  ;;  %v4470_v15 = vld [vmem:[#allocation9 + $0xdd8] sm:$0xff] }
 0x41e   :  { %3696 = vmatpush1.bf16.msra.mxu0 %v6655_v30  ;;  %v4474_v30 = vld [vmem:[#allocation9 + $0xdf8] sm:$0xff] }
 0x41f   :  { %4869 = vmatmul.mubr.bf16.vlgmr.msra.gmra.mrb[48].mxu1 %v7917_v56  ;;  %3763 = vmatprep.subr.bf16.mxu0 %v6604_v33  ;;  %v6652_v33 = vcombine.high %v3347_v48, %v3351_v25 }
 0x420   :  { %4919 = vmatpush1.bf16.msra.mxu1 %v6733_v34  ;;  %4950 = vmatprep.mubr.bf16.mxu1 %v7576_v50 }
 0x421   :  { %3714 = vmatmul.mubr.bf16.vlgmr.msra.gmra.mrb[52].mxu0 %v7861_v8  ;;  %4920 = vmatprep.subr.bf16.mxu1 %v6742_v36  ;;  %v6781_v36 = vcombine.low %v4462_v19, %v4466_v20  ;;  %v3878_v20 = vld [vmem:[#allocation9 + $0xac0] sm:$0xff] }
 0x422   :  { %3764 = vmatpush1.bf16.msra.mxu0 %v6603_v57  ;;  %3795 = vmatprep.mubr.bf16.mxu0 %v7576_v50  ;;  %v3355_v57 = vld [vmem:[#allocation9 + $0x9d0] sm:$0xff] }
 0x423   :  { %3765 = vmatprep.subr.bf16.mxu0 %v6612_v41  ;;  %v6660_v47 = vcombine.high %v3355_v57, %v3359_v38  ;;  %v6659_v26 = vcombine.low %v3355_v57, %v3359_v38  ;;  %v3894_v57 = vld [vmem:[#allocation9 + $0xb40] sm:$0xff] }
 0x424   :  { %4921 = vmatpush1.bf16.msra.mxu1 %v6741_v42  ;;  %v3898_v38 = vld [vmem:[#allocation9 + $0xb60] sm:$0xff] }
 0x425   :  { %4922 = vmatprep.subr.bf16.mxu1 %v6750_v6  ;;  %v4969_v6 = vld [vmem:[#allocation9 + $0xe08] sm:$0xff] }
 0x426   :  { %3766 = vmatpush1.bf16.msra.mxu0 %v6611_v46  ;;  %v4973_v46 = vld [vmem:[#allocation9 + $0xe28] sm:$0xff] }
 0x427   :  { %3767 = vmatprep.subr.bf16.mxu0 %v6620_v51  ;;  %v6789_v51 = vcombine.low %v4470_v15, %v4474_v30  ;;  %v6794_v54 = vcombine.high %v4969_v6, %v4973_v46  ;;  %v6793_v58 = vcombine.low %v4969_v6, %v4973_v46  ;;  %v3902_v46 = vld [vmem:[#allocation9 + $0xb80] sm:$0xff] }
 0x428   :  { %4923 = vmatpush1.bf16.msra.mxu1 %v6749_v52  ;;  %v3854_v52 = vld [vmem:[#allocation9 + $0xa00] sm:$0xff] }
 0x429   :  { %4924 = vmatprep.subr.bf16.mxu1 %v6758_v55  ;;  %v4977_v55 = vld [vmem:[#allocation9 + $0xe48] sm:$0xff] }
 0x42a   :  { %3768 = vmatpush1.bf16.msra.mxu0 %v6619_v60  ;;  %v4981_v60 = vld [vmem:[#allocation9 + $0xe68] sm:$0xff] }
 0x42b   :  { %3769 = vmatprep.subr.bf16.mxu0 %v6628_v62  ;;  %v3866_v62 = vld [vmem:[#allocation9 + $0xa60] sm:$0xff]  ;;  %v6801_v7 = vcombine.low %v4977_v55, %v4981_v60 }
 0x42c   :  { %4925 = vmatpush1.bf16.msra.mxu1 %v6757_v63  ;;  %v6802_v63 = vcombine.high %v4977_v55, %v4981_v60  ;;  %v6671_v12 = vcombine.low %v3862_v61, %v3866_v62 }
 0x42d   :  { %4926 = vmatprep.subr.bf16.mxu1 %v6766_v1  ;;  %v4989_v1 = vld [vmem:[#allocation9 + $0xea8] sm:$0xff] }
 0x42e   :  { %3770 = vmatpush1.bf16.msra.mxu0 %v6627_v3  ;;  %v6672_v3 = vcombine.high %v3862_v61, %v3866_v62  ;;  %v6809_v19 = vcombine.low %v4985_v2, %v4989_v1 }
 0x42f   :  { %3771 = vmatprep.subr.bf16.mxu0 %v6636_v10  ;;  %v3874_v10 = vld [vmem:[#allocation9 + $0xaa0] sm:$0xff] }
 0x430   :  { %4927 = vmatpush1.bf16.msra.mxu1 %v6765_v18  ;;  %v6810_v18 = vcombine.high %v4985_v2, %v4989_v1 }
 0x431   :  { %4928 = vmatprep.subr.bf16.mxu1 %v6774_v16  ;;  %v4997_v16 = vld [vmem:[#allocation9 + $0xee8] sm:$0xff] }
 0x432   :  { %v3199_v49 = vpop.f32.mrb[24].mxu1  ;;  %3772 = vmatpush1.bf16.msra.mxu0 %v6635_v17  ;;  %v6680_v17 = vcombine.high %v3870_v9, %v3874_v10 }
 0x433   :  { %v7924_v32 = vadd.f32 %v3199_v49, %v7897_v37  ;;  %v3201_v31 = vpop.f32.mrb[25].mxu1  ;;  %3773 = vmatprep.subr.bf16.mxu0 %v6644_v4  ;;  %v6790_v37 = vcombine.high %v4470_v15, %v4474_v30  ;;  %v3882_v4 = vld [vmem:[#allocation9 + $0xae0] sm:$0xff]  ;;  %v6817_v49 = vcombine.low %v4993_v14, %v4997_v16 }
 0x434   :  { %v7927_v34 = vadd.f32 %v3201_v31, %v7900_v39  ;;  %v2052_v35 = vpop.f32.mrb[28].mxu0  ;;  %v3203_v53 = vpop.f32.mrb[26].mxu1  ;;  %4929 = vmatpush1.bf16.msra.mxu1 %v6773_v22  ;;  %v6651_v39 = vcombine.low %v3347_v48, %v3351_v25  ;;  %v6818_v22 = vcombine.high %v4993_v14, %v4997_v16  ;;  %v6679_v48 = vcombine.low %v3870_v9, %v3874_v10  ;;  %v5001_v25 = vld [vmem:[#allocation9 + $0xf08] sm:$0xff]  ;;  %v3890_v15 = vld [vmem:[#allocation9 + $0xb20] sm:$0xff]  ;;  %v4971_v10 = vld [vmem:[#allocation9 + $0xe18] sm:$0xff] }
 0x435   :  { %v7930_v13 = vadd.f32 %v2052_v35, %v7871_v59  ;;  %v2054_v41 = vpop.f32.mrb[29].mxu0  ;;  %v3204_v42 = vpop.f32.mrb[27].mxu1  ;;  %4930 = vmatprep.subr.bf16.mxu1 %v6782_v27  ;;  %v3858_v59 = vld [vmem:[#allocation9 + $0xa20] sm:$0xff]  ;;  %v6688_v27 = vcombine.high %v3878_v20, %v3882_v4  ;;  %v6687_v31 = vcombine.low %v3878_v20, %v3882_v4  ;;  %v5013_v35 = vld [vmem:[#allocation9 + $0xf68] sm:$0xff] }
 0x436   :  { %v7933_v43 = vadd.f32 %v2054_v41, %v7873_v0  ;;  %v2056_v44 = vpop.f32.mrb[30].mxu0  ;;  %3774 = vmatpush1.bf16.msra.mxu0 %v6643_v29  ;;  %v6664_v0 = vcombine.high %v3854_v52, %v3858_v59  ;;  %v6663_v11 = vcombine.low %v3854_v52, %v3858_v59  ;;  %v3886_v29 = vld [vmem:[#allocation9 + $0xb00] sm:$0xff]  ;;  %v6703_v52 = vcombine.low %v3894_v57, %v3898_v38  ;;  %v5025_v59 = vld [vmem:[#allocation9 + $0xfc8] sm:$0xff] }
 0x437   :  { %v2057_v23 = vpop.f32.mrb[31].mxu0  ;;  %3775 = vmatprep.subr.bf16.mxu0 %v6652_v33  ;;  %v5009_v33 = vld [vmem:[#allocation9 + $0xf48] sm:$0xff]  ;;  %v6696_v53 = vcombine.high %v3886_v29, %v3890_v15  ;;  %v6695_v42 = vcombine.low %v3886_v29, %v3890_v15 }
 0x438   :  { %4931 = vmatpush1.bf16.msra.mxu1 %v6781_v36  ;;  %v6834_v41 = vcombine.high %v5009_v33, %v5013_v35  ;;  %v5021_v44 = vld [vmem:[#allocation9 + $0xfa8] sm:$0xff]  ;;  %v6833_v6 = vcombine.low %v5009_v33, %v5013_v35  ;;  %v3906_v23 = vld [vmem:[#allocation9 + $0xba0] sm:$0xff]  ;;  %v3872_v35 = vld [vmem:[#allocation9 + $0xa90] sm:$0xff] }
 0x439   :  { %4932 = vmatprep.subr.bf16.mxu1 %v6790_v37  ;;  %v5017_v37 = vld [vmem:[#allocation9 + $0xf88] sm:$0xff]  ;;  %v6712_v60 = vcombine.high %v3902_v46, %v3906_v23 }
 0x43a   :  { %3776 = vmatpush1.bf16.msra.mxu0 %v6651_v39  ;;  %v6704_v39 = vcombine.high %v3894_v57, %v3898_v38  ;;  %v6841_v62 = vcombine.low %v5017_v37, %v5021_v44  ;;  %v4995_v38 = vld [vmem:[#allocation9 + $0xed8] sm:$0xff] }
 0x43b   :  { %3777 = vmatprep.subr.bf16.mxu0 %v6660_v47  ;;  %v6842_v47 = vcombine.high %v5017_v37, %v5021_v44  ;;  %v3880_v44 = vld [vmem:[#allocation9 + $0xad0] sm:$0xff] }
 0x43c   :  { %4933 = vmatpush1.bf16.msra.mxu1 %v6789_v51 }
 0x43d   :  { %5393 = vmatprep.subr.bf16.mxu1 %v6794_v54  ;;  %v5029_v54 = vld [vmem:[#allocation9 + $0xfe8] sm:$0xff] }
 0x43e   :  { %3778 = vmatpush1.bf16.msra.mxu0 %v6659_v26  ;;  %v6849_v16 = vcombine.low %v5025_v59, %v5029_v54 }
 0x43f   :  { %4951 = vmatmul.mubr.bf16.vlgmr.msra.gmra.mrb[52].mxu1 %v7917_v56  ;;  %4238 = vmatprep.subr.bf16.mxu0 %v6664_v0 }
 0x440   :  { %5394 = vmatpush1.bf16.msra.mxu1 %v6793_v58  ;;  %5425 = vmatprep.mubr.bf16.mxu1 %v7576_v50 }
 0x441   :  { %3796 = vmatmul.mubr.bf16.vlgmr.msra.gmra.mrb[56].mxu0 %v7861_v8  ;;  %5395 = vmatprep.subr.bf16.mxu1 %v6802_v63  ;;  %v5005_v8 = vld [vmem:[#allocation9 + $0xf28] sm:$0xff]  ;;  %v3910_v63 = vld [vmem:[#allocation9 + $0xbc0] sm:$0xff] }
 0x442   :  { %4239 = vmatpush1.bf16.msra.mxu0 %v6663_v11  ;;  %4270 = vmatprep.mubr.bf16.mxu0 %v7576_v50  ;;  %v6826_v30 = vcombine.high %v5001_v25, %v5005_v8  ;;  %v6825_v36 = vcombine.low %v5001_v25, %v5005_v8  ;;  %v3914_v11 = vld [vmem:[#allocation9 + $0xbe0] sm:$0xff]  ;;  %v3864_v8 = vld [vmem:[#allocation9 + $0xa50] sm:$0xff] }
 0x443   :  { %4240 = vmatprep.subr.bf16.mxu0 %v6672_v3  ;;  %v6720_v14 = vcombine.high %v3910_v63, %v3914_v11  ;;  %v6719_v4 = vcombine.low %v3910_v63, %v3914_v11  ;;  %v3896_v11 = vld [vmem:[#allocation9 + $0xb50] sm:$0xff] }
 0x444   :  { %5396 = vmatpush1.bf16.msra.mxu1 %v6801_v7 }
 0x445   :  { %5397 = vmatprep.subr.bf16.mxu1 %v6810_v18  ;;  %v4975_v18 = vld [vmem:[#allocation9 + $0xe38] sm:$0xff] }
 0x446   :  { %4241 = vmatpush1.bf16.msra.mxu0 %v6671_v12  ;;  %v6798_v20 = vcombine.high %v4971_v10, %v4975_v18  ;;  %v6797_v25 = vcombine.low %v4971_v10, %v4975_v18 }
 0x447   :  { %4242 = vmatprep.subr.bf16.mxu0 %v6680_v17  ;;  %v3856_v17 = vld [vmem:[#allocation9 + $0xa10] sm:$0xff] }
 0x448   :  { %5398 = vmatpush1.bf16.msra.mxu1 %v6809_v19  ;;  %v1052_v19 = vmax.f32 %v7829_v21, 0.0  ;;  %v4991_v21 = vld [vmem:[#allocation9 + $0xeb8] sm:$0xff] }
 0x449   :  { %5399 = vmatprep.subr.bf16.mxu1 %v6818_v22  ;;  %v4983_v22 = vld [vmem:[#allocation9 + $0xe78] sm:$0xff] }
 0x44a   :  { %4243 = vmatpush1.bf16.msra.mxu0 %v6679_v48 }
 0x44b   :  { %4244 = vmatprep.subr.bf16.mxu0 %v6688_v27  ;;  %v3868_v27 = vld [vmem:[#allocation9 + $0xa70] sm:$0xff] }
 0x44c   :  { %5400 = vmatpush1.bf16.msra.mxu1 %v6817_v49  ;;  %v7952_v49 = vpack.c.bf16 %v1052_v19, %v1052_v19  ;;  %v6675_v57 = vcombine.low %v3864_v8, %v3868_v27  ;;  %v5027_v19 = vld [vmem:[#allocation9 + $0xfd8] sm:$0xff] }
 0x44d   :  { %5401 = vmatprep.subr.bf16.mxu1 %v6826_v30  ;;  %v4987_v30 = vld [vmem:[#allocation9 + $0xe98] sm:$0xff] }
 0x44e   :  { %4245 = vmatpush1.bf16.msra.mxu0 %v6687_v31  ;;  %v6676_v31 = vcombine.high %v3864_v8, %v3868_v27  ;;  %v6813_v37 = vcombine.low %v4987_v30, %v4991_v21 }
 0x44f   :  { %4246 = vmatprep.subr.bf16.mxu0 %v6696_v53  ;;  %v3876_v53 = vld [vmem:[#allocation9 + $0xab0] sm:$0xff] }
 0x450   :  { %5402 = vmatpush1.bf16.msra.mxu1 %v6825_v36  ;;  %v6814_v36 = vcombine.high %v4987_v30, %v4991_v21 }
 0x451   :  { %5403 = vmatprep.subr.bf16.mxu1 %v6834_v41  ;;  %v4999_v41 = vld [vmem:[#allocation9 + $0xef8] sm:$0xff] }
 0x452   :  { %v3281_v51 = vpop.f32.mrb[28].mxu1  ;;  %4247 = vmatpush1.bf16.msra.mxu0 %v6695_v42  ;;  %v6684_v42 = vcombine.high %v3872_v35, %v3876_v53 }
 0x453   :  { %v7940_v26 = vadd.f32 %v3281_v51, %v7912_v24  ;;  %v3283_v55 = vpop.f32.mrb[29].mxu1  ;;  %4248 = vmatprep.subr.bf16.mxu0 %v6704_v39  ;;  %v6850_v24 = vcombine.high %v5025_v59, %v5029_v54  ;;  %v3884_v39 = vld [vmem:[#allocation9 + $0xaf0] sm:$0xff] }
 0x454   :  { %v7943_v0 = vadd.f32 %v3283_v55, %v7914_v28  ;;  %v2134_v58 = vpop.f32.mrb[32].mxu0  ;;  %v3285_v61 = vpop.f32.mrb[30].mxu1  ;;  %5404 = vmatpush1.bf16.msra.mxu1 %v6833_v6  ;;  %v6711_v28 = vcombine.low %v3902_v46, %v3906_v23  ;;  %v6822_v6 = vcombine.high %v4995_v38, %v4999_v41  ;;  %v6683_v46 = vcombine.low %v3872_v35, %v3876_v53  ;;  %v5003_v23 = vld [vmem:[#allocation9 + $0xf18] sm:$0xff]  ;;  %v3888_v59 = vld [vmem:[#allocation9 + $0xb10] sm:$0xff] }
 0x455   :  { %v7946_v2 = vadd.f32 %v2134_v58, %v7902_v40  ;;  %v2136_v1 = vpop.f32.mrb[33].mxu0  ;;  %v3286_v3 = vpop.f32.mrb[31].mxu1  ;;  %5405 = vmatprep.subr.bf16.mxu1 %v6842_v47  ;;  %v3860_v40 = vld [vmem:[#allocation9 + $0xa30] sm:$0xff]  ;;  %v5007_v47 = vld [vmem:[#allocation9 + $0xf38] sm:$0xff]  ;;  %v6692_v51 = vcombine.high %v3880_v44, %v3884_v39 }
 0x456   :  { %v7949_v7 = vadd.f32 %v2136_v1, %v7904_v45  ;;  %v2138_v9 = vpop.f32.mrb[34].mxu0  ;;  %4249 = vmatpush1.bf16.msra.mxu0 %v6703_v52  ;;  %v4979_v45 = vld [vmem:[#allocation9 + $0xe58] sm:$0xff]  ;;  %v6668_v48 = vcombine.high %v3856_v17, %v3860_v40  ;;  %v6667_v15 = vcombine.low %v3856_v17, %v3860_v40  ;;  %v6821_v52 = vcombine.low %v4995_v38, %v4999_v41  ;;  %v3892_v54 = vld [vmem:[#allocation9 + $0xb30] sm:$0xff]  ;;  %v4411_v38 = vld [vmem:[#allocation9 + $0xc00] sm:$0xff] }
 0x457   :  { %v2139_v12 = vpop.f32.mrb[35].mxu0  ;;  %4250 = vmatprep.subr.bf16.mxu0 %v6712_v60  ;;  %v6806_v29 = vcombine.high %v4979_v45, %v4983_v22  ;;  %v6805_v33 = vcombine.low %v4979_v45, %v4983_v22  ;;  %v6830_v55 = vcombine.high %v5003_v23, %v5007_v47  ;;  %v6691_v60 = vcombine.low %v3880_v44, %v3884_v39  ;;  %v5011_v58 = vld [vmem:[#allocation9 + $0xf58] sm:$0xff]  ;;  %v3900_v1 = vld [vmem:[#allocation9 + $0xb70] sm:$0xff]  ;;  %v4415_v41 = vld [vmem:[#allocation9 + $0xc20] sm:$0xff] }
 0x458   :  { %5406 = vmatpush1.bf16.msra.mxu1 %v6841_v62  ;;  %v5015_v61 = vld [vmem:[#allocation9 + $0xf78] sm:$0xff]  ;;  %v6700_v62 = vcombine.high %v3888_v59, %v3892_v54  ;;  %v6829_v63 = vcombine.low %v5003_v23, %v5007_v47  ;;  %v6708_v10 = vcombine.high %v3896_v11, %v3900_v1  ;;  %v3904_v12 = vld [vmem:[#allocation9 + $0xb90] sm:$0xff]  ;;  %v6707_v40 = vcombine.low %v3896_v11, %v3900_v1  ;;  %v4423_v44 = vld [vmem:[#allocation9 + $0xc60] sm:$0xff] }
 0x459   :  { %5407 = vmatprep.subr.bf16.mxu1 %v6850_v24  ;;  %v6838_v3 = vcombine.high %v5011_v58, %v5015_v61  ;;  %v6699_v24 = vcombine.low %v3888_v59, %v3892_v54  ;;  %v5019_v9 = vld [vmem:[#allocation9 + $0xf98] sm:$0xff]  ;;  %v6837_v18 = vcombine.low %v5011_v58, %v5015_v61  ;;  %v4459_v1 = vld [vmem:[#allocation9 + $0xd80] sm:$0xff] }
 0x45a   :  { %4251 = vmatpush1.bf16.msra.mxu0 %v6711_v28  ;;  %v5023_v28 = vld [vmem:[#allocation9 + $0xfb8] sm:$0xff] }
 0x45b   :  { %4252 = vmatprep.subr.bf16.mxu0 %v6720_v14  ;;  %v3908_v14 = vld [vmem:[#allocation9 + $0xbb0] sm:$0xff]  ;;  %v6845_v27 = vcombine.low %v5019_v9, %v5023_v28 }
 0x45c   :  { %5408 = vmatpush1.bf16.msra.mxu1 %v6849_v16  ;;  %v6846_v16 = vcombine.high %v5019_v9, %v5023_v28  ;;  %v6716_v22 = vcombine.high %v3904_v12, %v3908_v14 }
 0x45d   :  { %5475 = vmatprep.subr.bf16.mxu1 %v6798_v20  ;;  %v5031_v20 = vld [vmem:[#allocation9 + $0xff8] sm:$0xff] }
 0x45e   :  { %4253 = vmatpush1.bf16.msra.mxu0 %v6719_v4 }
 0x45f   :  { %5426 = vmatmul.mubr.bf16.vlgmr.msra.gmra.mrb[56].mxu1 %v7952_v49  ;;  %4320 = vmatprep.subr.bf16.mxu0 %v6668_v48 }
 0x460   :  { %5476 = vmatpush1.bf16.msra.mxu1 %v6797_v25  ;;  %5507 = vmatprep.mubr.bf16.mxu1 %v7576_v50 }
 0x461   :  { %4271 = vmatmul.mubr.bf16.vlgmr.msra.gmra.mrb[60].mxu0 %v7890_v5  ;;  %5477 = vmatprep.subr.bf16.mxu1 %v6806_v29  ;;  %v3912_v29 = vld [vmem:[#allocation9 + $0xbd0] sm:$0xff] }
 0x462   :  { %4321 = vmatpush1.bf16.msra.mxu0 %v6667_v15  ;;  %4352 = vmatprep.mubr.bf16.mxu0 %v7576_v50  ;;  %v3916_v15 = vld [vmem:[#allocation9 + $0xbf0] sm:$0xff] }
 0x463   :  { %4322 = vmatprep.subr.bf16.mxu0 %v6676_v31 }
 0x464   :  { %5478 = vmatpush1.bf16.msra.mxu1 %v6805_v33 }
 0x465   :  { %5479 = vmatprep.subr.bf16.mxu1 %v6814_v36  ;;  %v6724_v36 = vcombine.high %v3912_v29, %v3916_v15 }
 0x466   :  { %4323 = vmatpush1.bf16.msra.mxu0 %v6675_v57  ;;  %v6853_v57 = vcombine.low %v5027_v19, %v5031_v20 }
 0x467   :  { %4324 = vmatprep.subr.bf16.mxu0 %v6684_v42  ;;  %v6728_v42 = vcombine.high %v4411_v38, %v4415_v41 }
 0x468   :  { %5480 = vmatpush1.bf16.msra.mxu1 %v6813_v37  ;;  %v4419_v37 = vld [vmem:[#allocation9 + $0xc40] sm:$0xff] }
 0x469   :  { %5481 = vmatprep.subr.bf16.mxu1 %v6822_v6  ;;  %v6736_v39 = vcombine.high %v4419_v37, %v4423_v44  ;;  %v4427_v6 = vld [vmem:[#allocation9 + $0xc80] sm:$0xff]  ;;  %v6735_v23 = vcombine.low %v4419_v37, %v4423_v44 }
 0x46a   :  { %4325 = vmatpush1.bf16.msra.mxu0 %v6683_v46  ;;  %v4431_v46 = vld [vmem:[#allocation9 + $0xca0] sm:$0xff] }
 0x46b   :  { %4326 = vmatprep.subr.bf16.mxu0 %v6692_v51  ;;  %v6744_v47 = vcombine.high %v4427_v6, %v4431_v46  ;;  %v4435_v51 = vld [vmem:[#allocation9 + $0xcc0] sm:$0xff]  ;;  %v6743_v59 = vcombine.low %v4427_v6, %v4431_v46  ;;  %v4441_v6 = vld [vmem:[#allocation9 + $0xcf0] sm:$0xff]  ;;  %v7322_v46 = vld [vmem:[#allocation12 + $0xe0] sm:$0xff]  }
 0x46c   :  { %5482 = vmatpush1.bf16.msra.mxu1 %v6821_v52  ;;  %v4439_v52 = vld [vmem:[#allocation9 + $0xce0] sm:$0xff] }
 0x46d   :  { %5483 = vmatprep.subr.bf16.mxu1 %v6830_v55  ;;  %v6752_v54 = vcombine.high %v4435_v51, %v4439_v52  ;;  %v4443_v55 = vld [vmem:[#allocation9 + $0xd00] sm:$0xff]  ;;  %v6751_v58 = vcombine.low %v4435_v51, %v4439_v52  ;;  %v7323_v51 = vld [vmem:[#allocation12 + $0xa0] sm:$0xff]   ;;  %v4445_v52 = vld [vmem:[#allocation9 + $0xd10] sm:$0xff] }
 0x46e   :  { %4327 = vmatpush1.bf16.msra.mxu0 %v6691_v60  ;;  %v4447_v60 = vld [vmem:[#allocation9 + $0xd20] sm:$0xff] }
 0x46f   :  { %4328 = vmatprep.subr.bf16.mxu0 %v6700_v62  ;;  %v6760_v61 = vcombine.high %v4443_v55, %v4447_v60  ;;  %v4451_v62 = vld [vmem:[#allocation9 + $0xd40] sm:$0xff] }
 0x470   :  { %5484 = vmatpush1.bf16.msra.mxu1 %v6829_v63  ;;  %v6759_v63 = vcombine.low %v4443_v55, %v4447_v60 }
 0x471   :  { %5485 = vmatprep.subr.bf16.mxu1 %v6838_v3  ;;  %v4463_v3 = vld [vmem:[#allocation9 + $0xda0] sm:$0xff] }
 0x472   :  { %v3756_v17 = vpop.f32.mrb[32].mxu1  ;;  %4329 = vmatpush1.bf16.msra.mxu0 %v6699_v24 }
 0x473   :  { %v7959_v4 = vadd.f32 %v3756_v17, %v7924_v32  ;;  %v3758_v45 = vpop.f32.mrb[33].mxu1  ;;  %4330 = vmatprep.subr.bf16.mxu0 %v6708_v10  ;;  %v6854_v32 = vcombine.high %v5027_v19, %v5031_v20  ;;  %v4467_v17 = vld [vmem:[#allocation9 + $0xdc0] sm:$0xff] }
 0x474   :  { %v7962_v48 = vadd.f32 %v3758_v45, %v7927_v34  ;;  %v2601_v25 = vpop.f32.mrb[36].mxu0  ;;  %v3760_v8 = vpop.f32.mrb[34].mxu1  ;;  %5486 = vmatpush1.bf16.msra.mxu1 %v6837_v18  ;;  %v6715_v34 = vcombine.low %v3904_v12, %v3908_v14  ;;  %v6776_v18 = vcombine.high %v4459_v1, %v4463_v3 }
 0x475   :  { %v7965_v30 = vadd.f32 %v2601_v25, %v7930_v13  ;;  %v2603_v21 = vpop.f32.mrb[37].mxu0  ;;  %v3761_v31 = vpop.f32.mrb[35].mxu1  ;;  %5487 = vmatprep.subr.bf16.mxu1 %v6846_v16  ;;  %v6723_v13 = vcombine.low %v3912_v29, %v3916_v15  ;;  %v6775_v25 = vcombine.low %v4459_v1, %v4463_v3  ;;  %v7315_v29 = vld [vmem:[#allocation12 + $0x80] sm:$0xff]   ;;  %v7316_v15 = vld [vmem:[#allocation12 + $0xc8] sm:$0xff]  }
 0x476   :  { %v7968_v33 = vadd.f32 %v2603_v21, %v7933_v43  ;;  %v2605_v35 = vpop.f32.mrb[38].mxu0  ;;  %4331 = vmatpush1.bf16.msra.mxu0 %v6707_v40  ;;  %v6727_v43 = vcombine.low %v4411_v38, %v4415_v41  ;;  %v4471_v40 = vld [vmem:[#allocation9 + $0xde0] sm:$0xff]  ;;  %v4413_v21 = vld [vmem:[#allocation9 + $0xc10] sm:$0xff]  ;;  %v7319_v38 = vld [vmem:[#allocation12 + $0x90] sm:$0xff]  }
 0x477   :  { %v2606_v53 = vpop.f32.mrb[39].mxu0  ;;  %4332 = vmatprep.subr.bf16.mxu0 %v6716_v22  ;;  %v4417_v31 = vld [vmem:[#allocation9 + $0xc30] sm:$0xff] }
 0x478   :  { %5488 = vmatpush1.bf16.msra.mxu1 %v6845_v27  ;;  %v6784_v27 = vcombine.high %v4467_v17, %v4471_v40  ;;  %v6732_v35 = vcombine.high %v4413_v21, %v4417_v31  ;;  %v4425_v53 = vld [vmem:[#allocation9 + $0xc70] sm:$0xff] }
 0x479   :  { %5489 = vmatprep.subr.bf16.mxu1 %v6854_v32  ;;  %v7317_v32 = vld [vmem:[#allocation12 + $0x88] sm:$0xff]  }
 0x47a   :  { %4333 = vmatpush1.bf16.msra.mxu0 %v6715_v34  ;;  %v4421_v34 = vld [vmem:[#allocation9 + $0xc50] sm:$0xff] }
 0x47b   :  { %4334 = vmatprep.subr.bf16.mxu0 %v6724_v36  ;;  %v6731_v36 = vcombine.low %v4413_v21, %v4417_v31  ;;  %v4429_v41 = vld [vmem:[#allocation9 + $0xc90] sm:$0xff]  ;;  %v6739_v37 = vcombine.low %v4421_v34, %v4425_v53  ;;  %v7328_v21 = vld [vmem:[#allocation12 + $0xf8] sm:$0xff]  }
 0x47c   :  { %5490 = vmatpush1.bf16.msra.mxu1 %v6853_v57  ;;  %v6740_v57 = vcombine.high %v4421_v34, %v4425_v53  ;;  %v7325_v1 = vld [vmem:[#allocation12 + $0xa8] sm:$0xff]   ;;  %v4968_v31 = vld [vmem:[#allocation9 + $0xe00] sm:$0xff] }
 0x47d   :  { %v4980_v34 = vld [vmem:[#allocation9 + $0xe60] sm:$0xff] }
 0x47e   :  { %4335 = vmatpush1.bf16.msra.mxu0 %v6723_v13  ;;  %v4433_v13 = vld [vmem:[#allocation9 + $0xcb0] sm:$0xff] }
 0x47f   :  { %5508 = vmatmul.mubr.bf16.vlgmr.msra.gmra.mrb[60].mxu1 %v7952_v49  ;;  %4795 = vmatprep.subr.bf16.mxu0 %v6728_v42  ;;  %v7320_v42 = vld [vmem:[#allocation12 + $0xd8] sm:$0xff]   ;;  %v6748_v44 = vcombine.high %v4429_v41, %v4433_v13 }
 0x481   :  { %4353 = vmatmul.mubr.bf16.vlgmr.msra.gmra.mrb[64].mxu0 %v7890_v5  ;;  %v4455_v5 = vld [vmem:[#allocation9 + $0xd60] sm:$0xff] }
 0x482   :  { %4796 = vmatpush1.bf16.msra.mxu0 %v6727_v43  ;;  %4827 = vmatprep.mubr.bf16.mxu0 %v7576_v50  ;;  %v6768_v11 = vcombine.high %v4451_v62, %v4455_v5  ;;  %v6767_v9 = vcombine.low %v4451_v62, %v4455_v5  ;;  %v7321_v43 = vld [vmem:[#allocation12 + $0x98] sm:$0xff]  }
 0x483   :  { %4797 = vmatprep.subr.bf16.mxu0 %v6736_v39  ;;  %v4437_v39 = vld [vmem:[#allocation9 + $0xcd0] sm:$0xff] }
 0x484   :  { %v6755_v55 = vcombine.low %v4437_v39, %v4441_v6 }
 0x486   :  { %4798 = vmatpush1.bf16.msra.mxu0 %v6735_v23  ;;  %v6747_v23 = vcombine.low %v4429_v41, %v4433_v13 }
 0x487   :  { %4799 = vmatprep.subr.bf16.mxu0 %v6744_v47  ;;  %v6756_v47 = vcombine.high %v4437_v39, %v4441_v6  ;;  %v5000_v39 = vld [vmem:[#allocation9 + $0xf00] sm:$0xff] }
 0x488   :  { %v5004_v6 = vld [vmem:[#allocation9 + $0xf20] sm:$0xff] }
 0x48a   :  { %4800 = vmatpush1.bf16.msra.mxu0 %v6743_v59  ;;  %v4449_v59 = vld [vmem:[#allocation9 + $0xd30] sm:$0xff] }
 0x48b   :  { %4801 = vmatprep.subr.bf16.mxu0 %v6752_v54  ;;  %v7324_v54 = vld [vmem:[#allocation12 + $0xe8] sm:$0xff]   ;;  %v6764_v60 = vcombine.high %v4445_v52, %v4449_v59  ;;  %v6763_v62 = vcombine.low %v4445_v52, %v4449_v59  ;;  %v5016_v59 = vld [vmem:[#allocation9 + $0xf80] sm:$0xff] }
 0x48e   :  { %4802 = vmatpush1.bf16.msra.mxu0 %v6751_v58  ;;  %v4453_v58 = vld [vmem:[#allocation9 + $0xd50] sm:$0xff] }
 0x48f   :  { %4803 = vmatprep.subr.bf16.mxu0 %v6760_v61  ;;  %v4457_v61 = vld [vmem:[#allocation9 + $0xd70] sm:$0xff] }
 0x490   :  { %v6772_v5 = vcombine.high %v4453_v58, %v4457_v61 }
 0x492   :  { %v3838_v24 = vpop.f32.mrb[36].mxu1  ;;  %4804 = vmatpush1.bf16.msra.mxu0 %v6759_v63  ;;  %v4461_v63 = vld [vmem:[#allocation9 + $0xd90] sm:$0xff] }
 0x493   :  { %v7974_v28 = vadd.f32 %v3838_v24, %v7940_v26  ;;  %v3840_v10 = vpop.f32.mrb[37].mxu1  ;;  %4805 = vmatprep.subr.bf16.mxu0 %v6768_v11  ;;  %v4465_v11 = vld [vmem:[#allocation9 + $0xdb0] sm:$0xff]  ;;  %v6771_v24 = vcombine.low %v4453_v58, %v4457_v61 }
 0x494   :  { %v7977_v12 = vadd.f32 %v3840_v10, %v7943_v0  ;;  %v2683_v14 = vpop.f32.mrb[40].mxu0  ;;  %v3842_v16 = vpop.f32.mrb[38].mxu1  ;;  %v7314_v0 = vld [vmem:[#allocation12 + $0xc0] sm:$0xff]  }
 0x495   :  { %v7980_v19 = vadd.f32 %v2683_v14, %v7946_v2  ;;  %v2685_v20 = vpop.f32.mrb[41].mxu0  ;;  %v3843_v45 = vpop.f32.mrb[39].mxu1  ;;  %7018 = vmatprep.subr.bf16.mxu1 %v7314_v0  ;;  %v6783_v2 = vcombine.low %v4467_v17, %v4471_v40  ;;  %v7326_v14 = vld [vmem:[#allocation12 + $0xf0] sm:$0xff]  }
 0x496   :  { %v7983_v22 = vadd.f32 %v2685_v20, %v7949_v7  ;;  %v2687_v26 = vpop.f32.mrb[42].mxu0  ;;  %4806 = vmatpush1.bf16.msra.mxu0 %v6767_v9  ;;  %7019 = vmatpush3.bf16.msra.mxu1 %v7315_v29  ;;  %v7318_v7 = vld [vmem:[#allocation12 + $0xd0] sm:$0xff]   ;;  %v4469_v20 = vld [vmem:[#allocation9 + $0xdd0] sm:$0xff]  ;;  %v6779_v29 = vcombine.low %v4461_v63, %v4465_v11 }
 0x497   :  { %v2688_v8 = vpop.f32.mrb[43].mxu0  ;;  %4807 = vmatprep.subr.bf16.mxu0 %v6776_v18  ;;  %7020 = vmatprep.subr.bf16.mxu1 %v7316_v15  ;;  %v6780_v18 = vcombine.high %v4461_v63, %v4465_v11  ;;  %v4473_v45 = vld [vmem:[#allocation9 + $0xdf0] sm:$0xff]  ;;  %v7327_v26 = vld [vmem:[#allocation12 + $0xb0] sm:$0xff]  }
 0x498   :  { %v6788_v15 = vcombine.high %v4469_v20, %v4473_v45 }
 0x49a   :  { %4808 = vmatpush1.bf16.msra.mxu0 %v6775_v25  ;;  %7021 = vmatpush3.bf16.msra.mxu1 %v7317_v32  ;;  %v7329_v32 = vld [vmem:[#allocation12 + $0xb8] sm:$0xff]  }
 0x49b   :  { %4809 = vmatprep.subr.bf16.mxu0 %v6784_v27  ;;  %7022 = vmatprep.subr.bf16.mxu1 %v7318_v7  ;;  %v7330_v7 = vld [vmem:[#allocation12 + $0x1c0] sm:$0xff]  }
 0x49e   :  { %4810 = vmatpush1.bf16.msra.mxu0 %v6783_v2  ;;  %7023 = vmatpush3.bf16.msra.mxu1 %v7319_v38  ;;  %v4972_v2 = vld [vmem:[#allocation9 + $0xe20] sm:$0xff] }
 0x49f   :  { %4877 = vmatprep.subr.bf16.mxu0 %v6732_v35  ;;  %7024 = vmatprep.subr.bf16.mxu1 %v7320_v42  ;;  %v6792_v35 = vcombine.high %v4968_v31, %v4972_v2  ;;  %v6791_v53 = vcombine.low %v4968_v31, %v4972_v2  ;;  %v4988_v38 = vld [vmem:[#allocation9 + $0xea0] sm:$0xff]  ;;  %v4994_v31 = vld [vmem:[#allocation9 + $0xed0] sm:$0xff] }
 0x4a0   :  { %v4992_v42 = vld [vmem:[#allocation9 + $0xec0] sm:$0xff]  ;;  %v4998_v2 = vld [vmem:[#allocation9 + $0xef0] sm:$0xff] }
 0x4a1   :  { %4828 = vmatmul.mubr.bf16.vlgmr.msra.gmra.mrb[68].mxu0 %v7917_v56 }
 0x4a2   :  { %4878 = vmatpush1.bf16.msra.mxu0 %v6731_v36  ;;  %4909 = vmatprep.mubr.bf16.mxu0 %v7576_v50 }
 0x4a3   :  { %4879 = vmatprep.subr.bf16.mxu0 %v6740_v57  ;;  %7025 = vmatpush3.bf16.msra.mxu1 %v7321_v43  ;;  %v4984_v57 = vld [vmem:[#allocation9 + $0xe80] sm:$0xff] }
 0x4a4   :  { %7026 = vmatprep.subr.bf16.mxu1 %v7322_v46  ;;  %v6808_v13 = vcombine.high %v4984_v57, %v4988_v38 }
 0x4a6   :  { %4880 = vmatpush1.bf16.msra.mxu0 %v6739_v37  ;;  %v4996_v37 = vld [vmem:[#allocation9 + $0xee0] sm:$0xff] }
 0x4a7   :  { %4881 = vmatprep.subr.bf16.mxu0 %v6748_v44  ;;  %7027 = vmatpush3.bf16.msra.mxu1 %v7323_v51  ;;  %v6807_v44 = vcombine.low %v4984_v57, %v4988_v38  ;;  %v6816_v43 = vcombine.high %v4992_v42, %v4996_v37  ;;  %v6815_v46 = vcombine.low %v4992_v42, %v4996_v37  ;;  %v5018_v38 = vld [vmem:[#allocation9 + $0xf90] sm:$0xff] }
 0x4a8   :  { %7028 = vmatprep.subr.bf16.mxu1 %v7324_v54  ;;  %v6823_v51 = vcombine.low %v5000_v39, %v5004_v6  ;;  %v5020_v54 = vld [vmem:[#allocation9 + $0xfa0] sm:$0xff] }
 0x4aa   :  { %4882 = vmatpush1.bf16.msra.mxu0 %v6747_v23  ;;  %v6824_v23 = vcombine.high %v5000_v39, %v5004_v6 }
 0x4ab   :  { %4883 = vmatprep.subr.bf16.mxu0 %v6756_v47  ;;  %7029 = vmatpush3.bf16.msra.mxu1 %v7325_v1  ;;  %v5008_v47 = vld [vmem:[#allocation9 + $0xf40] sm:$0xff] }
 0x4ac   :  { %7030 = vmatprep.subr.bf16.mxu1 %v7326_v14  ;;  %v5024_v1 = vld [vmem:[#allocation9 + $0xfc0] sm:$0xff] }
 0x4ae   :  { %4884 = vmatpush1.bf16.msra.mxu0 %v6755_v55 }
 0x4af   :  { %4885 = vmatprep.subr.bf16.mxu0 %v6764_v60  ;;  %7031 = vmatpush3.bf16.msra.mxu1 %v7327_v26 }
 0x4b0   :  { %7032 = vmatprep.subr.bf16.mxu1 %v7328_v21 }
 0x4b2   :  { %v4313_v3 = vpop.f32.mrb[40].mxu1  ;;  %4886 = vmatpush1.bf16.msra.mxu0 %v6763_v62  ;;  %v6840_v62 = vcombine.high %v5016_v59, %v5020_v54 }
 0x4b3   :  { %v7988_v9 = vadd.f32 %v4313_v3, %v7959_v4  ;;  %v4315_v10 = vpop.f32.mrb[41].mxu1  ;;  %4887 = vmatprep.subr.bf16.mxu0 %v6772_v5  ;;  %7033 = vmatpush3.bf16.msra.mxu1 %v7329_v32  ;;  %v5028_v3 = vld [vmem:[#allocation9 + $0xfe0] sm:$0xff] }
 0x4b4   :  { %v7991_v16 = vadd.f32 %v4315_v10, %v7962_v48  ;;  %v3158_v17 = vpop.f32.mrb[44].mxu0  ;;  %v4317_v40 = vpop.f32.mrb[42].mxu1  ;;  %7062 = vmatprep.subr.bf16.mxu1 %v7330_v7  ;;  %v6847_v26 = vcombine.low %v5024_v1, %v5028_v3  ;;  %v5006_v7 = vld [vmem:[#allocation9 + $0xf30] sm:$0xff] }
 0x4b5   :  { %v7994_v25 = vadd.f32 %v3158_v17, %v7965_v30  ;;  %v3160_v8 = vpop.f32.mrb[45].mxu0  ;;  %v4318_v27 = vpop.f32.mrb[43].mxu1  ;;  %v6787_v30 = vcombine.low %v4469_v20, %v4473_v45  ;;  %v6839_v17 = vcombine.low %v5016_v59, %v5020_v54  ;;  %v6848_v20 = vcombine.high %v5024_v1, %v5028_v3  ;;  %v4974_v45 = vld [vmem:[#allocation9 + $0xe30] sm:$0xff] }
 0x4b6   :  { %v7997_v4 = vadd.f32 %v3160_v8, %v7968_v33  ;;  %v3162_v0 = vpop.f32.mrb[46].mxu0  ;;  %4888 = vmatpush1.bf16.msra.mxu0 %v6771_v24  ;;  %v4976_v33 = vld [vmem:[#allocation9 + $0xe40] sm:$0xff]  ;;  %v4978_v27 = vld [vmem:[#allocation9 + $0xe50] sm:$0xff] }
 0x4b7   :  { %v3163_v48 = vpop.f32.mrb[47].mxu0  ;;  %4889 = vmatprep.subr.bf16.mxu0 %v6780_v18  ;;  %v6800_v36 = vcombine.high %v4976_v33, %v4980_v34  ;;  %v6799_v41 = vcombine.low %v4976_v33, %v4980_v34  ;;  %v6819_v33 = vcombine.low %v4994_v31, %v4998_v2 }
 0x4b8   :  { %v4990_v48 = vld [vmem:[#allocation9 + $0xeb0] sm:$0xff] }
 0x4ba   :  { %4890 = vmatpush1.bf16.msra.mxu0 %v6779_v29 }
 0x4bb   :  { %4891 = vmatprep.subr.bf16.mxu0 %v6788_v15 }
 0x4be   :  { %4892 = vmatpush1.bf16.msra.mxu0 %v6787_v30  ;;  %v6820_v30 = vcombine.high %v4994_v31, %v4998_v2  ;;  %v7357_v31 = vld [vmem:[#allocation12 + $0x28] sm:$0xff]  }
 0x4bf   :  { %5352 = vmatprep.subr.bf16.mxu0 %v6792_v35  ;;  %v5002_v35 = vld [vmem:[#allocation9 + $0xf10] sm:$0xff] }
 0x4c0   :  { %v6828_v34 = vcombine.high %v5002_v35, %v5006_v7  ;;  %v6827_v57 = vcombine.low %v5002_v35, %v5006_v7 }
 0x4c1   :  { %4910 = vmatmul.mubr.bf16.vlgmr.msra.gmra.mrb[72].mxu0 %v7917_v56  ;;  %v5012_v56 = vld [vmem:[#allocation9 + $0xf60] sm:$0xff] }
 0x4c2   :  { %5353 = vmatpush1.bf16.msra.mxu0 %v6791_v53  ;;  %5384 = vmatprep.mubr.bf16.mxu0 %v7576_v50  ;;  %v6832_v52 = vcombine.high %v5008_v47, %v5012_v56  ;;  %v6831_v60 = vcombine.low %v5008_v47, %v5012_v56  ;;  %v5010_v53 = vld [vmem:[#allocation9 + $0xf50] sm:$0xff] }
 0x4c3   :  { %5354 = vmatprep.subr.bf16.mxu0 %v6800_v36  ;;  %v5014_v36 = vld [vmem:[#allocation9 + $0xf70] sm:$0xff] }
 0x4c4   :  { %v6835_v42 = vcombine.low %v5010_v53, %v5014_v36  ;;  %v5030_v47 = vld [vmem:[#allocation9 + $0xff0] sm:$0xff] }
 0x4c6   :  { %5355 = vmatpush1.bf16.msra.mxu0 %v6799_v41  ;;  %v5022_v41 = vld [vmem:[#allocation9 + $0xfb0] sm:$0xff] }
 0x4c7   :  { %5356 = vmatprep.subr.bf16.mxu0 %v6808_v13  ;;  %v6843_v54 = vcombine.low %v5018_v38, %v5022_v41 }
 0x4ca   :  { %5357 = vmatpush1.bf16.msra.mxu0 %v6807_v44 }
 0x4cb   :  { %5358 = vmatprep.subr.bf16.mxu0 %v6816_v43  ;;  %v6844_v43 = vcombine.high %v5018_v38, %v5022_v41 }
 0x4ce   :  { %5359 = vmatpush1.bf16.msra.mxu0 %v6815_v46 }
 0x4cf   :  { %5360 = vmatprep.subr.bf16.mxu0 %v6824_v23  ;;  %v5026_v23 = vld [vmem:[#allocation9 + $0xfd0] sm:$0xff] }
 0x4d2   :  { %v4395_v55 = vpop.f32.mrb[44].mxu1  ;;  %5361 = vmatpush1.bf16.msra.mxu0 %v6823_v51 }
 0x4d3   :  { %v8002_v58 = vadd.f32 %v4395_v55, %v7974_v28  ;;  %v4397_v61 = vpop.f32.mrb[45].mxu1  ;;  %5362 = vmatprep.subr.bf16.mxu0 %v6832_v52 }
 0x4d4   :  { %v8005_v5 = vadd.f32 %v4397_v61, %v7977_v12  ;;  %v3240_v63 = vpop.f32.mrb[48].mxu0  ;;  %v4399_v11 = vpop.f32.mrb[46].mxu1  ;;  %v4970_v12 = vld [vmem:[#allocation9 + $0xe10] sm:$0xff] }
 0x4d5   :  { %v8008_v24 = vadd.f32 %v3240_v63, %v7980_v19  ;;  %v3242_v10 = vpop.f32.mrb[49].mxu0  ;;  %v4400_v18 = vpop.f32.mrb[47].mxu1  ;;  %v6796_v8 = vcombine.high %v4970_v12, %v4974_v45  ;;  %v4982_v19 = vld [vmem:[#allocation9 + $0xe70] sm:$0xff]  ;;  %v6795_v0 = vcombine.low %v4970_v12, %v4974_v45  ;;  %v7351_v12 = vld [vmem:[#allocation12 + $0x10] sm:$0xff]   ;;  %v7353_v45 = vld [vmem:[#allocation12 + $0x18] sm:$0xff]  }
 0x4d6   :  { %v8011_v14 = vadd.f32 %v3242_v10, %v7983_v22  ;;  %v3244_v28 = vpop.f32.mrb[50].mxu0  ;;  %5363 = vmatpush1.bf16.msra.mxu0 %v6831_v60  ;;  %v6804_v29 = vcombine.high %v4978_v27, %v4982_v19  ;;  %v4986_v22 = vld [vmem:[#allocation9 + $0xe90] sm:$0xff]  ;;  %v6803_v15 = vcombine.low %v4978_v27, %v4982_v19  ;;  %v6852_v60 = vcombine.high %v5026_v23, %v5030_v47 }
 0x4d7   :  { %v3245_v40 = vpop.f32.mrb[51].mxu0  ;;  %5364 = vmatprep.subr.bf16.mxu0 %v6840_v62  ;;  %v6812_v21 = vcombine.high %v4986_v22, %v4990_v48  ;;  %v6811_v32 = vcombine.low %v4986_v22, %v4990_v48  ;;  %v7356_v27 = vld [vmem:[#allocation12 + $0x68] sm:$0xff]  }
 0x4d8   :  { %v7347_v40 = vld [vmem:[#allocation12] sm:$0xff]  }
 0x4da   :  { %5365 = vmatpush1.bf16.msra.mxu0 %v6839_v17  ;;  %v7346_v17 = vld [vmem:[#allocation12 + $0x40] sm:$0xff]  }
 0x4db   :  { %5366 = vmatprep.subr.bf16.mxu0 %v6848_v20  ;;  %v7349_v20 = vld [vmem:[#allocation12 + $0x8] sm:$0xff]  }
 0x4de   :  { %5367 = vmatpush1.bf16.msra.mxu0 %v6847_v26  ;;  %v7354_v26 = vld [vmem:[#allocation12 + $0x60] sm:$0xff]  }
 0x4df   :  { %5434 = vmatprep.subr.bf16.mxu0 %v6796_v8  ;;  %v7355_v8 = vld [vmem:[#allocation12 + $0x20] sm:$0xff]  }
 0x4e1   :  { %5385 = vmatmul.mubr.bf16.vlgmr.msra.gmra.mrb[76].mxu0 %v7952_v49 }
 0x4e2   :  { %5435 = vmatpush1.bf16.msra.mxu0 %v6795_v0  ;;  %5466 = vmatprep.mubr.bf16.mxu0 %v7576_v50  ;;  %v6836_v50 = vcombine.high %v5010_v53, %v5014_v36 }
 0x4e3   :  { %5436 = vmatprep.subr.bf16.mxu0 %v6804_v29  ;;  %v8043_v29 = vld [vmem:[#allocation10] sm:$0xff] }
 0x4e6   :  { %5437 = vmatpush1.bf16.msra.mxu0 %v6803_v15 }
 0x4e7   :  { %5438 = vmatprep.subr.bf16.mxu0 %v6812_v21 }
 0x4ea   :  { %5439 = vmatpush1.bf16.msra.mxu0 %v6811_v32 }
 0x4eb   :  { %5440 = vmatprep.subr.bf16.mxu0 %v6820_v30 }
 0x4ee   :  { %5441 = vmatpush1.bf16.msra.mxu0 %v6819_v33 }
 0x4ef   :  { %5442 = vmatprep.subr.bf16.mxu0 %v6828_v34 }
 0x4f2   :  { %v4870_v13 = vpop.f32.mrb[48].mxu1  ;;  %5443 = vmatpush1.bf16.msra.mxu0 %v6827_v57  ;;  %v7358_v57 = vld [vmem:[#allocation12 + $0x70] sm:$0xff]  }
 0x4f3   :  { %v8016_v37 = vadd.f32 %v4870_v13, %v7988_v9  ;;  %v4872_v44 = vpop.f32.mrb[49].mxu1  ;;  %5444 = vmatprep.subr.bf16.mxu0 %v6836_v50  ;;  %v7359_v13 = vld [vmem:[#allocation12 + $0x30] sm:$0xff]  }
 0x4f4   :  { %v8019_v39 = vadd.f32 %v4872_v44, %v7991_v16  ;;  %v3715_v6 = vpop.f32.mrb[52].mxu0  ;;  %v4874_v46 = vpop.f32.mrb[50].mxu1  ;;  %v6851_v16 = vcombine.low %v5026_v23, %v5030_v47  ;;  %v7332_v47 = vld [vmem:[#allocation12 + $0x1c8] sm:$0xff]  }
 0x4f5   :  { %v8022_v56 = vadd.f32 %v3715_v6, %v7994_v25  ;;  %v3717_v51 = vpop.f32.mrb[53].mxu0  ;;  %v4875_v52 = vpop.f32.mrb[51].mxu1  ;;  %v7331_v6 = vld [vmem:[#allocation12 + $0x180] sm:$0xff]   ;;  %v7361_v46 = vld [vmem:[#allocation12 + $0x38] sm:$0xff]  }
 0x4f6   :  { %v8025_v59 = vadd.f32 %v3717_v51, %v7997_v4  ;;  %v3719_v9 = vpop.f32.mrb[54].mxu0  ;;  %5445 = vmatpush1.bf16.msra.mxu0 %v6835_v42  ;;  %v7333_v51 = vld [vmem:[#allocation12 + $0x188] sm:$0xff]   ;;  %v7334_v52 = vld [vmem:[#allocation12 + $0x1d0] sm:$0xff]  }
 0x4f7   :  { %v3720_v55 = vpop.f32.mrb[55].mxu0  ;;  %5446 = vmatprep.subr.bf16.mxu0 %v6844_v43  ;;  %v7360_v43 = vld [vmem:[#allocation12 + $0x78] sm:$0xff]  }
 0x4f8   :  { %v7336_v9 = vld [vmem:[#allocation12 + $0x1d8] sm:$0xff]   ;;  %v7338_v55 = vld [vmem:[#allocation12 + $0x1e0] sm:$0xff]  }
 0x4fa   :  { %5447 = vmatpush1.bf16.msra.mxu0 %v6843_v54  ;;  %v7337_v54 = vld [vmem:[#allocation12 + $0x198] sm:$0xff]  }
 0x4fb   :  { %5448 = vmatprep.subr.bf16.mxu0 %v6852_v60  ;;  %v7339_v60 = vld [vmem:[#allocation12 + $0x1a0] sm:$0xff]  }
 0x4fe   :  { %5449 = vmatpush1.bf16.msra.mxu0 %v6851_v16  ;;  %v7340_v16 = vld [vmem:[#allocation12 + $0x1e8] sm:$0xff]  }
 0x4ff   :  { %6996 = vmatprep.subr.bf16.mxu0 %v7346_v17 }
 0x501   :  { %5467 = vmatmul.mubr.bf16.vlgmr.msra.gmra.mrb[80].mxu0 %v7952_v49 }
 0x502   :  { %6997 = vmatpush3.bf16.msra.mxu0 %v7347_v40 }
 0x512   :  { %v4952_v61 = vpop.f32.mrb[52].mxu1 }
 0x513   :  { %v8029_v25 = vadd.f32 %v4952_v61, %v8002_v58  ;;  %v4954_v62 = vpop.f32.mrb[53].mxu1  ;;  %v7348_v58 = vld [vmem:[#allocation12 + $0x48] sm:$0xff]  }
 0x514   :  { %v8032_v4 = vadd.f32 %v4954_v62, %v8005_v5  ;;  %v3797_v63 = vpop.f32.mrb[56].mxu0  ;;  %v4956_v11 = vpop.f32.mrb[54].mxu1  ;;  %6998 = vmatprep.subr.bf16.mxu0 %v7348_v58  ;;  %v7350_v5 = vld [vmem:[#allocation12 + $0x50] sm:$0xff]   ;;  %v7341_v62 = vld [vmem:[#allocation12 + $0x1a8] sm:$0xff]   ;;  %v7344_v58 = vld [vmem:[#allocation12 + $0x1f8] sm:$0xff]  }
 0x515   :  { %v8035_v1 = vadd.f32 %v3797_v63, %v8008_v24  ;;  %v3799_v3 = vpop.f32.mrb[57].mxu0  ;;  %v4957_v10 = vpop.f32.mrb[55].mxu1  ;;  %6999 = vmatpush3.bf16.msra.mxu0 %v7349_v20  ;;  %v7352_v24 = vld [vmem:[#allocation12 + $0x58] sm:$0xff]   ;;  %v7342_v11 = vld [vmem:[#allocation12 + $0x1f0] sm:$0xff]  }
 0x516   :  { %v8038_v18 = vadd.f32 %v3799_v3, %v8011_v14  ;;  %v3801_v28 = vpop.f32.mrb[58].mxu0  ;;  %7000 = vmatprep.subr.bf16.mxu0 %v7350_v5  ;;  %v5526_v14 = vlaneseq }
 0x517   :  { %v3802_v49 = vpop.f32.mrb[59].mxu0 }
 0x518   :  { %v8040_v19 = vshrl.u32 %v5526_v14, 7  ;;  %v7343_v49 = vld [vmem:[#allocation12 + $0x1b0] sm:$0xff]  }
 0x519   :  { %7001 = vmatpush3.bf16.msra.mxu0 %v7351_v12 }
 0x51a   :  { %7002 = vmatprep.subr.bf16.mxu0 %v7352_v24  ;;  %v5536_v0 = vsub.s32 2, %v8040_v19  ;;  %v5540_v22 = vsub.s32 3, %v8040_v19  ;;  %v5552_v61 = vsub.s32 6, %v8040_v19  ;;  %v5556_v63 = vsub.s32 7, %v8040_v19 }
 0x51c   :  { %v5537_v48 = vrot.slane %v8043_v29, %v5536_v0  ;;  %v5541_v21 = vrot.slane %v8043_v29, %v5540_v22  ;;  %v5553_v3 = vrot.slane %v8043_v29, %v5552_v61  ;;  %v5557_v28 = vrot.slane %v8043_v29, %v5556_v63  ;;  %v7345_v22 = vld [vmem:[#allocation12 + $0x1b8] sm:$0xff]   ;;  %v7370_v61 = vld [vmem:[#allocation12 + $0x160] sm:$0xff]   ;;  %v7372_v63 = vld [vmem:[#allocation12 + $0x168] sm:$0xff]  }
 0x51d   :  { %7003 = vmatpush3.bf16.msra.mxu0 %v7353_v45 }
 0x51e   :  { %7004 = vmatprep.subr.bf16.mxu0 %v7354_v26 }
 0x521   :  { %7005 = vmatpush3.bf16.msra.mxu0 %v7355_v8 }
 0x522   :  { %7006 = vmatprep.subr.bf16.mxu0 %v7356_v27 }
 0x525   :  { %7007 = vmatpush3.bf16.msra.mxu0 %v7357_v31 }
 0x526   :  { %7008 = vmatprep.subr.bf16.mxu0 %v7358_v57 }
 0x529   :  { %7009 = vmatpush3.bf16.msra.mxu0 %v7359_v13 }
 0x52a   :  { %7010 = vmatprep.subr.bf16.mxu0 %v7360_v43 }
 0x52d   :  { %7011 = vmatpush3.bf16.msra.mxu0 %v7361_v46 }
 0x532   :  { %v5427_v15 = vpop.f32.mrb[56].mxu1 }
 0x533   :  { %v5518_v2 = vadd.f32 %v5427_v15, %v8016_v37  ;;  %v5429_v32 = vpop.f32.mrb[57].mxu1 }
 0x534   :  { %v5519_v30 = vadd.f32 %v5429_v32, %v8019_v39  ;;  %v4272_v35 = vpop.f32.mrb[60].mxu0  ;;  %v5431_v7 = vpop.f32.mrb[58].mxu1 }
 0x535   :  { %v5568_v33 = vadd.f32 %v5537_v48, %v5518_v2  ;;  %v8051_v34 = vadd.f32 %v4272_v35, %v8022_v56  ;;  %v4274_v53 = vpop.f32.mrb[61].mxu0  ;;  %v5432_v36 = vpop.f32.mrb[59].mxu1  ;;  %v7362_v56 = vld [vmem:[#allocation12 + $0x140] sm:$0xff]  }
 0x536   :  { %v5569_v50 = vadd.f32 %v5541_v21, %v5519_v30  ;;  %v8054_v38 = vadd.f32 %v4274_v53, %v8025_v59  ;;  %v4276_v41 = vpop.f32.mrb[62].mxu0  ;;  %7040 = vmatprep.subr.bf16.mxu0 %v7362_v56  ;;  %v7335_v59 = vld [vmem:[#allocation12 + $0x190] sm:$0xff]  }
 0x537   :  { %v5576_v42 = vmax.f32 %v5568_v33, 0.0  ;;  %v4277_v37 = vpop.f32.mrb[63].mxu0  ;;  %v5532_v41 = vsub.s32 1, %v8040_v19 }
 0x538   :  { %v5577_v44 = vmax.f32 %v5569_v50, 0.0  ;;  %v5528_v50 = vsub.s32 0, %v8040_v19 }
 0x539   :  { %v5584_v23 = vpack.c.bf16 %v5576_v42, %v5576_v42 }
 0x53a   :  { %v5585_v39 = vpack.c.bf16 %v5577_v44, %v5577_v44  ;;  %v5529_v13 = vrot.slane %v8043_v29, %v5528_v50 }
 0x53c   :  { %6181 = vmatprep.mubr.bf16.mxu1 %v5585_v39 }
 0x53d   :  { %6182 = vmatmul.mubr.bf16.vlgmr.msra.gmra.mrb[64].mxu1 %v5584_v23 }
 0x53e   :  { %7063 = vmatpush3.bf16.msra.mxu1 %v7331_v6 }
 0x53f   :  { %7064 = vmatprep.subr.bf16.mxu1 %v7332_v47 }
 0x542   :  { %7065 = vmatpush3.bf16.msra.mxu1 %v7333_v51  ;;  %v7363_v51 = vld [vmem:[#allocation12 + $0x100] sm:$0xff]  }
 0x543   :  { %7066 = vmatprep.subr.bf16.mxu1 %v7334_v52 }
 0x546   :  { %7067 = vmatpush3.bf16.msra.mxu1 %v7335_v59  ;;  %v7364_v59 = vld [vmem:[#allocation12 + $0x148] sm:$0xff]  }
 0x547   :  { %7068 = vmatprep.subr.bf16.mxu1 %v7336_v9  ;;  %v7365_v9 = vld [vmem:[#allocation12 + $0x108] sm:$0xff]  }
 0x54a   :  { %7069 = vmatpush3.bf16.msra.mxu1 %v7337_v54  ;;  %v7366_v54 = vld [vmem:[#allocation12 + $0x150] sm:$0xff]  }
 0x54b   :  { %7070 = vmatprep.subr.bf16.mxu1 %v7338_v55  ;;  %v7367_v55 = vld [vmem:[#allocation12 + $0x110] sm:$0xff]  }
 0x54e   :  { %7071 = vmatpush3.bf16.msra.mxu1 %v7339_v60  ;;  %v7368_v60 = vld [vmem:[#allocation12 + $0x158] sm:$0xff]  }
 0x54f   :  { %7072 = vmatprep.subr.bf16.mxu1 %v7340_v16  ;;  %v7369_v16 = vld [vmem:[#allocation12 + $0x118] sm:$0xff]  }
 0x552   :  { %v5509_v10 = vpop.f32.mrb[60].mxu1  ;;  %7073 = vmatpush3.bf16.msra.mxu1 %v7341_v62  ;;  %v7371_v62 = vld [vmem:[#allocation12 + $0x120] sm:$0xff]  }
 0x553   :  { %v5522_v17 = vadd.f32 %v5509_v10, %v8029_v25  ;;  %v5511_v40 = vpop.f32.mrb[61].mxu1  ;;  %7074 = vmatprep.subr.bf16.mxu1 %v7342_v11  ;;  %v5544_v11 = vsub.s32 4, %v8040_v19  ;;  %v5548_v10 = vsub.s32 5, %v8040_v19  ;;  %v7377_v19 = vld [vmem:[#allocation12 + $0x138] sm:$0xff]  }
 0x554   :  { %v5523_v20 = vadd.f32 %v5511_v40, %v8032_v4  ;;  %v4354_v5 = vpop.f32.mrb[64].mxu0  ;;  %v5513_v12 = vpop.f32.mrb[62].mxu1 }
 0x555   :  { %v5572_v24 = vadd.f32 %v5553_v3, %v5522_v17  ;;  %v4406_v45 = vadd.f32 %v4354_v5, %v8035_v1  ;;  %v4356_v26 = vpop.f32.mrb[65].mxu0  ;;  %v5514_v14 = vpop.f32.mrb[63].mxu1  ;;  %v7373_v3 = vld [vmem:[#allocation12 + $0x128] sm:$0xff]   ;;  %v5549_v40 = vrot.slane %v8043_v29, %v5548_v10  ;;  %v7376_v12 = vld [vmem:[#allocation12 + $0x178] sm:$0xff]  }
 0x556   :  { %v5573_v8 = vadd.f32 %v5557_v28, %v5523_v20  ;;  %v4407_v27 = vadd.f32 %v4356_v26, %v8038_v18  ;;  %v4358_v0 = vpop.f32.mrb[66].mxu0  ;;  %7075 = vmatpush3.bf16.msra.mxu1 %v7343_v49  ;;  %v7374_v28 = vld [vmem:[#allocation12 + $0x170] sm:$0xff]   ;;  %v5545_v49 = vrot.slane %v8043_v29, %v5544_v11 }
 0x557   :  { %v5580_v48 = vmax.f32 %v5572_v24, 0.0  ;;  %v4359_v25 = vpop.f32.mrb[67].mxu0  ;;  %7076 = vmatprep.subr.bf16.mxu1 %v7344_v58  ;;  %v7375_v58 = vld [vmem:[#allocation12 + $0x130] sm:$0xff]  }
 0x558   :  { %v5581_v15 = vmax.f32 %v5573_v8, 0.0 }
 0x559   :  { %v5588_v4 = vpack.c.bf16 %v5580_v48, %v5580_v48 }
 0x55a   :  { %v5589_v21 = vpack.c.bf16 %v5581_v15, %v5581_v15  ;;  %7077 = vmatpush3.bf16.msra.mxu1 %v7345_v22 }
 0x55c   :  { %6261 = vmatprep.mubr.bf16.mxu1 %v5589_v21 }
 0x55d   :  { %6262 = vmatmul.mubr.bf16.vlgmr.msra.gmra.mrb[68].mxu1 %v5588_v4 }
 0x574   :  { %v4829_v31 = vpop.f32.mrb[68].mxu0 }
 0x575   :  { %v4959_v1 = vadd.f32 %v4829_v31, %v8051_v34  ;;  %v4831_v2 = vpop.f32.mrb[69].mxu0  ;;  %v5533_v34 = vrot.slane %v8043_v29, %v5532_v41 }
 0x576   :  { %v4960_v32 = vadd.f32 %v4831_v2, %v8054_v38  ;;  %v4833_v30 = vpop.f32.mrb[70].mxu0 }
 0x577   :  { %v4834_v18 = vpop.f32.mrb[71].mxu0 }
 0x594   :  { %v4911_v35 = vpop.f32.mrb[72].mxu0 }
 0x595   :  { %v4963_v7 = vadd.f32 %v4911_v35, %v4406_v45  ;;  %v4913_v33 = vpop.f32.mrb[73].mxu0  ;;  %v6855_v35 = vld [vmem:[#allocation13] ss:$0 sm:$0xff] }
 0x596   :  { %v4964_v53 = vadd.f32 %v4913_v33, %v4407_v27  ;;  %v4915_v36 = vpop.f32.mrb[74].mxu0 }
 0x597   :  { %v4916_v57 = vpop.f32.mrb[75].mxu0 }
 0x5b4   :  { %v5386_v42 = vpop.f32.mrb[76].mxu0 }
 0x5b5   :  { %v5516_v37 = vadd.f32 %v5386_v42, %v4959_v1  ;;  %v5388_v44 = vpop.f32.mrb[77].mxu0 }
 0x5b6   :  { %v5517_v38 = vadd.f32 %v5388_v44, %v4960_v32  ;;  %v5390_v43 = vpop.f32.mrb[78].mxu0 }
 0x5b7   :  { %v5566_v39 = vadd.f32 %v5529_v13, %v5516_v37  ;;  %v5391_v6 = vpop.f32.mrb[79].mxu0 }
 0x5b8   :  { %v5567_v46 = vadd.f32 %v5533_v34, %v5517_v38 }
 0x5b9   :  { %v5574_v23 = vmax.f32 %v5566_v39, 0.0 }
 0x5ba   :  { %v5575_v47 = vmax.f32 %v5567_v46, 0.0 }
 0x5bb   :  { %v5582_v52 = vpack.c.bf16 %v5574_v23, %v5574_v23 }
 0x5bc   :  { %v5583_v56 = vpack.c.bf16 %v5575_v47, %v5575_v47 }
 0x5be   :  { %6141 = vmatprep.mubr.bf16.mxu0 %v5583_v56 }
 0x5bf   :  { %6142 = vmatmul.mubr.bf16.vlgmr.msra.gmra.mrb[84].mxu0 %v5582_v52 }
 0x5c0   :  { %7041 = vmatpush3.bf16.msra.mxu0 %v7363_v51 }
 0x5c1   :  { %7042 = vmatprep.subr.bf16.mxu0 %v7364_v59 }
 0x5c4   :  { %7043 = vmatpush3.bf16.msra.mxu0 %v7365_v9 }
 0x5c5   :  { %7044 = vmatprep.subr.bf16.mxu0 %v7366_v54 }
 0x5c8   :  { %7045 = vmatpush3.bf16.msra.mxu0 %v7367_v55 }
 0x5c9   :  { %7046 = vmatprep.subr.bf16.mxu0 %v7368_v60 }
 0x5cc   :  { %7047 = vmatpush3.bf16.msra.mxu0 %v7369_v16 }
 0x5cd   :  { %7048 = vmatprep.subr.bf16.mxu0 %v7370_v61 }
 0x5d0   :  { %7049 = vmatpush3.bf16.msra.mxu0 %v7371_v62 }
 0x5d1   :  { %7050 = vmatprep.subr.bf16.mxu0 %v7372_v63 }
 0x5d4   :  { %v5468_v17 = vpop.f32.mrb[80].mxu0  ;;  %7051 = vmatpush3.bf16.msra.mxu0 %v7373_v3 }
 0x5d5   :  { %v5520_v20 = vadd.f32 %v5468_v17, %v4963_v7  ;;  %v5470_v5 = vpop.f32.mrb[81].mxu0  ;;  %7052 = vmatprep.subr.bf16.mxu0 %v7374_v28 }
 0x5d6   :  { %v5521_v24 = vadd.f32 %v5470_v5, %v4964_v53  ;;  %v5472_v45 = vpop.f32.mrb[82].mxu0 }
 0x5d7   :  { %v5570_v26 = vadd.f32 %v5545_v49, %v5520_v20  ;;  %v5473_v14 = vpop.f32.mrb[83].mxu0 }
 0x5d8   :  { %v5571_v8 = vadd.f32 %v5549_v40, %v5521_v24  ;;  %7053 = vmatpush3.bf16.msra.mxu0 %v7375_v58 }
 0x5d9   :  { %v5578_v27 = vmax.f32 %v5570_v26, 0.0  ;;  %7054 = vmatprep.subr.bf16.mxu0 %v7376_v12 }
 0x5da   :  { %v5579_v0 = vmax.f32 %v5571_v8, 0.0 }
 0x5db   :  { %v5586_v48 = vpack.c.bf16 %v5578_v27, %v5578_v27 }
 0x5dc   :  { %v5587_v22 = vpack.c.bf16 %v5579_v0, %v5579_v0  ;;  %7055 = vmatpush3.bf16.msra.mxu0 %v7377_v19 }
 0x5de   :  { %6221 = vmatprep.mubr.bf16.mxu0 %v5587_v22 }
 0x5df   :  { %6222 = vmatmul.mubr.bf16.vlgmr.msra.gmra.mrb[88].mxu0 %v5586_v48 }
 0x610   :  { %v7034_v29 = vpop.f32.mrb[64].mxu1 }
 0x611   :  { %v7035_v25 = vpop.f32.mrb[65].mxu1 }
 0x612   :  { %v7036_v15 = vadd.f32 %v7035_v25, %v7034_v29  ;;  %v7037_v21 = vpop.f32.mrb[66].mxu1 }
 0x613   :  { %v7038_v4 = vpop.f32.mrb[67].mxu1 }
 0x630   :  { %v7078_v31 = vpop.f32.mrb[68].mxu1 }
 0x631   :  { %v7079_v1 = vpop.f32.mrb[69].mxu1 }
 0x632   :  { %v7080_v2 = vadd.f32 %v7079_v1, %v7078_v31  ;;  %v7081_v32 = vpop.f32.mrb[70].mxu1 }
 0x633   :  { %v7082_v30 = vpop.f32.mrb[71].mxu1 }
 0x692   :  { %v7012_v18 = vpop.f32.mrb[84].mxu0 }
 0x693   :  { %v7013_v7 = vpop.f32.mrb[85].mxu0 }
 0x694   :  { %v7014_v33 = vadd.f32 %v7013_v7, %v7012_v18  ;;  %v7015_v53 = vpop.f32.mrb[86].mxu0 }
 0x695   :  { %v7016_v36 = vpop.f32.mrb[87].mxu0 }
 0x696   :  { %v6144_v57 = vadd.f32 %v7014_v33, %v6855_v35 }
 0x698   :  { %v6184_v50 = vadd.f32 %v7036_v15, %v6144_v57 }
 0x6b2   :  { %v7056_v41 = vpop.f32.mrb[88].mxu0 }
 0x6b3   :  { %v7057_v13 = vpop.f32.mrb[89].mxu0 }
 0x6b4   :  { %v7058_v42 = vadd.f32 %v7057_v13, %v7056_v41  ;;  %v7059_v34 = vpop.f32.mrb[90].mxu0 }
 0x6b5   :  { %v7060_v37 = vpop.f32.mrb[91].mxu0 }
 0x6b6   :  { %v6224_v44 = vadd.f32 %v7058_v42, %v6184_v50 }
 0x6b8   :  { %v6264_v38 = vadd.f32 %v7080_v2, %v6224_v44 }
 0x6ba   :  { %6269 = vst [vmem:[%s8086_s9] sm:$0xff] %v6264_v38 }
 0x6bb   :  { %6274 = vsyncpa [#allocation3], 1 }
 0x6bc   :  { %6275 = vsyncpa [#allocation5], 1 }
 0x6bd   :  { %6276 = vsyncpa [#allocation8], 1 }
 0x6be   :  { %6277 = vsyncpa [#allocation11], 1 }
 0x6bf   :  { %6278 = vsyncpa [#allocation14], 1 }

</bundles_post_ra>
